<compile_context>
chip_gen: v6e
topology: v6e:2x2x1
jax: 0.10.0
libtpu: 0.0.40
codegen_flags: <defaults>
</compile_context>

<pallas_src>
import functools

import jax
import jax.numpy as jnp
from jax.experimental import pallas as pl
from jax.experimental.pallas import tpu as pltpu

EPS = 1e-5
LANES = 128          # lane-dense channel padding target
ROW_TILE = 1024      # M-axis tile (rows of the flattened N*H*W axis)
VMEM_LIMIT = 32 * 1024 * 1024   # conservative scoped-VMEM budget (safe on v7x's 64 MiB)


def _round_up(x, m):
    return (x + m - 1) // m * m


def _grid_rows(m):
    tm = ROW_TILE if m >= ROW_TILE else _round_up(m, 16)
    return tm, pl.cdiv(m, tm)


def _compiler_params():
    return pltpu.CompilerParams(dimension_semantics=("parallel",),
                                vmem_limit_bytes=VMEM_LIMIT)


# ----------------------------- Pallas kernels ------------------------------ #

def _conv1_kernel(x_ref, w_ref, y_ref, st_ref, *, n_rows, block_rows):
    """1x1 conv as tiled matmul (bf16 in, f32 acc) + per-tile BN partial stats."""
    i = pl.program_id(0)
    y = jnp.dot(x_ref[...], w_ref[...], preferred_element_type=jnp.float32)
    y_ref[...] = y
    rows = jax.lax.broadcasted_iota(jnp.int32, (block_rows, 1), 0) + i * block_rows
    ym = jnp.where(rows < n_rows, y, 0.0)                       # mask ragged tail rows
    st_ref[0] = jnp.concatenate(
        [jnp.sum(ym, axis=0, keepdims=True),
         jnp.sum(ym * ym, axis=0, keepdims=True)], axis=0)


def _conv2_kernel(zs_ref, mask_ref, a_ref, c_ref, w_ref, y_ref, st_ref,
                  *, ho, wo, cin, stride):
    """Fused [BN1-apply + ReLU] + 3x3 (strided) conv as 9 accumulated matmuls + stats.

    zs_ref holds the *raw* conv1 output for one image, spatially zero-padded and
    space-to-depth packed by the stride (channel index = (ph*stride+pw)*cin + c),
    so every tap window is a plain (non-strided) slice.
    """
    z = jnp.maximum(zs_ref[0] * a_ref[...] + c_ref[...], 0.0) * mask_ref[...]
    zb = z.astype(jnp.bfloat16)
    cout = w_ref.shape[2]
    acc = jnp.zeros((ho * wo, cout), jnp.float32)
    for dh in range(3):
        for dw in range(3):
            ph, pw = dh % stride, dw % stride
            blk = (ph * stride + pw) * cin
            win = zb[dh // stride: dh // stride + ho,
                     dw // stride: dw // stride + wo,
                     blk: blk + cin]
            acc = acc + jnp.dot(win.reshape(ho * wo, cin), w_ref[dh * 3 + dw],
                                preferred_element_type=jnp.float32)
    y_ref[0] = acc
    st_ref[0] = jnp.concatenate(
        [jnp.sum(acc, axis=0, keepdims=True),
         jnp.sum(acc * acc, axis=0, keepdims=True)], axis=0)


def _conv3_kernel(y2_ref, a_ref, c_ref, w3_ref, *rest, n_rows, block_rows, with_ds):
    """Fused [BN2-apply + ReLU] + 1x1 conv3 (+ fused downsample 1x1 conv) + stats."""
    if with_ds:
        id_ref, wd_ref, y3_ref, s3_ref, yd_ref, sd_ref = rest
    else:
        y3_ref, s3_ref = rest
    i = pl.program_id(0)
    rows = jax.lax.broadcasted_iota(jnp.int32, (block_rows, 1), 0) + i * block_rows
    valid = rows < n_rows

    z = jnp.maximum(y2_ref[...] * a_ref[...] + c_ref[...], 0.0).astype(jnp.bfloat16)
    y3 = jnp.dot(z, w3_ref[...], preferred_element_type=jnp.float32)
    y3_ref[...] = y3
    y3m = jnp.where(valid, y3, 0.0)
    s3_ref[0] = jnp.concatenate(
        [jnp.sum(y3m, axis=0, keepdims=True),
         jnp.sum(y3m * y3m, axis=0, keepdims=True)], axis=0)

    if with_ds:
        yd = jnp.dot(id_ref[...], wd_ref[...], preferred_element_type=jnp.float32)
        yd_ref[...] = yd
        ydm = jnp.where(valid, yd, 0.0)
        sd_ref[0] = jnp.concatenate(
            [jnp.sum(ydm, axis=0, keepdims=True),
             jnp.sum(ydm * ydm, axis=0, keepdims=True)], axis=0)


def _epilogue_kernel(y3_ref, a3_ref, c3_ref, res_ref, *rest, with_ds):
    """Final fused BN3-apply + (BNd-apply of downsample | identity) + add + ReLU."""
    if with_ds:
        ad_ref, cd_ref, o_ref = rest
        res = res_ref[...] * ad_ref[...] + cd_ref[...]
    else:
        (o_ref,) = rest
        res = res_ref[...]
    o_ref[...] = jnp.maximum(y3_ref[...] * a3_ref[...] + c3_ref[...] + res, 0.0)


# --------------------------- pallas_call wrappers --------------------------- #

def conv1x1_stats(x2d, w):
    m, kin = x2d.shape
    cout = w.shape[1]
    tm, g = _grid_rows(m)
    kern = functools.partial(_conv1_kernel, n_rows=m, block_rows=tm)
    return pl.pallas_call(
        kern,
        grid=(g,),
        in_specs=[pl.BlockSpec((tm, kin), lambda i: (i, 0)),
                  pl.BlockSpec((kin, cout), lambda i: (0, 0))],
        out_specs=[pl.BlockSpec((tm, cout), lambda i: (i, 0)),
                   pl.BlockSpec((1, 2, cout), lambda i: (i, 0, 0))],
        out_shape=[jax.ShapeDtypeStruct((m, cout), jnp.float32),
                   jax.ShapeDtypeStruct((g, 2, cout), jnp.float32)],
        compiler_params=_compiler_params(),
        cost_estimate=pl.CostEstimate(
            flops=2 * m * kin * cout, transcendentals=0,
            bytes_accessed=x2d.size * 2 + w.size * 2 + m * cout * 4),
    )(x2d, w)


def conv3x3_stats(y1s, mask, a1t, c1t, w2m, *, ho, wo, cin, stride):
    n, hs, ws, cs = y1s.shape
    cout = w2m.shape[2]
    kern = functools.partial(_conv2_kernel, ho=ho, wo=wo, cin=cin, stride=stride)
    return pl.pallas_call(
        kern,
        grid=(n,),
        in_specs=[pl.BlockSpec((1, hs, ws, cs), lambda i: (i, 0, 0, 0)),
                  pl.BlockSpec((hs, ws, cs), lambda i: (0, 0, 0)),
                  pl.BlockSpec((1, 1, cs), lambda i: (0, 0, 0)),
                  pl.BlockSpec((1, 1, cs), lambda i: (0, 0, 0)),
                  pl.BlockSpec((9, cin, cout), lambda i: (0, 0, 0))],
        out_specs=[pl.BlockSpec((1, ho * wo, cout), lambda i: (i, 0, 0)),
                   pl.BlockSpec((1, 2, cout), lambda i: (i, 0, 0))],
        out_shape=[jax.ShapeDtypeStruct((n, ho * wo, cout), jnp.float32),
                   jax.ShapeDtypeStruct((n, 2, cout), jnp.float32)],
        compiler_params=_compiler_params(),
        cost_estimate=pl.CostEstimate(
            flops=2 * n * ho * wo * 9 * cin * cout, transcendentals=0,
            bytes_accessed=y1s.size * 4 + mask.size * 4 + w2m.size * 2
            + n * ho * wo * cout * 4),
    )(y1s, mask, a1t, c1t, w2m)


def conv3_and_downsample(y2f, a2, c2, w3, ids=None, wd=None):
    with_ds = ids is not None
    m, cin = y2f.shape
    cout = w3.shape[1]
    tm, g = _grid_rows(m)
    kern = functools.partial(_conv3_kernel, n_rows=m, block_rows=tm, with_ds=with_ds)

    row_in = pl.BlockSpec((tm, cin), lambda i: (i, 0))
    vec = pl.BlockSpec((1, cin), lambda i: (0, 0))
    w_spec = pl.BlockSpec((cin, cout), lambda i: (0, 0))
    row_out = pl.BlockSpec((tm, cout), lambda i: (i, 0))
    st_spec = pl.BlockSpec((1, 2, cout), lambda i: (i, 0, 0))

    in_specs = [row_in, vec, vec, w_spec]
    args = [y2f, a2, c2, w3]
    out_specs = [row_out, st_spec]
    out_shape = [jax.ShapeDtypeStruct((m, cout), jnp.float32),
                 jax.ShapeDtypeStruct((g, 2, cout), jnp.float32)]
    flops = 2 * m * cin * cout
    bytes_acc = y2f.size * 4 + w3.size * 2 + m * cout * 4
    if with_ds:
        cid = ids.shape[1]
        in_specs += [pl.BlockSpec((tm, cid), lambda i: (i, 0)),
                     pl.BlockSpec((cid, cout), lambda i: (0, 0))]
        args += [ids, wd]
        out_specs += [row_out, st_spec]
        out_shape += [jax.ShapeDtypeStruct((m, cout), jnp.float32),
                      jax.ShapeDtypeStruct((g, 2, cout), jnp.float32)]
        flops += 2 * m * cid * cout
        bytes_acc += ids.size * 2 + wd.size * 2 + m * cout * 4
    return pl.pallas_call(
        kern, grid=(g,), in_specs=in_specs, out_specs=out_specs, out_shape=out_shape,
        compiler_params=_compiler_params(),
        cost_estimate=pl.CostEstimate(flops=flops, transcendentals=0,
                                      bytes_accessed=bytes_acc),
    )(*args)


def epilogue(y3, a3, c3, res, ad=None, cd=None):
    with_ds = ad is not None
    m, cout = y3.shape
    tm, g = _grid_rows(m)
    kern = functools.partial(_epilogue_kernel, with_ds=with_ds)
    row = pl.BlockSpec((tm, cout), lambda i: (i, 0))
    vec = pl.BlockSpec((1, cout), lambda i: (0, 0))
    in_specs = [row, vec, vec, pl.BlockSpec((tm, res.shape[1]), lambda i: (i, 0))]
    args = [y3, a3, c3, res]
    if with_ds:
        in_specs += [vec, vec]
        args += [ad, cd]
    return pl.pallas_call(
        kern, grid=(g,), in_specs=in_specs,
        out_specs=row,
        out_shape=jax.ShapeDtypeStruct((m, cout), jnp.float32),
        compiler_params=_compiler_params(),
    )(*args)


# ------------------------------ glue (plain JAX) ---------------------------- #

def _pad1(v, c, fill):
    return jnp.pad(v, (0, c - v.shape[0]), constant_values=fill).astype(jnp.float32)


def _pad2(w, r, c):
    return jnp.pad(w, ((0, r - w.shape[0]), (0, c - w.shape[1])))


def _bn_coeffs(stats, count, gamma_p, beta_p):
    """Turn per-tile (sum, sumsq) partials into per-channel scale/shift (f32)."""
    ssum = jnp.sum(stats[:, 0, :], axis=0)
    ssq = jnp.sum(stats[:, 1, :], axis=0)
    mean = ssum / count
    var = jnp.maximum(ssq / count - mean * mean, 0.0)
    a = gamma_p * jax.lax.rsqrt(var + EPS)
    c = beta_p - mean * a
    return a.reshape(1, -1), c.reshape(1, -1)


def init_block_params(key, in_channels, inter_channels):
    """Deterministic synthetic parameters, stored in PyTorch layouts (OIHW for convs)."""
    out_c = inter_channels * 4
    ks = jax.random.split(key, 12)
    p = {
        "w1": jax.random.normal(ks[0], (inter_channels, in_channels, 1, 1), jnp.float32) * 0.1,
        "w2": jax.random.normal(ks[1], (inter_channels, inter_channels, 3, 3), jnp.float32) * 0.1,
        "w3": jax.random.normal(ks[2], (out_c, inter_channels, 1, 1), jnp.float32) * 0.1,
        "wd": jax.random.normal(ks[3], (out_c, in_channels, 1, 1), jnp.float32) * 0.1,
        "g1": 1.0 + 0.1 * jax.random.normal(ks[4], (inter_channels,), jnp.float32),
        "b1": 0.1 * jax.random.normal(ks[5], (inter_channels,), jnp.float32),
        "g2": 1.0 + 0.1 * jax.random.normal(ks[6], (inter_channels,), jnp.float32),
        "b2": 0.1 * jax.random.normal(ks[7], (inter_channels,), jnp.float32),
        "g3": 1.0 + 0.1 * jax.random.normal(ks[8], (out_c,), jnp.float32),
        "b3": 0.1 * jax.random.normal(ks[9], (out_c,), jnp.float32),
        "gd": 1.0 + 0.1 * jax.random.normal(ks[10], (out_c,), jnp.float32),
        "bd": 0.1 * jax.random.normal(ks[11], (out_c,), jnp.float32),
    }
    return p


@functools.partial(jax.jit, static_argnums=(2, 3, 4))
def block_forward(x_nchw, p, in_channels, inter_channels, stride):
    n, cin, h, w = x_nchw.shape
    out_c = inter_channels * 4
    s = stride

    # lane-dense channel padding (multiple of 128 lanes)
    cp_in = _round_up(cin, LANES)
    cp_mid = _round_up(inter_channels, LANES)
    cp_out = _round_up(out_c, LANES)

    # NCHW -> NHWC once at the boundary (public API is PyTorch-layout)
    x = jnp.transpose(x_nchw, (0, 2, 3, 1))
    xpad = jnp.pad(x, ((0, 0), (0, 0), (0, 0), (0, cp_in - cin)))      # f32, padded C
    x_bf = xpad.astype(jnp.bfloat16)
    m1 = n * h * w
    x2d = x_bf.reshape(m1, cp_in)

    # weights: PyTorch OIHW -> (K, Cout) matmul layout, channel-padded, bf16
    bf16 = jnp.bfloat16
    w1 = _pad2(p["w1"].reshape(inter_channels, cin).T, cp_in, cp_mid).astype(bf16)
    w2m = jnp.transpose(p["w2"], (2, 3, 1, 0)).reshape(9, inter_channels, inter_channels)
    w2m = jnp.pad(w2m, ((0, 0), (0, cp_mid - inter_channels),
                        (0, cp_mid - inter_channels))).astype(bf16)
    w3 = _pad2(p["w3"].reshape(out_c, inter_channels).T, cp_mid, cp_out).astype(bf16)
    wd = _pad2(p["wd"].reshape(out_c, cin).T, cp_in, cp_out).astype(bf16)

    g1 = _pad1(p["g1"], cp_mid, 1.0); b1 = _pad1(p["b1"], cp_mid, 0.0)
    g2 = _pad1(p["g2"], cp_mid, 1.0); b2 = _pad1(p["b2"], cp_mid, 0.0)
    g3 = _pad1(p["g3"], cp_out, 1.0); b3 = _pad1(p["b3"], cp_out, 0.0)
    gd = _pad1(p["gd"], cp_out, 1.0); bd = _pad1(p["bd"], cp_out, 0.0)

    # ---- stage 1: conv1 (1x1) + BN1 partial stats ----
    y1, st1 = conv1x1_stats(x2d, w1)                       # (M1, cp_mid) f32 raw
    a1, c1 = _bn_coeffs(st1, m1, g1, b1)

    # ---- stage 2: [BN1+ReLU fused] conv2 (3x3, stride, pad=1) + BN2 stats ----
    ho = (h + 2 - 3) // s + 1
    wo = (w + 2 - 3) // s + 1
    hp = _round_up(h + 2, s)
    wp = _round_up(w + 2, s)
    y1p = jnp.pad(y1.reshape(n, h, w, cp_mid),
                  ((0, 0), (1, hp - h - 1), (1, wp - w - 1), (0, 0)))
    hs, ws = hp // s, wp // s
    cs = cp_mid * s * s
    # space-to-depth by the stride: tap windows become plain slices in the kernel
    y1s = y1p.reshape(n, hs, s, ws, s, cp_mid).transpose(0, 1, 3, 2, 4, 5) \
             .reshape(n, hs, ws, cs)
    rr = jnp.arange(hp)[:, None]
    cc = jnp.arange(wp)[None, :]
    interior = ((rr >= 1) & (rr <= h) & (cc >= 1) & (cc <= w))
    mask = jnp.broadcast_to(interior[:, :, None], (hp, wp, cp_mid)).astype(jnp.float32)
    mask = mask.reshape(hs, s, ws, s, cp_mid).transpose(0, 2, 1, 3, 4).reshape(hs, ws, cs)
    a1t = jnp.tile(a1, (1, s * s)).reshape(1, 1, cs)
    c1t = jnp.tile(c1, (1, s * s)).reshape(1, 1, cs)

    y2, st2 = conv3x3_stats(y1s, mask, a1t, c1t, w2m,
                            ho=ho, wo=wo, cin=cp_mid, stride=s)
    m2 = n * ho * wo
    a2, c2 = _bn_coeffs(st2, m2, g2, b2)
    y2f = y2.reshape(m2, cp_mid)

    # ---- stage 3: [BN2+ReLU fused] conv3 (1x1) (+ fused downsample conv) + stats ----
    use_ds = not (cin == out_c and s == 1)
    if use_ds:
        ids = x_bf[:, ::s, ::s, :].reshape(m2, cp_in)       # strided identity, bf16
        y3, st3, yd, std_ = conv3_and_downsample(y2f, a2, c2, w3, ids, wd)
        a3, c3 = _bn_coeffs(st3, m2, g3, b3)
        ad, cd = _bn_coeffs(std_, m2, gd, bd)
        out2d = epilogue(y3, a3, c3, yd, ad, cd)
    else:
        y3, st3 = conv3_and_downsample(y2f, a2, c2, w3)
        a3, c3 = _bn_coeffs(st3, m2, g3, b3)
        ident = xpad.reshape(m1, cp_in)                     # f32 identity (cp_in==cp_out)
        out2d = epilogue(y3, a3, c3, ident)

    out = out2d[:, :out_c].reshape(n, ho, wo, out_c)
    return jnp.transpose(out, (0, 3, 1, 2))                 # back to NCHW


# ------------------------------- reference ---------------------------------- #
# Matched-precision reference: same bf16-input / f32-accumulate matmul numerics as the
# Pallas kernels (the review-recommended TPU precision), with all BN math in f32.

def _ref_block(x_nchw, p, in_channels, inter_channels, stride):
    bf16, f32 = jnp.bfloat16, jnp.float32

    def conv(x, w, s, pad):
        return jax.lax.conv_general_dilated(
            x.astype(bf16), w.astype(bf16), (s, s), [(pad, pad), (pad, pad)],
            dimension_numbers=("NCHW", "OIHW", "NCHW"),
            preferred_element_type=f32)

    def bn(y, g, b):
        mean = jnp.mean(y, axis=(0, 2, 3), keepdims=True)
        var = jnp.var(y, axis=(0, 2, 3), keepdims=True)
        return (y - mean) * jax.lax.rsqrt(var + EPS) * g.reshape(1, -1, 1, 1) \
            + b.reshape(1, -1, 1, 1)

    out_c = inter_channels * 4
    identity = x_nchw
    hh = jax.nn.relu(bn(conv(x_nchw, p["w1"], 1, 0), p["g1"], p["b1"]))
    hh = jax.nn.relu(bn(conv(hh, p["w2"], stride, 1), p["g2"], p["b2"]))
    hh = bn(conv(hh, p["w3"], 1, 0), p["g3"], p["b3"])
    if in_channels == out_c and stride == 1:
        hh = hh + identity
    else:
        hh = hh + bn(conv(identity, p["wd"], stride, 0), p["gd"], p["bd"])
    return jax.nn.relu(hh)


# ----------------------------------- main ----------------------------------- #

if __name__ == "__main__":
    N, IN_C, H, W = 2, 4, 16, 16
    INTER_C, STRIDE = 4, 2

    key = jax.random.PRNGKey(0)
    kx, kp = jax.random.split(key)
    x = jax.random.normal(kx, (N, IN_C, H, W), jnp.float32)
    params = init_block_params(kp, IN_C, INTER_C)

    out = block_forward(x, params, IN_C, INTER_C, STRIDE)
    out = jax.block_until_ready(out)

    ref = jax.block_until_ready(_ref_block(x, params, IN_C, INTER_C, STRIDE))
    assert out.shape == (N, INTER_C * 4, H // STRIDE, W // STRIDE), out.shape
    # tolerance leaves room for bf16 tie-breaking on the cast boundaries; typical
    # max-abs-diff between kernel and matched-precision reference is ~1e-5.
    assert jnp.allclose(out, ref, atol=1e-2, rtol=1e-2), float(jnp.max(jnp.abs(out - ref)))

    print("KERNEL_OK")
</pallas_src>

<mosaic_0001>
module attributes {stable_mosaic.version = 11 : i64} {
  func.func @_conv1_kernel(%arg0: i32, %arg1: memref<512x128xbf16, #tpu.memory_space<vmem>>, %arg2: memref<128x128xbf16, #tpu.memory_space<vmem>>, %arg3: memref<512x128xf32, #tpu.memory_space<vmem>>, %arg4: memref<1x2x128xf32, #tpu.memory_space<vmem>>) attributes {dimension_semantics = [#tpu.dimension_semantics<parallel>], iteration_bounds = array<i64: 1>, scalar_prefetch = 0 : i64, scratch_operands = 0 : i64, tpu.core_type = #tpu.core_type<tc>, window_params = [{transform_indices = @transform_0, window_bounds = array<i64: 512, 128>}, {pipeline_mode = #tpu.pipeline_mode<synchronous>, transform_indices = @transform_1, window_bounds = array<i64: 128, 128>}, {transform_indices = @transform_2, window_bounds = array<i64: 512, 128>}, {transform_indices = @transform_3, window_bounds = array<i64: 1, 2, 128>}]} {
    %c0 = arith.constant 0 : index
    %c0_0 = arith.constant 0 : index
    %0 = vector.load %arg1[%c0, %c0_0] : memref<512x128xbf16, #tpu.memory_space<vmem>>, vector<512x128xbf16>
    %c0_1 = arith.constant 0 : index
    %c0_2 = arith.constant 0 : index
    %1 = vector.load %arg2[%c0_1, %c0_2] : memref<128x128xbf16, #tpu.memory_space<vmem>>, vector<128x128xbf16>
    %cst = arith.constant dense<0.000000e+00> : vector<512x128xf32>
    %2 = tpu.matmul %0, %1, %cst {dimension_numbers = #tpu.dot_dimension_numbers<[1], [0], [0], [1], [0, 0, 1, 1], [], []>} : vector<512x128xbf16>, vector<128x128xbf16>, vector<512x128xf32> -> vector<512x128xf32>
    %c0_3 = arith.constant 0 : index
    %c0_4 = arith.constant 0 : index
    %3 = vector.load %arg3[%c0_3, %c0_4] : memref<512x128xf32, #tpu.memory_space<vmem>>, vector<512x128xf32>
    tpu.vector_store %arg3[%c0_3, %c0_4], %2 {strides = array<i32>} : memref<512x128xf32, #tpu.memory_space<vmem>>, vector<512x128xf32>,
    %4 = tpu.iota {dimensions = array<i32: 0>} : vector<512x1xi32>
    %c512_i32 = arith.constant 512 : i32
    %5 = arith.muli %arg0, %c512_i32 : i32
    %6 = vector.broadcast %5 : i32 to vector<512x1xi32>
    %7 = arith.addi %4, %6 : vector<512x1xi32>
    %c512_i32_5 = arith.constant 512 : i32
    %8 = vector.broadcast %c512_i32_5 : i32 to vector<512x1xi32>
    %9 = arith.cmpi slt, %7, %8 : vector<512x1xi32>
    %cst_6 = arith.constant 0.000000e+00 : f32
    %10 = vector.shape_cast %9 : vector<512x1xi1> to vector<512x1xi1>
    %11 = vector.broadcast %10 : vector<512x1xi1> to vector<512x128xi1>
    %12 = vector.broadcast %cst_6 : f32 to vector<512x128xf32>
    %13 = arith.select %11, %2, %12 : vector<512x128xi1>, vector<512x128xf32>
    %cst_7 = arith.constant dense<0.000000e+00> : vector<128xf32>
    %14 = vector.multi_reduction <add>, %13, %cst_7 [0] : vector<512x128xf32> to vector<128xf32>
    %15 = vector.shape_cast %14 : vector<128xf32> to vector<1x128xf32>
    %16 = arith.mulf %13, %13 : vector<512x128xf32>
    %cst_8 = arith.constant dense<0.000000e+00> : vector<128xf32>
    %17 = vector.multi_reduction <add>, %16, %cst_8 [0] : vector<512x128xf32> to vector<128xf32>
    %18 = vector.shape_cast %17 : vector<128xf32> to vector<1x128xf32>
    %19 = tpu.concatenate %15, %18 in 0 : vector<1x128xf32>, vector<1x128xf32> -> vector<2x128xf32>
    %c0_9 = arith.constant 0 : index
    %c0_10 = arith.constant 0 : index
    %c0_11 = arith.constant 0 : index
    %20 = vector.load %arg4[%c0_9, %c0_10, %c0_11] : memref<1x2x128xf32, #tpu.memory_space<vmem>>, vector<1x2x128xf32>
    %21 = vector.shape_cast %20 : vector<1x2x128xf32> to vector<2x128xf32>
    %22 = vector.shape_cast %19 : vector<2x128xf32> to vector<1x2x128xf32>
    tpu.vector_store %arg4[%c0_9, %c0_10, %c0_11], %22 {strides = array<i32>} : memref<1x2x128xf32, #tpu.memory_space<vmem>>, vector<1x2x128xf32>,
    return
  }
  func.func @transform_0(%arg0: i32) -> (i32, i32) {
    %c0_i32 = arith.constant 0 : i32
    %c0_i32_0 = arith.constant 0 : i32
    return %arg0, %c0_i32 : i32, i32
  }
  func.func @transform_1(%arg0: i32) -> (i32, i32) {
    %c0_i32 = arith.constant 0 : i32
    %c0_i32_0 = arith.constant 0 : i32
    %c0_i32_1 = arith.constant 0 : i32
    return %c0_i32, %c0_i32_0 : i32, i32
  }
  func.func @transform_2(%arg0: i32) -> (i32, i32) {
    %c0_i32 = arith.constant 0 : i32
    %c0_i32_0 = arith.constant 0 : i32
    return %arg0, %c0_i32 : i32, i32
  }
  func.func @transform_3(%arg0: i32) -> (i32, i32, i32) {
    %c0_i32 = arith.constant 0 : i32
    %c0_i32_0 = arith.constant 0 : i32
    %c0_i32_1 = arith.constant 0 : i32
    return %arg0, %c0_i32, %c0_i32_0 : i32, i32, i32
  }
}

module attributes {stable_mosaic.version = 11 : i64} {
  func.func @_conv2_kernel(%arg0: i32, %arg1: memref<1x9x9x512xf32, #tpu.memory_space<vmem>>, %arg2: memref<9x9x512xf32, #tpu.memory_space<vmem>>, %arg3: memref<1x1x512xf32, #tpu.memory_space<vmem>>, %arg4: memref<1x1x512xf32, #tpu.memory_space<vmem>>, %arg5: memref<9x128x128xbf16, #tpu.memory_space<vmem>>, %arg6: memref<1x64x128xf32, #tpu.memory_space<vmem>>, %arg7: memref<1x2x128xf32, #tpu.memory_space<vmem>>) attributes {dimension_semantics = [#tpu.dimension_semantics<parallel>], iteration_bounds = array<i64: 2>, scalar_prefetch = 0 : i64, scratch_operands = 0 : i64, tpu.core_type = #tpu.core_type<tc>, window_params = [{transform_indices = @transform_0, window_bounds = array<i64: 1, 9, 9, 512>}, {pipeline_mode = #tpu.pipeline_mode<synchronous>, transform_indices = @transform_1, window_bounds = array<i64: 9, 9, 512>}, {pipeline_mode = #tpu.pipeline_mode<synchronous>, transform_indices = @transform_2, window_bounds = array<i64: 1, 1, 512>}, {pipeline_mode = #tpu.pipeline_mode<synchronous>, transform_indices = @transform_3, window_bounds = array<i64: 1, 1, 512>}, {pipeline_mode = #tpu.pipeline_mode<synchronous>, transform_indices = @transform_4, window_bounds = array<i64: 9, 128, 128>}, {transform_indices = @transform_5, window_bounds = array<i64: 1, 64, 128>}, {transform_indices = @transform_6, window_bounds = array<i64: 1, 2, 128>}]} {
    %c0 = arith.constant 0 : index
    %c0_0 = arith.constant 0 : index
    %c0_1 = arith.constant 0 : index
    %c0_2 = arith.constant 0 : index
    %0 = vector.load %arg1[%c0, %c0_0, %c0_1, %c0_2] : memref<1x9x9x512xf32, #tpu.memory_space<vmem>>, vector<1x9x9x512xf32>
    %1 = vector.shape_cast %0 : vector<1x9x9x512xf32> to vector<9x9x512xf32>
    %c0_3 = arith.constant 0 : index
    %c0_4 = arith.constant 0 : index
    %c0_5 = arith.constant 0 : index
    %2 = vector.load %arg3[%c0_3, %c0_4, %c0_5] : memref<1x1x512xf32, #tpu.memory_space<vmem>>, vector<1x1x512xf32>
    %3 = vector.broadcast %2 : vector<1x1x512xf32> to vector<9x9x512xf32>
    %4 = arith.mulf %1, %3 : vector<9x9x512xf32>
    %c0_6 = arith.constant 0 : index
    %c0_7 = arith.constant 0 : index
    %c0_8 = arith.constant 0 : index
    %5 = vector.load %arg4[%c0_6, %c0_7, %c0_8] : memref<1x1x512xf32, #tpu.memory_space<vmem>>, vector<1x1x512xf32>
    %6 = vector.broadcast %5 : vector<1x1x512xf32> to vector<9x9x512xf32>
    %7 = arith.addf %4, %6 : vector<9x9x512xf32>
    %cst = arith.constant 0.000000e+00 : f32
    %8 = vector.broadcast %cst : f32 to vector<9x9x512xf32>
    %9 = arith.maximumf %7, %8 : vector<9x9x512xf32>
    %c0_9 = arith.constant 0 : index
    %c0_10 = arith.constant 0 : index
    %c0_11 = arith.constant 0 : index
    %10 = vector.load %arg2[%c0_9, %c0_10, %c0_11] : memref<9x9x512xf32, #tpu.memory_space<vmem>>, vector<9x9x512xf32>
    %11 = arith.mulf %9, %10 : vector<9x9x512xf32>
    %12 = arith.truncf %11 : vector<9x9x512xf32> to vector<9x9x512xbf16>
    %cst_12 = arith.constant 0.000000e+00 : f32
    %13 = vector.broadcast %cst_12 : f32 to vector<64x128xf32>
    %14 = vector.extract_strided_slice %12 {offsets = [0, 0, 0], sizes = [8, 8, 128], strides = [1, 1, 1]} : vector<9x9x512xbf16> to vector<8x8x128xbf16>
    %15 = vector.shape_cast %14 : vector<8x8x128xbf16> to vector<64x128xbf16>
    %c0_13 = arith.constant 0 : index
    %c0_14 = arith.constant 0 : index
    %c0_15 = arith.constant 0 : index
    %16 = vector.load %arg5[%c0_13, %c0_14, %c0_15] : memref<9x128x128xbf16, #tpu.memory_space<vmem>>, vector<1x128x128xbf16>
    %17 = vector.shape_cast %16 : vector<1x128x128xbf16> to vector<128x128xbf16>
    %cst_16 = arith.constant dense<0.000000e+00> : vector<64x128xf32>
    %18 = tpu.matmul %15, %17, %cst_16 {dimension_numbers = #tpu.dot_dimension_numbers<[1], [0], [0], [1], [0, 0, 1, 1], [], []>} : vector<64x128xbf16>, vector<128x128xbf16>, vector<64x128xf32> -> vector<64x128xf32>
    %19 = arith.addf %13, %18 : vector<64x128xf32>
    %20 = vector.extract_strided_slice %12 {offsets = [0, 0, 128], sizes = [8, 8, 128], strides = [1, 1, 1]} : vector<9x9x512xbf16> to vector<8x8x128xbf16>
    %21 = vector.shape_cast %20 : vector<8x8x128xbf16> to vector<64x128xbf16>
    %c1 = arith.constant 1 : index
    %c0_17 = arith.constant 0 : index
    %c0_18 = arith.constant 0 : index
    %22 = vector.load %arg5[%c1, %c0_17, %c0_18] : memref<9x128x128xbf16, #tpu.memory_space<vmem>>, vector<1x128x128xbf16>
    %23 = vector.shape_cast %22 : vector<1x128x128xbf16> to vector<128x128xbf16>
    %cst_19 = arith.constant dense<0.000000e+00> : vector<64x128xf32>
    %24 = tpu.matmul %21, %23, %cst_19 {dimension_numbers = #tpu.dot_dimension_numbers<[1], [0], [0], [1], [0, 0, 1, 1], [], []>} : vector<64x128xbf16>, vector<128x128xbf16>, vector<64x128xf32> -> vector<64x128xf32>
    %25 = arith.addf %19, %24 : vector<64x128xf32>
    %26 = vector.extract_strided_slice %12 {offsets = [0, 1, 0], sizes = [8, 8, 128], strides = [1, 1, 1]} : vector<9x9x512xbf16> to vector<8x8x128xbf16>
    %27 = vector.shape_cast %26 : vector<8x8x128xbf16> to vector<64x128xbf16>
    %c2 = arith.constant 2 : index
    %c0_20 = arith.constant 0 : index
    %c0_21 = arith.constant 0 : index
    %28 = vector.load %arg5[%c2, %c0_20, %c0_21] : memref<9x128x128xbf16, #tpu.memory_space<vmem>>, vector<1x128x128xbf16>
    %29 = vector.shape_cast %28 : vector<1x128x128xbf16> to vector<128x128xbf16>
    %cst_22 = arith.constant dense<0.000000e+00> : vector<64x128xf32>
    %30 = tpu.matmul %27, %29, %cst_22 {dimension_numbers = #tpu.dot_dimension_numbers<[1], [0], [0], [1], [0, 0, 1, 1], [], []>} : vector<64x128xbf16>, vector<128x128xbf16>, vector<64x128xf32> -> vector<64x128xf32>
    %31 = arith.addf %25, %30 : vector<64x128xf32>
    %32 = vector.extract_strided_slice %12 {offsets = [0, 0, 256], sizes = [8, 8, 128], strides = [1, 1, 1]} : vector<9x9x512xbf16> to vector<8x8x128xbf16>
    %33 = vector.shape_cast %32 : vector<8x8x128xbf16> to vector<64x128xbf16>
    %c3 = arith.constant 3 : index
    %c0_23 = arith.constant 0 : index
    %c0_24 = arith.constant 0 : index
    %34 = vector.load %arg5[%c3, %c0_23, %c0_24] : memref<9x128x128xbf16, #tpu.memory_space<vmem>>, vector<1x128x128xbf16>
    %35 = vector.shape_cast %34 : vector<1x128x128xbf16> to vector<128x128xbf16>
    %cst_25 = arith.constant dense<0.000000e+00> : vector<64x128xf32>
    %36 = tpu.matmul %33, %35, %cst_25 {dimension_numbers = #tpu.dot_dimension_numbers<[1], [0], [0], [1], [0, 0, 1, 1], [], []>} : vector<64x128xbf16>, vector<128x128xbf16>, vector<64x128xf32> -> vector<64x128xf32>
    %37 = arith.addf %31, %36 : vector<64x128xf32>
    %38 = vector.extract_strided_slice %12 {offsets = [0, 0, 384], sizes = [8, 8, 128], strides = [1, 1, 1]} : vector<9x9x512xbf16> to vector<8x8x128xbf16>
    %39 = vector.shape_cast %38 : vector<8x8x128xbf16> to vector<64x128xbf16>
    %c4 = arith.constant 4 : index
    %c0_26 = arith.constant 0 : index
    %c0_27 = arith.constant 0 : index
    %40 = vector.load %arg5[%c4, %c0_26, %c0_27] : memref<9x128x128xbf16, #tpu.memory_space<vmem>>, vector<1x128x128xbf16>
    %41 = vector.shape_cast %40 : vector<1x128x128xbf16> to vector<128x128xbf16>
    %cst_28 = arith.constant dense<0.000000e+00> : vector<64x128xf32>
    %42 = tpu.matmul %39, %41, %cst_28 {dimension_numbers = #tpu.dot_dimension_numbers<[1], [0], [0], [1], [0, 0, 1, 1], [], []>} : vector<64x128xbf16>, vector<128x128xbf16>, vector<64x128xf32> -> vector<64x128xf32>
    %43 = arith.addf %37, %42 : vector<64x128xf32>
    %44 = vector.extract_strided_slice %12 {offsets = [0, 1, 256], sizes = [8, 8, 128], strides = [1, 1, 1]} : vector<9x9x512xbf16> to vector<8x8x128xbf16>
    %45 = vector.shape_cast %44 : vector<8x8x128xbf16> to vector<64x128xbf16>
    %c5 = arith.constant 5 : index
    %c0_29 = arith.constant 0 : index
    %c0_30 = arith.constant 0 : index
    %46 = vector.load %arg5[%c5, %c0_29, %c0_30] : memref<9x128x128xbf16, #tpu.memory_space<vmem>>, vector<1x128x128xbf16>
    %47 = vector.shape_cast %46 : vector<1x128x128xbf16> to vector<128x128xbf16>
    %cst_31 = arith.constant dense<0.000000e+00> : vector<64x128xf32>
    %48 = tpu.matmul %45, %47, %cst_31 {dimension_numbers = #tpu.dot_dimension_numbers<[1], [0], [0], [1], [0, 0, 1, 1], [], []>} : vector<64x128xbf16>, vector<128x128xbf16>, vector<64x128xf32> -> vector<64x128xf32>
    %49 = arith.addf %43, %48 : vector<64x128xf32>
    %50 = vector.extract_strided_slice %12 {offsets = [1, 0, 0], sizes = [8, 8, 128], strides = [1, 1, 1]} : vector<9x9x512xbf16> to vector<8x8x128xbf16>
    %51 = vector.shape_cast %50 : vector<8x8x128xbf16> to vector<64x128xbf16>
    %c6 = arith.constant 6 : index
    %c0_32 = arith.constant 0 : index
    %c0_33 = arith.constant 0 : index
    %52 = vector.load %arg5[%c6, %c0_32, %c0_33] : memref<9x128x128xbf16, #tpu.memory_space<vmem>>, vector<1x128x128xbf16>
    %53 = vector.shape_cast %52 : vector<1x128x128xbf16> to vector<128x128xbf16>
    %cst_34 = arith.constant dense<0.000000e+00> : vector<64x128xf32>
    %54 = tpu.matmul %51, %53, %cst_34 {dimension_numbers = #tpu.dot_dimension_numbers<[1], [0], [0], [1], [0, 0, 1, 1], [], []>} : vector<64x128xbf16>, vector<128x128xbf16>, vector<64x128xf32> -> vector<64x128xf32>
    %55 = arith.addf %49, %54 : vector<64x128xf32>
    %56 = vector.extract_strided_slice %12 {offsets = [1, 0, 128], sizes = [8, 8, 128], strides = [1, 1, 1]} : vector<9x9x512xbf16> to vector<8x8x128xbf16>
    %57 = vector.shape_cast %56 : vector<8x8x128xbf16> to vector<64x128xbf16>
    %c7 = arith.constant 7 : index
    %c0_35 = arith.constant 0 : index
    %c0_36 = arith.constant 0 : index
    %58 = vector.load %arg5[%c7, %c0_35, %c0_36] : memref<9x128x128xbf16, #tpu.memory_space<vmem>>, vector<1x128x128xbf16>
    %59 = vector.shape_cast %58 : vector<1x128x128xbf16> to vector<128x128xbf16>
    %cst_37 = arith.constant dense<0.000000e+00> : vector<64x128xf32>
    %60 = tpu.matmul %57, %59, %cst_37 {dimension_numbers = #tpu.dot_dimension_numbers<[1], [0], [0], [1], [0, 0, 1, 1], [], []>} : vector<64x128xbf16>, vector<128x128xbf16>, vector<64x128xf32> -> vector<64x128xf32>
    %61 = arith.addf %55, %60 : vector<64x128xf32>
    %62 = vector.extract_strided_slice %12 {offsets = [1, 1, 0], sizes = [8, 8, 128], strides = [1, 1, 1]} : vector<9x9x512xbf16> to vector<8x8x128xbf16>
    %63 = vector.shape_cast %62 : vector<8x8x128xbf16> to vector<64x128xbf16>
    %c8 = arith.constant 8 : index
    %c0_38 = arith.constant 0 : index
    %c0_39 = arith.constant 0 : index
    %64 = vector.load %arg5[%c8, %c0_38, %c0_39] : memref<9x128x128xbf16, #tpu.memory_space<vmem>>, vector<1x128x128xbf16>
    %65 = vector.shape_cast %64 : vector<1x128x128xbf16> to vector<128x128xbf16>
    %cst_40 = arith.constant dense<0.000000e+00> : vector<64x128xf32>
    %66 = tpu.matmul %63, %65, %cst_40 {dimension_numbers = #tpu.dot_dimension_numbers<[1], [0], [0], [1], [0, 0, 1, 1], [], []>} : vector<64x128xbf16>, vector<128x128xbf16>, vector<64x128xf32> -> vector<64x128xf32>
    %67 = arith.addf %61, %66 : vector<64x128xf32>
    %c0_41 = arith.constant 0 : index
    %c0_42 = arith.constant 0 : index
    %c0_43 = arith.constant 0 : index
    %68 = vector.load %arg6[%c0_41, %c0_42, %c0_43] : memref<1x64x128xf32, #tpu.memory_space<vmem>>, vector<1x64x128xf32>
    %69 = vector.shape_cast %68 : vector<1x64x128xf32> to vector<64x128xf32>
    %70 = vector.shape_cast %67 : vector<64x128xf32> to vector<1x64x128xf32>
    tpu.vector_store %arg6[%c0_41, %c0_42, %c0_43], %70 {strides = array<i32>} : memref<1x64x128xf32, #tpu.memory_space<vmem>>, vector<1x64x128xf32>,
    %cst_44 = arith.constant dense<0.000000e+00> : vector<128xf32>
    %71 = vector.multi_reduction <add>, %67, %cst_44 [0] : vector<64x128xf32> to vector<128xf32>
    %72 = vector.shape_cast %71 : vector<128xf32> to vector<1x128xf32>
    %73 = arith.mulf %67, %67 : vector<64x128xf32>
    %cst_45 = arith.constant dense<0.000000e+00> : vector<128xf32>
    %74 = vector.multi_reduction <add>, %73, %cst_45 [0] : vector<64x128xf32> to vector<128xf32>
    %75 = vector.shape_cast %74 : vector<128xf32> to vector<1x128xf32>
    %76 = tpu.concatenate %72, %75 in 0 : vector<1x128xf32>, vector<1x128xf32> -> vector<2x128xf32>
    %c0_46 = arith.constant 0 : index
    %c0_47 = arith.constant 0 : index
    %c0_48 = arith.constant 0 : index
    %77 = vector.load %arg7[%c0_46, %c0_47, %c0_48] : memref<1x2x128xf32, #tpu.memory_space<vmem>>, vector<1x2x128xf32>
    %78 = vector.shape_cast %77 : vector<1x2x128xf32> to vector<2x128xf32>
    %79 = vector.shape_cast %76 : vector<2x128xf32> to vector<1x2x128xf32>
    tpu.vector_store %arg7[%c0_46, %c0_47, %c0_48], %79 {strides = array<i32>} : memref<1x2x128xf32, #tpu.memory_space<vmem>>, vector<1x2x128xf32>,
    return
  }
  func.func @transform_0(%arg0: i32) -> (i32, i32, i32, i32) {
    %c0_i32 = arith.constant 0 : i32
    %c0_i32_0 = arith.constant 0 : i32
    %c0_i32_1 = arith.constant 0 : i32
    %c0_i32_2 = arith.constant 0 : i32
    return %arg0, %c0_i32, %c0_i32_0, %c0_i32_1 : i32, i32, i32, i32
  }
  func.func @transform_1(%arg0: i32) -> (i32, i32, i32) {
    %c0_i32 = arith.constant 0 : i32
    %c0_i32_0 = arith.constant 0 : i32
    %c0_i32_1 = arith.constant 0 : i32
    %c0_i32_2 = arith.constant 0 : i32
    return %c0_i32, %c0_i32_0, %c0_i32_1 : i32, i32, i32
  }
  func.func @transform_2(%arg0: i32) -> (i32, i32, i32) {
    %c0_i32 = arith.constant 0 : i32
    %c0_i32_0 = arith.constant 0 : i32
    %c0_i32_1 = arith.constant 0 : i32
    %c0_i32_2 = arith.constant 0 : i32
    return %c0_i32, %c0_i32_0, %c0_i32_1 : i32, i32, i32
  }
  func.func @transform_3(%arg0: i32) -> (i32, i32, i32) {
    %c0_i32 = arith.constant 0 : i32
    %c0_i32_0 = arith.constant 0 : i32
    %c0_i32_1 = arith.constant 0 : i32
    %c0_i32_2 = arith.constant 0 : i32
    return %c0_i32, %c0_i32_0, %c0_i32_1 : i32, i32, i32
  }
  func.func @transform_4(%arg0: i32) -> (i32, i32, i32) {
    %c0_i32 = arith.constant 0 : i32
    %c0_i32_0 = arith.constant 0 : i32
    %c0_i32_1 = arith.constant 0 : i32
    %c0_i32_2 = arith.constant 0 : i32
    return %c0_i32, %c0_i32_0, %c0_i32_1 : i32, i32, i32
  }
  func.func @transform_5(%arg0: i32) -> (i32, i32, i32) {
    %c0_i32 = arith.constant 0 : i32
    %c0_i32_0 = arith.constant 0 : i32
    %c0_i32_1 = arith.constant 0 : i32
    return %arg0, %c0_i32, %c0_i32_0 : i32, i32, i32
  }
  func.func @transform_6(%arg0: i32) -> (i32, i32, i32) {
    %c0_i32 = arith.constant 0 : i32
    %c0_i32_0 = arith.constant 0 : i32
    %c0_i32_1 = arith.constant 0 : i32
    return %arg0, %c0_i32, %c0_i32_0 : i32, i32, i32
  }
}

module attributes {stable_mosaic.version = 11 : i64} {
  func.func @_conv3_kernel(%arg0: i32, %arg1: memref<128x128xf32, #tpu.memory_space<vmem>>, %arg2: memref<1x128xf32, #tpu.memory_space<vmem>>, %arg3: memref<1x128xf32, #tpu.memory_space<vmem>>, %arg4: memref<128x128xbf16, #tpu.memory_space<vmem>>, %arg5: memref<128x128xbf16, #tpu.memory_space<vmem>>, %arg6: memref<128x128xbf16, #tpu.memory_space<vmem>>, %arg7: memref<128x128xf32, #tpu.memory_space<vmem>>, %arg8: memref<1x2x128xf32, #tpu.memory_space<vmem>>, %arg9: memref<128x128xf32, #tpu.memory_space<vmem>>, %arg10: memref<1x2x128xf32, #tpu.memory_space<vmem>>) attributes {dimension_semantics = [#tpu.dimension_semantics<parallel>], iteration_bounds = array<i64: 1>, scalar_prefetch = 0 : i64, scratch_operands = 0 : i64, tpu.core_type = #tpu.core_type<tc>, window_params = [{transform_indices = @transform_0, window_bounds = array<i64: 128, 128>}, {pipeline_mode = #tpu.pipeline_mode<synchronous>, transform_indices = @transform_1, window_bounds = array<i64: 1, 128>}, {pipeline_mode = #tpu.pipeline_mode<synchronous>, transform_indices = @transform_2, window_bounds = array<i64: 1, 128>}, {pipeline_mode = #tpu.pipeline_mode<synchronous>, transform_indices = @transform_3, window_bounds = array<i64: 128, 128>}, {transform_indices = @transform_4, window_bounds = array<i64: 128, 128>}, {pipeline_mode = #tpu.pipeline_mode<synchronous>, transform_indices = @transform_5, window_bounds = array<i64: 128, 128>}, {transform_indices = @transform_6, window_bounds = array<i64: 128, 128>}, {transform_indices = @transform_7, window_bounds = array<i64: 1, 2, 128>}, {transform_indices = @transform_8, window_bounds = array<i64: 128, 128>}, {transform_indices = @transform_9, window_bounds = array<i64: 1, 2, 128>}]} {
    %0 = tpu.iota {dimensions = array<i32: 0>} : vector<128x1xi32>
    %c128_i32 = arith.constant 128 : i32
    %1 = arith.muli %arg0, %c128_i32 : i32
    %2 = vector.broadcast %1 : i32 to vector<128x1xi32>
    %3 = arith.addi %0, %2 : vector<128x1xi32>
    %c128_i32_0 = arith.constant 128 : i32
    %4 = vector.broadcast %c128_i32_0 : i32 to vector<128x1xi32>
    %5 = arith.cmpi slt, %3, %4 : vector<128x1xi32>
    %c0 = arith.constant 0 : index
    %c0_1 = arith.constant 0 : index
    %6 = vector.load %arg1[%c0, %c0_1] : memref<128x128xf32, #tpu.memory_space<vmem>>, vector<128x128xf32>
    %c0_2 = arith.constant 0 : index
    %c0_3 = arith.constant 0 : index
    %7 = vector.load %arg2[%c0_2, %c0_3] : memref<1x128xf32, #tpu.memory_space<vmem>>, vector<1x128xf32>
    %8 = vector.broadcast %7 : vector<1x128xf32> to vector<128x128xf32>
    %9 = arith.mulf %6, %8 : vector<128x128xf32>
    %c0_4 = arith.constant 0 : index
    %c0_5 = arith.constant 0 : index
    %10 = vector.load %arg3[%c0_4, %c0_5] : memref<1x128xf32, #tpu.memory_space<vmem>>, vector<1x128xf32>
    %11 = vector.broadcast %10 : vector<1x128xf32> to vector<128x128xf32>
    %12 = arith.addf %9, %11 : vector<128x128xf32>
    %cst = arith.constant 0.000000e+00 : f32
    %13 = vector.broadcast %cst : f32 to vector<128x128xf32>
    %14 = arith.maximumf %12, %13 : vector<128x128xf32>
    %15 = arith.truncf %14 : vector<128x128xf32> to vector<128x128xbf16>
    %c0_6 = arith.constant 0 : index
    %c0_7 = arith.constant 0 : index
    %16 = vector.load %arg4[%c0_6, %c0_7] : memref<128x128xbf16, #tpu.memory_space<vmem>>, vector<128x128xbf16>
    %cst_8 = arith.constant dense<0.000000e+00> : vector<128x128xf32>
    %17 = tpu.matmul %15, %16, %cst_8 {dimension_numbers = #tpu.dot_dimension_numbers<[1], [0], [0], [1], [0, 0, 1, 1], [], []>} : vector<128x128xbf16>, vector<128x128xbf16>, vector<128x128xf32> -> vector<128x128xf32>
    %c0_9 = arith.constant 0 : index
    %c0_10 = arith.constant 0 : index
    %18 = vector.load %arg7[%c0_9, %c0_10] : memref<128x128xf32, #tpu.memory_space<vmem>>, vector<128x128xf32>
    tpu.vector_store %arg7[%c0_9, %c0_10], %17 {strides = array<i32>} : memref<128x128xf32, #tpu.memory_space<vmem>>, vector<128x128xf32>,
    %cst_11 = arith.constant 0.000000e+00 : f32
    %19 = vector.shape_cast %5 : vector<128x1xi1> to vector<128x1xi1>
    %20 = vector.broadcast %19 : vector<128x1xi1> to vector<128x128xi1>
    %21 = vector.broadcast %cst_11 : f32 to vector<128x128xf32>
    %22 = arith.select %20, %17, %21 : vector<128x128xi1>, vector<128x128xf32>
    %cst_12 = arith.constant dense<0.000000e+00> : vector<128xf32>
    %23 = vector.multi_reduction <add>, %22, %cst_12 [0] : vector<128x128xf32> to vector<128xf32>
    %24 = vector.shape_cast %23 : vector<128xf32> to vector<1x128xf32>
    %25 = arith.mulf %22, %22 : vector<128x128xf32>
    %cst_13 = arith.constant dense<0.000000e+00> : vector<128xf32>
    %26 = vector.multi_reduction <add>, %25, %cst_13 [0] : vector<128x128xf32> to vector<128xf32>
    %27 = vector.shape_cast %26 : vector<128xf32> to vector<1x128xf32>
    %28 = tpu.concatenate %24, %27 in 0 : vector<1x128xf32>, vector<1x128xf32> -> vector<2x128xf32>
    %c0_14 = arith.constant 0 : index
    %c0_15 = arith.constant 0 : index
    %c0_16 = arith.constant 0 : index
    %29 = vector.load %arg8[%c0_14, %c0_15, %c0_16] : memref<1x2x128xf32, #tpu.memory_space<vmem>>, vector<1x2x128xf32>
    %30 = vector.shape_cast %29 : vector<1x2x128xf32> to vector<2x128xf32>
    %31 = vector.shape_cast %28 : vector<2x128xf32> to vector<1x2x128xf32>
    tpu.vector_store %arg8[%c0_14, %c0_15, %c0_16], %31 {strides = array<i32>} : memref<1x2x128xf32, #tpu.memory_space<vmem>>, vector<1x2x128xf32>,
    %c0_17 = arith.constant 0 : index
    %c0_18 = arith.constant 0 : index
    %32 = vector.load %arg5[%c0_17, %c0_18] : memref<128x128xbf16, #tpu.memory_space<vmem>>, vector<128x128xbf16>
    %c0_19 = arith.constant 0 : index
    %c0_20 = arith.constant 0 : index
    %33 = vector.load %arg6[%c0_19, %c0_20] : memref<128x128xbf16, #tpu.memory_space<vmem>>, vector<128x128xbf16>
    %cst_21 = arith.constant dense<0.000000e+00> : vector<128x128xf32>
    %34 = tpu.matmul %32, %33, %cst_21 {dimension_numbers = #tpu.dot_dimension_numbers<[1], [0], [0], [1], [0, 0, 1, 1], [], []>} : vector<128x128xbf16>, vector<128x128xbf16>, vector<128x128xf32> -> vector<128x128xf32>
    %c0_22 = arith.constant 0 : index
    %c0_23 = arith.constant 0 : index
    %35 = vector.load %arg9[%c0_22, %c0_23] : memref<128x128xf32, #tpu.memory_space<vmem>>, vector<128x128xf32>
    tpu.vector_store %arg9[%c0_22, %c0_23], %34 {strides = array<i32>} : memref<128x128xf32, #tpu.memory_space<vmem>>, vector<128x128xf32>,
    %cst_24 = arith.constant 0.000000e+00 : f32
    %36 = vector.shape_cast %5 : vector<128x1xi1> to vector<128x1xi1>
    %37 = vector.broadcast %36 : vector<128x1xi1> to vector<128x128xi1>
    %38 = vector.broadcast %cst_24 : f32 to vector<128x128xf32>
    %39 = arith.select %37, %34, %38 : vector<128x128xi1>, vector<128x128xf32>
    %cst_25 = arith.constant dense<0.000000e+00> : vector<128xf32>
    %40 = vector.multi_reduction <add>, %39, %cst_25 [0] : vector<128x128xf32> to vector<128xf32>
    %41 = vector.shape_cast %40 : vector<128xf32> to vector<1x128xf32>
    %42 = arith.mulf %39, %39 : vector<128x128xf32>
    %cst_26 = arith.constant dense<0.000000e+00> : vector<128xf32>
    %43 = vector.multi_reduction <add>, %42, %cst_26 [0] : vector<128x128xf32> to vector<128xf32>
    %44 = vector.shape_cast %43 : vector<128xf32> to vector<1x128xf32>
    %45 = tpu.concatenate %41, %44 in 0 : vector<1x128xf32>, vector<1x128xf32> -> vector<2x128xf32>
    %c0_27 = arith.constant 0 : index
    %c0_28 = arith.constant 0 : index
    %c0_29 = arith.constant 0 : index
    %46 = vector.load %arg10[%c0_27, %c0_28, %c0_29] : memref<1x2x128xf32, #tpu.memory_space<vmem>>, vector<1x2x128xf32>
    %47 = vector.shape_cast %46 : vector<1x2x128xf32> to vector<2x128xf32>
    %48 = vector.shape_cast %45 : vector<2x128xf32> to vector<1x2x128xf32>
    tpu.vector_store %arg10[%c0_27, %c0_28, %c0_29], %48 {strides = array<i32>} : memref<1x2x128xf32, #tpu.memory_space<vmem>>, vector<1x2x128xf32>,
    return
  }
  func.func @transform_0(%arg0: i32) -> (i32, i32) {
    %c0_i32 = arith.constant 0 : i32
    %c0_i32_0 = arith.constant 0 : i32
    return %arg0, %c0_i32 : i32, i32
  }
  func.func @transform_1(%arg0: i32) -> (i32, i32) {
    %c0_i32 = arith.constant 0 : i32
    %c0_i32_0 = arith.constant 0 : i32
    %c0_i32_1 = arith.constant 0 : i32
    return %c0_i32, %c0_i32_0 : i32, i32
  }
  func.func @transform_2(%arg0: i32) -> (i32, i32) {
    %c0_i32 = arith.constant 0 : i32
    %c0_i32_0 = arith.constant 0 : i32
    %c0_i32_1 = arith.constant 0 : i32
    return %c0_i32, %c0_i32_0 : i32, i32
  }
  func.func @transform_3(%arg0: i32) -> (i32, i32) {
    %c0_i32 = arith.constant 0 : i32
    %c0_i32_0 = arith.constant 0 : i32
    %c0_i32_1 = arith.constant 0 : i32
    return %c0_i32, %c0_i32_0 : i32, i32
  }
  func.func @transform_4(%arg0: i32) -> (i32, i32) {
    %c0_i32 = arith.constant 0 : i32
    %c0_i32_0 = arith.constant 0 : i32
    return %arg0, %c0_i32 : i32, i32
  }
  func.func @transform_5(%arg0: i32) -> (i32, i32) {
    %c0_i32 = arith.constant 0 : i32
    %c0_i32_0 = arith.constant 0 : i32
    %c0_i32_1 = arith.constant 0 : i32
    return %c0_i32, %c0_i32_0 : i32, i32
  }
  func.func @transform_6(%arg0: i32) -> (i32, i32) {
    %c0_i32 = arith.constant 0 : i32
    %c0_i32_0 = arith.constant 0 : i32
    return %arg0, %c0_i32 : i32, i32
  }
  func.func @transform_7(%arg0: i32) -> (i32, i32, i32) {
    %c0_i32 = arith.constant 0 : i32
    %c0_i32_0 = arith.constant 0 : i32
    %c0_i32_1 = arith.constant 0 : i32
    return %arg0, %c0_i32, %c0_i32_0 : i32, i32, i32
  }
  func.func @transform_8(%arg0: i32) -> (i32, i32) {
    %c0_i32 = arith.constant 0 : i32
    %c0_i32_0 = arith.constant 0 : i32
    return %arg0, %c0_i32 : i32, i32
  }
  func.func @transform_9(%arg0: i32) -> (i32, i32, i32) {
    %c0_i32 = arith.constant 0 : i32
    %c0_i32_0 = arith.constant 0 : i32
    %c0_i32_1 = arith.constant 0 : i32
    return %arg0, %c0_i32, %c0_i32_0 : i32, i32, i32
  }
}

module attributes {stable_mosaic.version = 11 : i64} {
  func.func @_epilogue_kernel(%arg0: i32, %arg1: memref<128x128xf32, #tpu.memory_space<vmem>>, %arg2: memref<1x128xf32, #tpu.memory_space<vmem>>, %arg3: memref<1x128xf32, #tpu.memory_space<vmem>>, %arg4: memref<128x128xf32, #tpu.memory_space<vmem>>, %arg5: memref<1x128xf32, #tpu.memory_space<vmem>>, %arg6: memref<1x128xf32, #tpu.memory_space<vmem>>, %arg7: memref<128x128xf32, #tpu.memory_space<vmem>>) attributes {dimension_semantics = [#tpu.dimension_semantics<parallel>], iteration_bounds = array<i64: 1>, scalar_prefetch = 0 : i64, scratch_operands = 0 : i64, tpu.core_type = #tpu.core_type<tc>, window_params = [{transform_indices = @transform_0, window_bounds = array<i64: 128, 128>}, {pipeline_mode = #tpu.pipeline_mode<synchronous>, transform_indices = @transform_1, window_bounds = array<i64: 1, 128>}, {pipeline_mode = #tpu.pipeline_mode<synchronous>, transform_indices = @transform_2, window_bounds = array<i64: 1, 128>}, {transform_indices = @transform_3, window_bounds = array<i64: 128, 128>}, {pipeline_mode = #tpu.pipeline_mode<synchronous>, transform_indices = @transform_4, window_bounds = array<i64: 1, 128>}, {pipeline_mode = #tpu.pipeline_mode<synchronous>, transform_indices = @transform_5, window_bounds = array<i64: 1, 128>}, {transform_indices = @transform_6, window_bounds = array<i64: 128, 128>}]} {
    %c0 = arith.constant 0 : index
    %c0_0 = arith.constant 0 : index
    %0 = vector.load %arg4[%c0, %c0_0] : memref<128x128xf32, #tpu.memory_space<vmem>>, vector<128x128xf32>
    %c0_1 = arith.constant 0 : index
    %c0_2 = arith.constant 0 : index
    %1 = vector.load %arg5[%c0_1, %c0_2] : memref<1x128xf32, #tpu.memory_space<vmem>>, vector<1x128xf32>
    %2 = vector.broadcast %1 : vector<1x128xf32> to vector<128x128xf32>
    %3 = arith.mulf %0, %2 : vector<128x128xf32>
    %c0_3 = arith.constant 0 : index
    %c0_4 = arith.constant 0 : index
    %4 = vector.load %arg6[%c0_3, %c0_4] : memref<1x128xf32, #tpu.memory_space<vmem>>, vector<1x128xf32>
    %5 = vector.broadcast %4 : vector<1x128xf32> to vector<128x128xf32>
    %6 = arith.addf %3, %5 : vector<128x128xf32>
    %c0_5 = arith.constant 0 : index
    %c0_6 = arith.constant 0 : index
    %7 = vector.load %arg1[%c0_5, %c0_6] : memref<128x128xf32, #tpu.memory_space<vmem>>, vector<128x128xf32>
    %c0_7 = arith.constant 0 : index
    %c0_8 = arith.constant 0 : index
    %8 = vector.load %arg2[%c0_7, %c0_8] : memref<1x128xf32, #tpu.memory_space<vmem>>, vector<1x128xf32>
    %9 = vector.broadcast %8 : vector<1x128xf32> to vector<128x128xf32>
    %10 = arith.mulf %7, %9 : vector<128x128xf32>
    %c0_9 = arith.constant 0 : index
    %c0_10 = arith.constant 0 : index
    %11 = vector.load %arg3[%c0_9, %c0_10] : memref<1x128xf32, #tpu.memory_space<vmem>>, vector<1x128xf32>
    %12 = vector.broadcast %11 : vector<1x128xf32> to vector<128x128xf32>
    %13 = arith.addf %10, %12 : vector<128x128xf32>
    %14 = arith.addf %13, %6 : vector<128x128xf32>
    %cst = arith.constant 0.000000e+00 : f32
    %15 = vector.broadcast %cst : f32 to vector<128x128xf32>
    %16 = arith.maximumf %14, %15 : vector<128x128xf32>
    %c0_11 = arith.constant 0 : index
    %c0_12 = arith.constant 0 : index
    %17 = vector.load %arg7[%c0_11, %c0_12] : memref<128x128xf32, #tpu.memory_space<vmem>>, vector<128x128xf32>
    tpu.vector_store %arg7[%c0_11, %c0_12], %16 {strides = array<i32>} : memref<128x128xf32, #tpu.memory_space<vmem>>, vector<128x128xf32>,
    return
  }
  func.func @transform_0(%arg0: i32) -> (i32, i32) {
    %c0_i32 = arith.constant 0 : i32
    %c0_i32_0 = arith.constant 0 : i32
    return %arg0, %c0_i32 : i32, i32
  }
  func.func @transform_1(%arg0: i32) -> (i32, i32) {
    %c0_i32 = arith.constant 0 : i32
    %c0_i32_0 = arith.constant 0 : i32
    %c0_i32_1 = arith.constant 0 : i32
    return %c0_i32, %c0_i32_0 : i32, i32
  }
  func.func @transform_2(%arg0: i32) -> (i32, i32) {
    %c0_i32 = arith.constant 0 : i32
    %c0_i32_0 = arith.constant 0 : i32
    %c0_i32_1 = arith.constant 0 : i32
    return %c0_i32, %c0_i32_0 : i32, i32
  }
  func.func @transform_3(%arg0: i32) -> (i32, i32) {
    %c0_i32 = arith.constant 0 : i32
    %c0_i32_0 = arith.constant 0 : i32
    return %arg0, %c0_i32 : i32, i32
  }
  func.func @transform_4(%arg0: i32) -> (i32, i32) {
    %c0_i32 = arith.constant 0 : i32
    %c0_i32_0 = arith.constant 0 : i32
    %c0_i32_1 = arith.constant 0 : i32
    return %c0_i32, %c0_i32_0 : i32, i32
  }
  func.func @transform_5(%arg0: i32) -> (i32, i32) {
    %c0_i32 = arith.constant 0 : i32
    %c0_i32_0 = arith.constant 0 : i32
    %c0_i32_1 = arith.constant 0 : i32
    return %c0_i32, %c0_i32_0 : i32, i32
  }
  func.func @transform_6(%arg0: i32) -> (i32, i32) {
    %c0_i32 = arith.constant 0 : i32
    %c0_i32_0 = arith.constant 0 : i32
    return %arg0, %c0_i32 : i32, i32
  }
}

</mosaic_0001>

<bundles_post_ra>
// kernel: block_forward.4
= control target key start
LH: loop header
LB: loop body
LE: loop exit
PB: predicated region body
PF: predicated region fallthrough
CT: control target
= control target key end

     0   :  { %vm1276_vm0 = vcmask 1040384   ;;  %s2030_s1 = inlined_call_operand.vmem [shape: bf16[128,128], index: 1, kind: input, shape index: {}]   ;;  %s2031_s0 = inlined_call_operand.vmem [shape: bf16[512,128], index: 0, kind: input, shape index: {}]   ;;  %s2032_s2 = inlined_call_operand.vmem [shape: f32[512,128], index: 2, kind: output, shape index: {0}]   ;;  %s2033_s3 = inlined_call_operand.vmem [shape: f32[1,2,128], index: 3, kind: output, shape index: {1}]  }
   0x1   :  { %v1463_v0 = vld [vmem:[%s2030_s1 + $0x38] sm:$0xff]   ;;  %v1464_v1 = vld [vmem:[%s2030_s1 + $0x30] sm:$0xff]   ;;  %v1465_v2 = vld [vmem:[%s2030_s1 + $0x28] sm:$0xff]  }
   0x2   :  { %1367 = vmatprep.subr.bf16.mxu0 %v1463_v0  ;;  %1447 = vmatprep.subr.bf16.mxu1 %v1463_v0  ;;  %v1466_v3 = vld [vmem:[%s2030_s1 + $0x20] sm:$0xff]   ;;  %v1467_v5 = vld [vmem:[%s2030_s1 + $0x18] sm:$0xff]   ;;  %v1468_v6 = vld [vmem:[%s2030_s1 + $0x10] sm:$0xff]  }
   0x3   :  { %1368 = vmatpush3.bf16.msra.mxu0 %v1463_v0  ;;  %1455 = vmatpush3.bf16.msra.mxu1 %v1463_v0  ;;  %v1471_v4 = vld [vmem:[%s2031_s0] sm:$0xff]   ;;  %v1469_v7 = vld [vmem:[%s2030_s1 + $0x8] sm:$0xff]   ;;  %v1473_v11 = vld [vmem:[%s2031_s0 + $0x10] sm:$0xff]  }
   0x4   :  { %1369 = vmatprep.subr.bf16.mxu0 %v1464_v1  ;;  %1448 = vmatprep.subr.bf16.mxu1 %v1464_v1  ;;  %v1470_v8 = vld [vmem:[%s2030_s1] sm:$0xff]   ;;  %v1472_v10 = vld [vmem:[%s2031_s0 + $0x8] sm:$0xff]   ;;  %v1489_v13 = vld [vmem:[%s2031_s0 + $0x90] sm:$0xff]  }
   0x5   :  { %1383 = vmatprep.mubr.bf16.mxu0 %v1471_v4  ;;  %v1487_v9 = vld [vmem:[%s2031_s0 + $0x80] sm:$0xff]   ;;  %v1488_v12 = vld [vmem:[%s2031_s0 + $0x88] sm:$0xff]   ;;  %v1474_v14 = vld [vmem:[%s2031_s0 + $0x18] sm:$0xff]  }
   0x6   :  { %1415 = vmatprep.mubr.bf16.mxu1 %v1487_v9  ;;  %v1475_v15 = vld [vmem:[%s2031_s0 + $0x20] sm:$0xff]   ;;  %v1490_v16 = vld [vmem:[%s2031_s0 + $0x98] sm:$0xff]   ;;  %v1476_v18 = vld [vmem:[%s2031_s0 + $0x28] sm:$0xff]  }
   0x7   :  { %1370 = vmatpush3.bf16.msra.mxu0 %v1464_v1  ;;  %1456 = vmatpush3.bf16.msra.mxu1 %v1464_v1  ;;  %v1491_v17 = vld [vmem:[%s2031_s0 + $0xa0] sm:$0xff]   ;;  %v1492_v19 = vld [vmem:[%s2031_s0 + $0xa8] sm:$0xff]   ;;  %v1477_v20 = vld [vmem:[%s2031_s0 + $0x30] sm:$0xff]  }
   0x8   :  { %1371 = vmatprep.subr.bf16.mxu0 %v1465_v2  ;;  %1449 = vmatprep.subr.bf16.mxu1 %v1465_v2  ;;  %v1493_v21 = vld [vmem:[%s2031_s0 + $0xb0] sm:$0xff]   ;;  %v1478_v22 = vld [vmem:[%s2031_s0 + $0x38] sm:$0xff]   ;;  %v1479_v24 = vld [vmem:[%s2031_s0 + $0x40] sm:$0xff]  }
   0x9   :  { %v1494_v23 = vld [vmem:[%s2031_s0 + $0xb8] sm:$0xff]   ;;  %v1495_v25 = vld [vmem:[%s2031_s0 + $0xc0] sm:$0xff]   ;;  %v1480_v26 = vld [vmem:[%s2031_s0 + $0x48] sm:$0xff]  }
   0xa   :  { %v1496_v27 = vld [vmem:[%s2031_s0 + $0xc8] sm:$0xff]   ;;  %v1481_v28 = vld [vmem:[%s2031_s0 + $0x50] sm:$0xff]   ;;  %v1482_v30 = vld [vmem:[%s2031_s0 + $0x58] sm:$0xff]  }
   0xb   :  { %1372 = vmatpush3.bf16.msra.mxu0 %v1465_v2  ;;  %1457 = vmatpush3.bf16.msra.mxu1 %v1465_v2  ;;  %v1497_v29 = vld [vmem:[%s2031_s0 + $0xd0] sm:$0xff]   ;;  %v1498_v31 = vld [vmem:[%s2031_s0 + $0xd8] sm:$0xff]   ;;  %v1483_v32 = vld [vmem:[%s2031_s0 + $0x60] sm:$0xff]  }
   0xc   :  { %1373 = vmatprep.subr.bf16.mxu0 %v1466_v3  ;;  %1450 = vmatprep.subr.bf16.mxu1 %v1466_v3  ;;  %v1499_v33 = vld [vmem:[%s2031_s0 + $0xe0] sm:$0xff]   ;;  %v1484_v34 = vld [vmem:[%s2031_s0 + $0x68] sm:$0xff]   ;;  %v1485_v36 = vld [vmem:[%s2031_s0 + $0x70] sm:$0xff]  }
   0xd   :  { %v1500_v35 = vld [vmem:[%s2031_s0 + $0xe8] sm:$0xff]   ;;  %v1501_v37 = vld [vmem:[%s2031_s0 + $0xf0] sm:$0xff]   ;;  %v1486_v38 = vld [vmem:[%s2031_s0 + $0x78] sm:$0xff]  }
   0xe   :  { %v1502_v39 = vld [vmem:[%s2031_s0 + $0xf8] sm:$0xff]  }
   0xf   :  { %1374 = vmatpush3.bf16.msra.mxu0 %v1466_v3  ;;  %1458 = vmatpush3.bf16.msra.mxu1 %v1466_v3 }
  0x10   :  { %1375 = vmatprep.subr.bf16.mxu0 %v1467_v5  ;;  %1451 = vmatprep.subr.bf16.mxu1 %v1467_v5 }
  0x13   :  { %1376 = vmatpush3.bf16.msra.mxu0 %v1467_v5  ;;  %1459 = vmatpush3.bf16.msra.mxu1 %v1467_v5 }
  0x14   :  { %1377 = vmatprep.subr.bf16.mxu0 %v1468_v6  ;;  %1452 = vmatprep.subr.bf16.mxu1 %v1468_v6 }
  0x17   :  { %1378 = vmatpush3.bf16.msra.mxu0 %v1468_v6  ;;  %1460 = vmatpush3.bf16.msra.mxu1 %v1468_v6 }
  0x18   :  { %1379 = vmatprep.subr.bf16.mxu0 %v1469_v7  ;;  %1453 = vmatprep.subr.bf16.mxu1 %v1469_v7 }
  0x1b   :  { %1380 = vmatpush3.bf16.msra.mxu0 %v1469_v7  ;;  %1461 = vmatpush3.bf16.msra.mxu1 %v1469_v7 }
  0x1c   :  { %1381 = vmatprep.subr.bf16.mxu0 %v1470_v8  ;;  %1454 = vmatprep.subr.bf16.mxu1 %v1470_v8 }
  0x1f   :  { %1382 = vmatpush3.bf16.msra.mxu0 %v1470_v8  ;;  %1462 = vmatpush3.bf16.msra.mxu1 %v1470_v8 }
  0x22   :  { %1384 = vmatmul.mubr.bf16.vlgmr.msra.gmra.mxu0 %v1472_v10  ;;  %1416 = vmatmul.mubr.bf16.vlgmr.msra.gmra.mxu1 %v1488_v12 }
  0x23   :  { %1387 = vmatprep.mubr.bf16.mxu0 %v1473_v11  ;;  %1419 = vmatprep.mubr.bf16.mxu1 %v1489_v13 }
  0x2a   :  { %1388 = vmatmul.mubr.bf16.gmra.mxu0 %v1474_v14  ;;  %1420 = vmatmul.mubr.bf16.gmra.mxu1 %v1490_v16 }
  0x2b   :  { %1391 = vmatprep.mubr.bf16.mxu0 %v1475_v15  ;;  %1423 = vmatprep.mubr.bf16.mxu1 %v1491_v17 }
  0x32   :  { %1392 = vmatmul.mubr.bf16.gmra.mxu0 %v1476_v18  ;;  %1424 = vmatmul.mubr.bf16.gmra.mxu1 %v1492_v19 }
  0x33   :  { %1395 = vmatprep.mubr.bf16.mxu0 %v1477_v20  ;;  %1427 = vmatprep.mubr.bf16.mxu1 %v1493_v21 }
  0x3a   :  { %1396 = vmatmul.mubr.bf16.gmra.mxu0 %v1478_v22  ;;  %1428 = vmatmul.mubr.bf16.gmra.mxu1 %v1494_v23 }
  0x3b   :  { %1399 = vmatprep.mubr.bf16.mxu0 %v1479_v24  ;;  %1431 = vmatprep.mubr.bf16.mxu1 %v1495_v25 }
  0x42   :  { %1400 = vmatmul.mubr.bf16.gmra.mxu0 %v1480_v26  ;;  %1432 = vmatmul.mubr.bf16.gmra.mxu1 %v1496_v27 }
  0x43   :  { %1403 = vmatprep.mubr.bf16.mxu0 %v1481_v28  ;;  %1435 = vmatprep.mubr.bf16.mxu1 %v1497_v29 }
  0x4a   :  { %1404 = vmatmul.mubr.bf16.gmra.mxu0 %v1482_v30  ;;  %1436 = vmatmul.mubr.bf16.gmra.mxu1 %v1498_v31 }
  0x4b   :  { %1407 = vmatprep.mubr.bf16.mxu0 %v1483_v32  ;;  %1439 = vmatprep.mubr.bf16.mxu1 %v1499_v33 }
  0x52   :  { %1408 = vmatmul.mubr.bf16.gmra.mxu0 %v1484_v34  ;;  %1440 = vmatmul.mubr.bf16.gmra.mxu1 %v1500_v35 }
  0x53   :  { %1411 = vmatprep.mubr.bf16.mxu0 %v1485_v36  ;;  %1443 = vmatprep.mubr.bf16.mxu1 %v1501_v37 }
  0x5a   :  { %1412 = vmatmul.mubr.bf16.gmra.mxu0 %v1486_v38  ;;  %1444 = vmatmul.mubr.bf16.gmra.mxu1 %v1502_v39 }
  0xe2   :  { %v1385_v40 = vpop.f32.mrf.mxu0  ;;  %v1643_v41 = vpop.f32.mrf.mxu1 }
  0xe3   :  { %625 = vst [vmem:[%s2032_s2 + $0x10] sm:$0xff] %v1385_v40  ;;  %657 = vst [vmem:[%s2032_s2 + $0x110] sm:$0xff] %v1643_v41  ;;  %v1145_v53 = vmul.f32 %v1385_v40, %v1385_v40 }
  0xe4   :  { %v368_v42 = vpop.f32.mrf.mxu0  ;;  %v1652_v43 = vpop.f32.mrf.mxu1 }
  0xe5   :  { %623 = vst [vmem:[%s2032_s2] sm:$0xff] %v368_v42  ;;  %655 = vst [vmem:[%s2032_s2 + $0x100] sm:$0xff] %v1652_v43  ;;  %v1143_v48 = vmul.f32 %v368_v42, %v368_v42 }
  0xe6   :  { %v1386_v44 = vpop.f32.mrf.mxu0  ;;  %v1661_v45 = vpop.f32.mrf.mxu1 }
  0xe7   :  { %626 = vst [vmem:[%s2032_s2 + $0x18] sm:$0xff] %v1386_v44  ;;  %658 = vst [vmem:[%s2032_s2 + $0x118] sm:$0xff] %v1661_v45  ;;  %v1146_v58 = vmul.f32 %v1386_v44, %v1386_v44 }
  0xe8   :  { %v371_v46 = vpop.f32.mrf.mxu0  ;;  %v1670_v47 = vpop.f32.mrf.mxu1 }
  0xe9   :  { %624 = vst [vmem:[%s2032_s2 + $0x8] sm:$0xff] %v371_v46  ;;  %v1074_v49 = vadd.f32 %v371_v46, %v368_v42  ;;  %v1144_v50 = vmul.f32 %v371_v46, %v371_v46  ;;  %656 = vst [vmem:[%s2032_s2 + $0x108] sm:$0xff] %v1670_v47 }
  0xea   :  { %v1389_v51 = vpop.f32.mrf.mxu0  ;;  %v1679_v52 = vpop.f32.mrf.mxu1 }
  0xeb   :  { %v1075_v54 = vadd.f32 %v1385_v40, %v1074_v49  ;;  %v1207_v55 = vadd.f32 %v1144_v50, %v1143_v48  ;;  %629 = vst [vmem:[%s2032_s2 + $0x30] sm:$0xff] %v1389_v51  ;;  %661 = vst [vmem:[%s2032_s2 + $0x130] sm:$0xff] %v1679_v52  ;;  %v1149_v9 = vmul.f32 %v1389_v51, %v1389_v51 }
  0xec   :  { %v384_v56 = vpop.f32.mrf.mxu0  ;;  %v1688_v57 = vpop.f32.mrf.mxu1 }
  0xed   :  { %v1208_v59 = vadd.f32 %v1207_v55, %v1145_v53  ;;  %627 = vst [vmem:[%s2032_s2 + $0x20] sm:$0xff] %v384_v56  ;;  %v1076_v60 = vadd.f32 %v1386_v44, %v1075_v54  ;;  %659 = vst [vmem:[%s2032_s2 + $0x120] sm:$0xff] %v1688_v57  ;;  %v1147_v0 = vmul.f32 %v384_v56, %v384_v56 }
  0xee   :  { %v1390_v61 = vpop.f32.mrf.mxu0  ;;  %v1697_v62 = vpop.f32.mrf.mxu1 }
  0xef   :  { %v1077_v63 = vadd.f32 %v1076_v60, %v384_v56  ;;  %v1209_v1 = vadd.f32 %v1208_v59, %v1146_v58  ;;  %630 = vst [vmem:[%s2032_s2 + $0x38] sm:$0xff] %v1390_v61  ;;  %662 = vst [vmem:[%s2032_s2 + $0x138] sm:$0xff] %v1697_v62  ;;  %v1150_v14 = vmul.f32 %v1390_v61, %v1390_v61 }
  0xf0   :  { %v387_v2 = vpop.f32.mrf.mxu0  ;;  %v1706_v3 = vpop.f32.mrf.mxu1 }
  0xf1   :  { %v1210_v4 = vadd.f32 %v1209_v1, %v1147_v0  ;;  %628 = vst [vmem:[%s2032_s2 + $0x28] sm:$0xff] %v387_v2  ;;  %v1078_v5 = vadd.f32 %v1077_v63, %v387_v2  ;;  %v1148_v6 = vmul.f32 %v387_v2, %v387_v2  ;;  %660 = vst [vmem:[%s2032_s2 + $0x128] sm:$0xff] %v1706_v3 }
  0xf2   :  { %v1393_v7 = vpop.f32.mrf.mxu0  ;;  %v1715_v8 = vpop.f32.mrf.mxu1 }
  0xf3   :  { %v1079_v10 = vadd.f32 %v1389_v51, %v1078_v5  ;;  %v1211_v11 = vadd.f32 %v1210_v4, %v1148_v6  ;;  %633 = vst [vmem:[%s2032_s2 + $0x50] sm:$0xff] %v1393_v7  ;;  %665 = vst [vmem:[%s2032_s2 + $0x150] sm:$0xff] %v1715_v8  ;;  %v1153_v29 = vmul.f32 %v1393_v7, %v1393_v7 }
  0xf4   :  { %v400_v12 = vpop.f32.mrf.mxu0  ;;  %v1724_v13 = vpop.f32.mrf.mxu1 }
  0xf5   :  { %v1212_v15 = vadd.f32 %v1211_v11, %v1149_v9  ;;  %631 = vst [vmem:[%s2032_s2 + $0x40] sm:$0xff] %v400_v12  ;;  %v1080_v16 = vadd.f32 %v1390_v61, %v1079_v10  ;;  %663 = vst [vmem:[%s2032_s2 + $0x140] sm:$0xff] %v1724_v13  ;;  %v1151_v20 = vmul.f32 %v400_v12, %v400_v12 }
  0xf6   :  { %v1394_v17 = vpop.f32.mrf.mxu0  ;;  %v1733_v18 = vpop.f32.mrf.mxu1 }
  0xf7   :  { %v1081_v19 = vadd.f32 %v1080_v16, %v400_v12  ;;  %v1213_v21 = vadd.f32 %v1212_v15, %v1150_v14  ;;  %634 = vst [vmem:[%s2032_s2 + $0x58] sm:$0xff] %v1394_v17  ;;  %666 = vst [vmem:[%s2032_s2 + $0x158] sm:$0xff] %v1733_v18  ;;  %v1154_v34 = vmul.f32 %v1394_v17, %v1394_v17 }
  0xf8   :  { %v403_v22 = vpop.f32.mrf.mxu0  ;;  %v1742_v23 = vpop.f32.mrf.mxu1 }
  0xf9   :  { %v1214_v24 = vadd.f32 %v1213_v21, %v1151_v20  ;;  %632 = vst [vmem:[%s2032_s2 + $0x48] sm:$0xff] %v403_v22  ;;  %v1082_v25 = vadd.f32 %v1081_v19, %v403_v22  ;;  %v1152_v26 = vmul.f32 %v403_v22, %v403_v22  ;;  %664 = vst [vmem:[%s2032_s2 + $0x148] sm:$0xff] %v1742_v23 }
  0xfa   :  { %v1397_v27 = vpop.f32.mrf.mxu0  ;;  %v1751_v28 = vpop.f32.mrf.mxu1 }
  0xfb   :  { %v1083_v30 = vadd.f32 %v1393_v7, %v1082_v25  ;;  %v1215_v31 = vadd.f32 %v1214_v24, %v1152_v26  ;;  %637 = vst [vmem:[%s2032_s2 + $0x70] sm:$0xff] %v1397_v27  ;;  %669 = vst [vmem:[%s2032_s2 + $0x170] sm:$0xff] %v1751_v28  ;;  %v1157_v54 = vmul.f32 %v1397_v27, %v1397_v27 }
  0xfc   :  { %v416_v32 = vpop.f32.mrf.mxu0  ;;  %v1760_v33 = vpop.f32.mrf.mxu1 }
  0xfd   :  { %v1216_v35 = vadd.f32 %v1215_v31, %v1153_v29  ;;  %635 = vst [vmem:[%s2032_s2 + $0x60] sm:$0xff] %v416_v32  ;;  %v1084_v36 = vadd.f32 %v1394_v17, %v1083_v30  ;;  %667 = vst [vmem:[%s2032_s2 + $0x160] sm:$0xff] %v1760_v33  ;;  %v1155_v40 = vmul.f32 %v416_v32, %v416_v32 }
  0xfe   :  { %v1398_v37 = vpop.f32.mrf.mxu0  ;;  %v1769_v38 = vpop.f32.mrf.mxu1 }
  0xff   :  { %v1085_v39 = vadd.f32 %v1084_v36, %v416_v32  ;;  %v1217_v42 = vadd.f32 %v1216_v35, %v1154_v34  ;;  %638 = vst [vmem:[%s2032_s2 + $0x78] sm:$0xff] %v1398_v37  ;;  %670 = vst [vmem:[%s2032_s2 + $0x178] sm:$0xff] %v1769_v38  ;;  %v1158_v60 = vmul.f32 %v1398_v37, %v1398_v37 }
 0x100   :  { %v419_v44 = vpop.f32.mrf.mxu0  ;;  %v1778_v46 = vpop.f32.mrf.mxu1 }
 0x101   :  { %v1218_v48 = vadd.f32 %v1217_v42, %v1155_v40  ;;  %636 = vst [vmem:[%s2032_s2 + $0x68] sm:$0xff] %v419_v44  ;;  %v1086_v49 = vadd.f32 %v1085_v39, %v419_v44  ;;  %v1156_v50 = vmul.f32 %v419_v44, %v419_v44  ;;  %668 = vst [vmem:[%s2032_s2 + $0x168] sm:$0xff] %v1778_v46 }
 0x102   :  { %v1401_v51 = vpop.f32.mrf.mxu0  ;;  %v1787_v53 = vpop.f32.mrf.mxu1 }
 0x103   :  { %v1087_v55 = vadd.f32 %v1397_v27, %v1086_v49  ;;  %v1219_v56 = vadd.f32 %v1218_v48, %v1156_v50  ;;  %641 = vst [vmem:[%s2032_s2 + $0x90] sm:$0xff] %v1401_v51  ;;  %673 = vst [vmem:[%s2032_s2 + $0x190] sm:$0xff] %v1787_v53  ;;  %v1161_v15 = vmul.f32 %v1401_v51, %v1401_v51 }
 0x104   :  { %v432_v58 = vpop.f32.mrf.mxu0  ;;  %v1796_v59 = vpop.f32.mrf.mxu1 }
 0x105   :  { %v1220_v61 = vadd.f32 %v1219_v56, %v1157_v54  ;;  %639 = vst [vmem:[%s2032_s2 + $0x80] sm:$0xff] %v432_v58  ;;  %v1088_v63 = vadd.f32 %v1398_v37, %v1087_v55  ;;  %671 = vst [vmem:[%s2032_s2 + $0x180] sm:$0xff] %v1796_v59  ;;  %v1159_v4 = vmul.f32 %v432_v58, %v432_v58 }
 0x106   :  { %v1402_v0 = vpop.f32.mrf.mxu0  ;;  %v1805_v1 = vpop.f32.mrf.mxu1 }
 0x107   :  { %v1089_v2 = vadd.f32 %v1088_v63, %v432_v58  ;;  %v1221_v5 = vadd.f32 %v1220_v61, %v1158_v60  ;;  %642 = vst [vmem:[%s2032_s2 + $0x98] sm:$0xff] %v1402_v0  ;;  %674 = vst [vmem:[%s2032_s2 + $0x198] sm:$0xff] %v1805_v1  ;;  %v1162_v21 = vmul.f32 %v1402_v0, %v1402_v0 }
 0x108   :  { %v435_v6 = vpop.f32.mrf.mxu0  ;;  %v1814_v7 = vpop.f32.mrf.mxu1 }
 0x109   :  { %v1222_v9 = vadd.f32 %v1221_v5, %v1159_v4  ;;  %640 = vst [vmem:[%s2032_s2 + $0x88] sm:$0xff] %v435_v6  ;;  %v1090_v10 = vadd.f32 %v1089_v2, %v435_v6  ;;  %v1160_v11 = vmul.f32 %v435_v6, %v435_v6  ;;  %672 = vst [vmem:[%s2032_s2 + $0x188] sm:$0xff] %v1814_v7 }
 0x10a   :  { %v1405_v12 = vpop.f32.mrf.mxu0  ;;  %v1823_v14 = vpop.f32.mrf.mxu1 }
 0x10b   :  { %v1091_v16 = vadd.f32 %v1401_v51, %v1090_v10  ;;  %v1223_v17 = vadd.f32 %v1222_v9, %v1160_v11  ;;  %645 = vst [vmem:[%s2032_s2 + $0xb0] sm:$0xff] %v1405_v12  ;;  %677 = vst [vmem:[%s2032_s2 + $0x1b0] sm:$0xff] %v1823_v14  ;;  %v1165_v40 = vmul.f32 %v1405_v12, %v1405_v12 }
 0x10c   :  { %v448_v19 = vpop.f32.mrf.mxu0  ;;  %v1832_v20 = vpop.f32.mrf.mxu1 }
 0x10d   :  { %v1224_v22 = vadd.f32 %v1223_v17, %v1161_v15  ;;  %643 = vst [vmem:[%s2032_s2 + $0xa0] sm:$0xff] %v448_v19  ;;  %v1092_v24 = vadd.f32 %v1402_v0, %v1091_v16  ;;  %675 = vst [vmem:[%s2032_s2 + $0x1a0] sm:$0xff] %v1832_v20  ;;  %v1163_v29 = vmul.f32 %v448_v19, %v448_v19 }
 0x10e   :  { %v1406_v25 = vpop.f32.mrf.mxu0  ;;  %v1841_v26 = vpop.f32.mrf.mxu1 }
 0x10f   :  { %v1093_v27 = vadd.f32 %v1092_v24, %v448_v19  ;;  %v1225_v30 = vadd.f32 %v1224_v22, %v1162_v21  ;;  %646 = vst [vmem:[%s2032_s2 + $0xb8] sm:$0xff] %v1406_v25  ;;  %678 = vst [vmem:[%s2032_s2 + $0x1b8] sm:$0xff] %v1841_v26  ;;  %v1166_v50 = vmul.f32 %v1406_v25, %v1406_v25 }
 0x110   :  { %v451_v31 = vpop.f32.mrf.mxu0  ;;  %v1850_v32 = vpop.f32.mrf.mxu1 }
 0x111   :  { %v1226_v34 = vadd.f32 %v1225_v30, %v1163_v29  ;;  %644 = vst [vmem:[%s2032_s2 + $0xa8] sm:$0xff] %v451_v31  ;;  %v1094_v35 = vadd.f32 %v1093_v27, %v451_v31  ;;  %v1164_v36 = vmul.f32 %v451_v31, %v451_v31  ;;  %676 = vst [vmem:[%s2032_s2 + $0x1a8] sm:$0xff] %v1850_v32 }
 0x112   :  { %v1409_v37 = vpop.f32.mrf.mxu0  ;;  %v1859_v39 = vpop.f32.mrf.mxu1 }
 0x113   :  { %v1095_v42 = vadd.f32 %v1405_v12, %v1094_v35  ;;  %v1227_v44 = vadd.f32 %v1226_v34, %v1164_v36  ;;  %649 = vst [vmem:[%s2032_s2 + $0xd0] sm:$0xff] %v1409_v37  ;;  %681 = vst [vmem:[%s2032_s2 + $0x1d0] sm:$0xff] %v1859_v39  ;;  %v1169_v10 = vmul.f32 %v1409_v37, %v1409_v37 }
 0x114   :  { %v464_v48 = vpop.f32.mrf.mxu0  ;;  %v1868_v49 = vpop.f32.mrf.mxu1 }
 0x115   :  { %v1228_v51 = vadd.f32 %v1227_v44, %v1165_v40  ;;  %647 = vst [vmem:[%s2032_s2 + $0xc0] sm:$0xff] %v464_v48  ;;  %v1096_v54 = vadd.f32 %v1406_v25, %v1095_v42  ;;  %679 = vst [vmem:[%s2032_s2 + $0x1c0] sm:$0xff] %v1868_v49  ;;  %v1167_v60 = vmul.f32 %v464_v48, %v464_v48 }
 0x116   :  { %v1410_v55 = vpop.f32.mrf.mxu0  ;;  %v1877_v56 = vpop.f32.mrf.mxu1 }
 0x117   :  { %v1097_v58 = vadd.f32 %v1096_v54, %v464_v48  ;;  %v1229_v61 = vadd.f32 %v1228_v51, %v1166_v50  ;;  %650 = vst [vmem:[%s2032_s2 + $0xd8] sm:$0xff] %v1410_v55  ;;  %682 = vst [vmem:[%s2032_s2 + $0x1d8] sm:$0xff] %v1877_v56  ;;  %v1170_v17 = vmul.f32 %v1410_v55, %v1410_v55 }
 0x118   :  { %v467_v63 = vpop.f32.mrf.mxu0  ;;  %v1886_v0 = vpop.f32.mrf.mxu1  ;;  %v1175_v51 = vmul.f32 %v1652_v43, %v1652_v43 }
 0x119   :  { %v1230_v2 = vadd.f32 %v1229_v61, %v1167_v60  ;;  %648 = vst [vmem:[%s2032_s2 + $0xc8] sm:$0xff] %v467_v63  ;;  %v1098_v4 = vadd.f32 %v1097_v58, %v467_v63  ;;  %v1168_v5 = vmul.f32 %v467_v63, %v467_v63  ;;  %680 = vst [vmem:[%s2032_s2 + $0x1c8] sm:$0xff] %v1886_v0 }
 0x11a   :  { %v1413_v6 = vpop.f32.mrf.mxu0  ;;  %v1895_v9 = vpop.f32.mrf.mxu1  ;;  %v1176_v60 = vmul.f32 %v1670_v47, %v1670_v47  ;;  %v1177_v63 = vmul.f32 %v1643_v41, %v1643_v41 }
 0x11b   :  { %v1099_v11 = vadd.f32 %v1409_v37, %v1098_v4  ;;  %v1231_v12 = vadd.f32 %v1230_v2, %v1168_v5  ;;  %653 = vst [vmem:[%s2032_s2 + $0xf0] sm:$0xff] %v1413_v6  ;;  %685 = vst [vmem:[%s2032_s2 + $0x1f0] sm:$0xff] %v1895_v9  ;;  %v1173_v37 = vmul.f32 %v1413_v6, %v1413_v6 }
 0x11c   :  { %v480_v15 = vpop.f32.mrf.mxu0  ;;  %v1904_v16 = vpop.f32.mrf.mxu1  ;;  %v1178_v5 = vmul.f32 %v1661_v45, %v1661_v45 }
 0x11d   :  { %v1232_v19 = vadd.f32 %v1231_v12, %v1169_v10  ;;  %651 = vst [vmem:[%s2032_s2 + $0xe0] sm:$0xff] %v480_v15  ;;  %v1100_v21 = vadd.f32 %v1410_v55, %v1099_v11  ;;  %683 = vst [vmem:[%s2032_s2 + $0x1e0] sm:$0xff] %v1904_v16  ;;  %v1171_v27 = vmul.f32 %v480_v15, %v480_v15 }
 0x11e   :  { %v1414_v22 = vpop.f32.mrf.mxu0  ;;  %v1913_v24 = vpop.f32.mrf.mxu1  ;;  %v1179_v11 = vmul.f32 %v1688_v57, %v1688_v57 }
 0x11f   :  { %v1101_v25 = vadd.f32 %v1100_v21, %v480_v15  ;;  %v1233_v29 = vadd.f32 %v1232_v19, %v1170_v17  ;;  %654 = vst [vmem:[%s2032_s2 + $0xf8] sm:$0xff] %v1414_v22  ;;  %686 = vst [vmem:[%s2032_s2 + $0x1f8] sm:$0xff] %v1913_v24  ;;  %v1174_v44 = vmul.f32 %v1414_v22, %v1414_v22 }
 0x120   :  { %v483_v30 = vpop.f32.mrf.mxu0  ;;  %v1922_v31 = vpop.f32.mrf.mxu1  ;;  %v1180_v17 = vmul.f32 %v1706_v3, %v1706_v3 }
 0x121   :  { %v1234_v34 = vadd.f32 %v1233_v29, %v1171_v27  ;;  %652 = vst [vmem:[%s2032_s2 + $0xe8] sm:$0xff] %v483_v30  ;;  %v1102_v35 = vadd.f32 %v1101_v25, %v483_v30  ;;  %v1172_v36 = vmul.f32 %v483_v30, %v483_v30  ;;  %684 = vst [vmem:[%s2032_s2 + $0x1e8] sm:$0xff] %v1922_v31 }
 0x122   :  { %v1183_v27 = vmul.f32 %v1724_v13, %v1724_v13 }
 0x123   :  { %v1103_v40 = vadd.f32 %v1413_v6, %v1102_v35  ;;  %v1235_v42 = vadd.f32 %v1234_v34, %v1172_v36  ;;  %v1184_v34 = vmul.f32 %v1742_v23, %v1742_v23 }
 0x125   :  { %v1104_v48 = vadd.f32 %v1414_v22, %v1103_v40  ;;  %v1236_v50 = vadd.f32 %v1235_v42, %v1173_v37  ;;  %v1187_v42 = vmul.f32 %v1760_v33, %v1760_v33 }
 0x127   :  { %v1237_v54 = vadd.f32 %v1236_v50, %v1174_v44  ;;  %v1105_v55 = vadd.f32 %v1104_v48, %v1652_v43  ;;  %v1188_v50 = vmul.f32 %v1778_v46, %v1778_v46 }
 0x129   :  { %v1106_v58 = vadd.f32 %v1105_v55, %v1670_v47  ;;  %v1238_v61 = vadd.f32 %v1237_v54, %v1175_v51 }
 0x12b   :  { %v1107_v2 = vadd.f32 %v1643_v41, %v1106_v58  ;;  %v1239_v4 = vadd.f32 %v1238_v61, %v1176_v60  ;;  %v1181_v41 = vmul.f32 %v1679_v52, %v1679_v52  ;;  %v1191_v60 = vmul.f32 %v1796_v59, %v1796_v59 }
 0x12d   :  { %v1240_v6 = vadd.f32 %v1239_v4, %v1177_v63  ;;  %v1108_v10 = vadd.f32 %v1661_v45, %v1107_v2  ;;  %v1182_v45 = vmul.f32 %v1697_v62, %v1697_v62  ;;  %v1192_v2 = vmul.f32 %v1814_v7, %v1814_v7 }
 0x12f   :  { %v1109_v43 = vadd.f32 %v1108_v10, %v1688_v57  ;;  %v1241_v12 = vadd.f32 %v1240_v6, %v1178_v5 }
 0x131   :  { %v1242_v47 = vadd.f32 %v1241_v12, %v1179_v11  ;;  %v1110_v15 = vadd.f32 %v1109_v43, %v1706_v3  ;;  %v1195_v43 = vmul.f32 %v1832_v20, %v1832_v20 }
 0x133   :  { %v1111_v19 = vadd.f32 %v1679_v52, %v1110_v15  ;;  %v1243_v21 = vadd.f32 %v1242_v47, %v1180_v17  ;;  %v1185_v52 = vmul.f32 %v1715_v8, %v1715_v8  ;;  %v1196_v47 = vmul.f32 %v1850_v32, %v1850_v32 }
 0x135   :  { %v1244_v22 = vadd.f32 %v1243_v21, %v1181_v41  ;;  %v1112_v25 = vadd.f32 %v1697_v62, %v1111_v19  ;;  %v1186_v62 = vmul.f32 %v1733_v18, %v1733_v18  ;;  %v1199_v21 = vmul.f32 %v1868_v49, %v1868_v49 }
 0x137   :  { %v1113_v57 = vadd.f32 %v1112_v25, %v1724_v13  ;;  %v1245_v29 = vadd.f32 %v1244_v22, %v1182_v45  ;;  %v1200_v25 = vmul.f32 %v1886_v0, %v1886_v0 }
 0x139   :  { %v1246_v30 = vadd.f32 %v1245_v29, %v1183_v27  ;;  %v1114_v3 = vadd.f32 %v1113_v57, %v1742_v23 }
 0x13b   :  { %v1115_v35 = vadd.f32 %v1715_v8, %v1114_v3  ;;  %v1247_v36 = vadd.f32 %v1246_v30, %v1184_v34  ;;  %v1189_v8 = vmul.f32 %v1751_v28, %v1751_v28  ;;  %v1203_v3 = vmul.f32 %v1904_v16, %v1904_v16 }
 0x13d   :  { %v1248_v37 = vadd.f32 %v1247_v36, %v1185_v52  ;;  %v1116_v40 = vadd.f32 %v1733_v18, %v1115_v35  ;;  %v1190_v18 = vmul.f32 %v1769_v38, %v1769_v38  ;;  %v1204_v35 = vmul.f32 %v1922_v31, %v1922_v31 }
 0x13f   :  { %v1117_v13 = vadd.f32 %v1116_v40, %v1760_v33  ;;  %v1249_v44 = vadd.f32 %v1248_v37, %v1186_v62 }
 0x141   :  { %v1250_v48 = vadd.f32 %v1249_v44, %v1187_v42  ;;  %v1118_v23 = vadd.f32 %v1117_v13, %v1778_v46 }
 0x143   :  { %v1119_v51 = vadd.f32 %v1751_v28, %v1118_v23  ;;  %v1251_v54 = vadd.f32 %v1250_v48, %v1188_v50  ;;  %v1193_v28 = vmul.f32 %v1787_v53, %v1787_v53 }
 0x145   :  { %v1252_v55 = vadd.f32 %v1251_v54, %v1189_v8  ;;  %v1120_v58 = vadd.f32 %v1769_v38, %v1119_v51  ;;  %v1194_v38 = vmul.f32 %v1805_v1, %v1805_v1 }
 0x147   :  { %v1121_v33 = vadd.f32 %v1120_v58, %v1796_v59  ;;  %v1253_v61 = vadd.f32 %v1252_v55, %v1190_v18 }
 0x149   :  { %v1254_v63 = vadd.f32 %v1253_v61, %v1191_v60  ;;  %v1122_v46 = vadd.f32 %v1121_v33, %v1814_v7 }
 0x14b   :  { %v1123_v4 = vadd.f32 %v1787_v53, %v1122_v46  ;;  %v1255_v5 = vadd.f32 %v1254_v63, %v1192_v2  ;;  %v1197_v53 = vmul.f32 %v1823_v14, %v1823_v14 }
 0x14d   :  { %v1256_v6 = vadd.f32 %v1255_v5, %v1193_v28  ;;  %v1124_v10 = vadd.f32 %v1805_v1, %v1123_v4  ;;  %v1198_v1 = vmul.f32 %v1841_v26, %v1841_v26 }
 0x14f   :  { %v1125_v59 = vadd.f32 %v1124_v10, %v1832_v20  ;;  %v1257_v11 = vadd.f32 %v1256_v6, %v1194_v38 }
 0x151   :  { %v1258_v12 = vadd.f32 %v1257_v11, %v1195_v43  ;;  %v1126_v7 = vadd.f32 %v1125_v59, %v1850_v32 }
 0x153   :  { %v1127_v15 = vadd.f32 %v1823_v14, %v1126_v7  ;;  %v1259_v17 = vadd.f32 %v1258_v12, %v1196_v47  ;;  %v1201_v14 = vmul.f32 %v1859_v39, %v1859_v39 }
 0x155   :  { %v1260_v41 = vadd.f32 %v1259_v17, %v1197_v53  ;;  %v1128_v19 = vadd.f32 %v1841_v26, %v1127_v15  ;;  %v1202_v26 = vmul.f32 %v1877_v56, %v1877_v56 }
 0x157   :  { %v1129_v20 = vadd.f32 %v1128_v19, %v1868_v49  ;;  %v1261_v45 = vadd.f32 %v1260_v41, %v1198_v1 }
 0x159   :  { %v1262_v22 = vadd.f32 %v1261_v45, %v1199_v21  ;;  %v1130_v32 = vadd.f32 %v1129_v20, %v1886_v0 }
 0x15b   :  { %v1131_v57 = vadd.f32 %v1859_v39, %v1130_v32  ;;  %v1263_v27 = vadd.f32 %v1262_v22, %v1200_v25  ;;  %v1205_v39 = vmul.f32 %v1895_v9, %v1895_v9 }
 0x15d   :  { %v1264_v29 = vadd.f32 %v1263_v27, %v1201_v14  ;;  %v1132_v30 = vadd.f32 %v1877_v56, %v1131_v57  ;;  %v1206_v56 = vmul.f32 %v1913_v24, %v1913_v24 }
 0x15f   :  { %v1133_v49 = vadd.f32 %v1132_v30, %v1904_v16  ;;  %v1265_v34 = vadd.f32 %v1264_v29, %v1202_v26 }
 0x161   :  { %v1266_v52 = vadd.f32 %v1265_v34, %v1203_v3  ;;  %v1134_v0 = vadd.f32 %v1133_v49, %v1922_v31 }
 0x163   :  { %v1135_v36 = vadd.f32 %v1895_v9, %v1134_v0  ;;  %v1267_v62 = vadd.f32 %v1266_v52, %v1204_v35 }
 0x165   :  { %v1136_v37 = vadd.f32 %v1913_v24, %v1135_v36  ;;  %v1268_v40 = vadd.f32 %v1267_v62, %v1205_v39 }
 0x167   :  { %v1137_v16 = vrot.slane %v1136_v37, 4  ;;  %v1269_v13 = vadd.f32 %v1268_v40, %v1206_v56 }
 0x169   :  { %v1138_v42 = vadd.f32 %v1137_v16, %v1136_v37  ;;  %v1270_v44 = vrot.slane %v1269_v13, 4 }
 0x16b   :  { %v1139_v48 = vrot.slane %v1138_v42, 2  ;;  %v1271_v23 = vadd.f32 %v1270_v44, %v1269_v13 }
 0x16d   :  { %v1140_v50 = vadd.f32 %v1139_v48, %v1138_v42  ;;  %v1272_v31 = vrot.slane %v1271_v23, 2 }
 0x16f   :  { %v1141_v8 = vrot.slane %v1140_v50, 1  ;;  %v1273_v51 = vadd.f32 %v1272_v31, %v1271_v23 }
 0x171   :  { %v1274_v54 = vrot.slane %v1273_v51, 1  ;;  %v1142_v9 = vadd.f32 %v1141_v8, %v1140_v50 }
 0x173   :  { %v1275_v18 = vadd.f32 %v1274_v54, %v1273_v51 }
 0x175   :  { %v1277_v55 = vsel %vm1276_vm0, %v1142_v9, %v1275_v18 }
 0x176   :  { %1278 = vst [vmem:[%s2033_s3] sm:$0x3] %v1277_v55 }

// kernel: block_forward.5
= control target key start
LH: loop header
LB: loop body
LE: loop exit
PB: predicated region body
PF: predicated region fallthrough
CT: control target
= control target key end

     0   :  { %s3359_s21 = smov 0   ;;  %s4352_s0 = inlined_call_operand.vmem [shape: f32[2,9,9,512], index: 0, kind: input, shape index: {}]   ;;  %s4353_s1 = inlined_call_operand.vmem [shape: f32[9,9,512], index: 1, kind: input, shape index: {}]   ;;  %s4354_s2 = inlined_call_operand.vmem [shape: f32[1,1,512], index: 2, kind: input, shape index: {}]   ;;  %s4355_s3 = inlined_call_operand.vmem [shape: f32[1,1,512], index: 3, kind: input, shape index: {}]   ;;  %s4356_s4 = inlined_call_operand.vmem [shape: bf16[9,128,128], index: 4, kind: input, shape index: {}]   ;;  %s4357_s5 = inlined_call_operand.vmem [shape: f32[2,64,128], index: 5, kind: output, shape index: {0}]   ;;  %s4358_s6 = inlined_call_operand.vmem [shape: f32[2,2,128], index: 6, kind: output, shape index: {1}]  }
   0x1 LB: > { %s2555_s22 = sadd.s32 4294967295, %s3322_s21   ;;  %p2559_p0 = scmp.ge.s32.totalorder %s3322_s21, 1  ;;  %s3322_s21 = sphi %s3359_s21, %s17_s21  }
   0x2   : > { %p215_p1 = scmp.lt.s32.totalorder %s3322_s21, 3 }
   0x4   : > { %p216_p2 = pnand %p2559_p0, %p215_p1 }
   0x6   : > { %219 = sbr.rel (%p216_p2) target bundleno = 414 (0x19e), region = 40 }
   0xb   : > { %v3244_v0 = vld [vmem:[%s4356_s4 + $0x78] sm:$0xff]   ;;  %p249_p3 = scmp.lt.s32.totalorder %s2555_s22, 1  ;;  %v3246_v2 = vld [vmem:[%s4356_s4 + $0x70] sm:$0xff]   ;;  %v3248_v4 = vld [vmem:[%s4356_s4 + $0x68] sm:$0xff]   ;;  %v334_v5 = vlaneseq  ;;  %vm1081_vm0 = vsmask.f32 3328 }
   0xc   : > { %v3245_v1 = vld [vmem:[%s4356_s4 + $0x38] sm:$0xff]   ;;  %3003 = vmatprep.subr.bf16.mxu0 %v3244_v0  ;;  %v3247_v3 = vld [vmem:[%s4356_s4 + $0x30] sm:$0xff]   ;;  %v3249_v6 = vld [vmem:[%s4356_s4 + $0x28] sm:$0xff]   ;;  %vm1082_vm1 = vsmask.f32 7440  ;;  %vm2466_vm3 = vcmask 1040384  }
   0xd   : > { %3027 = vmatprep.subr.bf16.mxu1 %v3245_v1  ;;  %3004 = vmatpush3.bf16.msra.mxu0 %v3244_v0  ;;  %s4400_s22 = smov (!%p249_p3, %s2555_s22), 1  ;;  %v3250_v7 = vld [vmem:[%s4356_s4 + $0x60] sm:$0xff]   ;;  %v3390_v8 = vshrl.u32 %v334_v5, 7  ;;  %v3252_v10 = vld [vmem:[%s4356_s4 + $0x58] sm:$0xff]   ;;  %v3254_v15 = vld [vmem:[%s4356_s4 + $0x50] sm:$0xff]  }
   0xe   : > { %3028 = vmatpush3.bf16.msra.mxu1 %v3245_v1  ;;  %3005 = vmatprep.subr.bf16.mxu0 %v3246_v2  ;;  %v3251_v9 = vld [vmem:[%s4356_s4 + $0x20] sm:$0xff]   ;;  %s3235_s15 = smul.u32 576, %s4400_s22  ;;  %v3253_v12 = vld [vmem:[%s4356_s4 + $0x18] sm:$0xff]   ;;  %v3255_v19 = vld [vmem:[%s4356_s4 + $0x10] sm:$0xff]   ;;  %s2836_s20 = sshll.u32 %s4400_s22, 6 }
   0xf   : > { %3029 = vmatprep.subr.bf16.mxu1 %v3247_v3  ;;  %v336_v11 = vsub.s32 0, %v3390_v8  ;;  %v340_v13 = vsub.s32 1, %v3390_v8  ;;  %v348_v14 = vsub.s32 3, %v3390_v8  ;;  %v3418_v18 = vld [vmem:[%s4354_s2] sm:$0xf]  ;;  %v3256_v23 = vld [vmem:[%s4356_s4 + $0x48] sm:$0xff]   ;;  %vm3764_vm2 = vmor %vm1081_vm0, %vm1082_vm1  ;;  %s4322_s26 = scalar_lea.vmem %s4357_s5, %s2836_s20 }
  0x10   : > { %s3406_s24 = scalar_lea.vmem %s4352_s0, %s3235_s15  ;;  %v3432_v22 = vld [vmem:[%s4355_s3] sm:$0xf]  ;;  %v3257_v29 = vld [vmem:[%s4356_s4 + $0x8] sm:$0xff]   ;;  %s2563_s27 = sshll.u32 %s4400_s22, 1 }
  0x11   : > { %3006 = vmatpush3.bf16.msra.mxu0 %v3246_v2  ;;  %v265_v16 = vld [vmem:[%s3406_s24 + $0x8] sm:$0xff]  ;;  %v3424_v20 = vrot.slane %v3418_v18, %v336_v11  ;;  %v3427_v21 = vrot.slane %v3418_v18, %v340_v13  ;;  %v3438_v24 = vrot.slane %v3432_v22, %v336_v11  ;;  %v3441_v25 = vrot.slane %v3432_v22, %v340_v13  ;;  %v264_v26 = vld [vmem:[%s3406_s24] sm:$0xff]  ;;  %s262_s29 = scalar_lea.vmem %s4358_s6, %s2563_s27 }
  0x12   : > { %3030 = vmatpush3.bf16.msra.mxu1 %v3247_v3  ;;  %3007 = vmatprep.subr.bf16.mxu0 %v3248_v4  ;;  %v273_v17 = vld [vmem:[%s3406_s24 + $0x48] sm:$0xff]  ;;  %v272_v27 = vld [vmem:[%s3406_s24 + $0x40] sm:$0xff]  ;;  %v3446_v28 = vrot.slane %v3418_v18, %v348_v14  ;;  %v3470_v42 = vrot.slane %v3432_v22, %v348_v14 }
  0x13   : > { %3031 = vmatprep.subr.bf16.mxu1 %v3249_v6  ;;  %v355_v30 = vmul.f32 %v3427_v21, %v265_v16  ;;  %v363_v31 = vmul.f32 %v3427_v21, %v273_v17  ;;  %v354_v32 = vmul.f32 %v3424_v20, %v264_v26  ;;  %v362_v33 = vmul.f32 %v3424_v20, %v272_v27  ;;  %v281_v34 = vld [vmem:[%s3406_s24 + $0x88] sm:$0xff]  ;;  %v580_v38 = vld [vmem:[%s4353_s1] sm:$0xff]  ;;  %v3261_v26 = vld [vmem:[%s4356_s4 + $0xf8] sm:$0xff]  }
  0x14   : > { %v289_v35 = vld [vmem:[%s3406_s24 + $0xc8] sm:$0xff]  ;;  %v371_v39 = vmul.f32 %v3427_v21, %v281_v34  ;;  %v280_v41 = vld [vmem:[%s3406_s24 + $0x80] sm:$0xff] }
  0x15   : > { %3008 = vmatpush3.bf16.msra.mxu0 %v3248_v4  ;;  %v581_v36 = vld [vmem:[%s4353_s1 + $0x8] sm:$0xff]  ;;  %v379_v40 = vmul.f32 %v3427_v21, %v289_v35  ;;  %v445_v43 = vadd.f32 %v3441_v25, %v355_v30  ;;  %v453_v44 = vadd.f32 %v3441_v25, %v363_v31  ;;  %v444_v45 = vadd.f32 %v3438_v24, %v354_v32  ;;  %v588_v47 = vld [vmem:[%s4353_s1 + $0x40] sm:$0xff] }
  0x16   : > { %3032 = vmatpush3.bf16.msra.mxu1 %v3249_v6  ;;  %3009 = vmatprep.subr.bf16.mxu0 %v3250_v7  ;;  %v589_v37 = vld [vmem:[%s4353_s1 + $0x48] sm:$0xff]  ;;  %v452_v46 = vadd.f32 %v3438_v24, %v362_v33  ;;  %v288_v49 = vld [vmem:[%s3406_s24 + $0xc0] sm:$0xff]  ;;  %v461_v51 = vadd.f32 %v3441_v25, %v371_v39  ;;  %v370_v54 = vmul.f32 %v3424_v20, %v280_v41  ;;  %v3262_v39 = vld [vmem:[%s4356_s4 + $0xb0] sm:$0xff]  }
  0x17   : > { %3033 = vmatprep.subr.bf16.mxu1 %v3251_v9  ;;  %v597_v48 = vld [vmem:[%s4353_s1 + $0x88] sm:$0xff]  ;;  %v3258_v50 = vld [vmem:[%s4356_s4 + $0x40] sm:$0xff]   ;;  %v469_v52 = vadd.f32 %v3441_v25, %v379_v40  ;;  %v378_v55 = vmul.f32 %v3424_v20, %v288_v49  ;;  %v513_v57 = vmax.f32 %v445_v43, 0.0  ;;  %v521_v58 = vmax.f32 %v453_v44, 0.0  ;;  %v3263_v40 = vld [vmem:[%s4356_s4 + $0xf0] sm:$0xff]  }
  0x18   : > { %v605_v53 = vld [vmem:[%s4353_s1 + $0xc8] sm:$0xff]  ;;  %v3259_v56 = vld [vmem:[%s4356_s4] sm:$0xff]   ;;  %v512_v59 = vmax.f32 %v444_v45, 0.0  ;;  %v520_v60 = vmax.f32 %v452_v46, 0.0  ;;  %v529_v61 = vmax.f32 %v461_v51, 0.0  ;;  %v460_v63 = vadd.f32 %v3438_v24, %v370_v54 }
  0x19   : > { %3010 = vmatpush3.bf16.msra.mxu0 %v3250_v7  ;;  %v537_v62 = vmax.f32 %v469_v52, 0.0  ;;  %v468_v0 = vadd.f32 %v3438_v24, %v378_v55  ;;  %v596_v1 = vld [vmem:[%s4353_s1 + $0x80] sm:$0xff]  ;;  %v649_v3 = vmul.f32 %v581_v36, %v513_v57  ;;  %v3504_v4 = vmul.f32 %v589_v37, %v521_v58  ;;  %v3264_v51 = vld [vmem:[%s4356_s4 + $0xa8] sm:$0xff]  }
  0x1a   : > { %3034 = vmatpush3.bf16.msra.mxu1 %v3251_v9  ;;  %3011 = vmatprep.subr.bf16.mxu0 %v3252_v10  ;;  %v604_v2 = vld [vmem:[%s4353_s1 + $0xc0] sm:$0xff]  ;;  %v648_v5 = vmul.f32 %v580_v38, %v512_v59  ;;  %v3506_v6 = vmul.f32 %v588_v47, %v520_v60  ;;  %v3508_v7 = vmul.f32 %v597_v48, %v529_v61  ;;  %v297_v48 = vld [vmem:[%s3406_s24 + $0x108] sm:$0xff]  ;;  %v344_v49 = vsub.s32 2, %v3390_v8 }
  0x1b   : > { %3035 = vmatprep.subr.bf16.mxu1 %v3253_v12  ;;  %v3510_v9 = vmul.f32 %v605_v53, %v537_v62  ;;  %v536_v11 = vmax.f32 %v468_v0, 0.0  ;;  %v2837_v13 = vpack.c.bf16 %v3504_v4, %v649_v3  ;;  %v305_v52 = vld [vmem:[%s3406_s24 + $0x148] sm:$0xff]  ;;  %v387_v53 = vmul.f32 %v3427_v21, %v297_v48  ;;  %v296_v58 = vld [vmem:[%s3406_s24 + $0x100] sm:$0xff] }
  0x1c   : > { %v2841_v14 = vpack.c.bf16 %v3506_v6, %v648_v5  ;;  %v2847_v16 = vpack.c.bf16 %v3506_v6, %v3506_v6  ;;  %v395_v57 = vmul.f32 %v3427_v21, %v305_v52  ;;  %v304_v59 = vld [vmem:[%s3406_s24 + $0x140] sm:$0xff]  ;;  %v386_v0 = vmul.f32 %v3424_v20, %v296_v58  ;;  %v321_v3 = vld [vmem:[%s3406_s24 + $0x1c8] sm:$0xff] }
  0x1d   : > { %3012 = vmatpush3.bf16.msra.mxu0 %v3252_v10  ;;  %v528_v10 = vmax.f32 %v460_v63, 0.0  ;;  %3019 = vmatprep.mubr.bf16.mxu0 %v2837_v13  ;;  %v2838_v32 = vpack.c.bf16 %v3510_v9, %v3508_v7  ;;  %v477_v62 = vadd.f32 %v3441_v25, %v387_v53  ;;  %v613_v63 = vld [vmem:[%s4353_s1 + $0x108] sm:$0xff]  ;;  %v612_v13 = vld [vmem:[%s4353_s1 + $0x100] sm:$0xff] }
  0x1e   : > { %3036 = vmatpush3.bf16.msra.mxu1 %v3253_v12  ;;  %3013 = vmatprep.subr.bf16.mxu0 %v3254_v15  ;;  %v3260_v12 = vld [vmem:[%s4356_s4 + $0xb8] sm:$0xff]   ;;  %v1099_v30 = vshrl.u32 %v2847_v16, 16  ;;  %v1102_v31 = vshll.u32 %v2847_v16, 16  ;;  %v312_v16 = vld [vmem:[%s3406_s24 + $0x180] sm:$0xff] }
  0x1f   : > { %3037 = vmatprep.subr.bf16.mxu1 %v3255_v19  ;;  %v3519_v17 = vmul.f32 %v596_v1, %v528_v10  ;;  %3043 = vmatprep.mubr.bf16.mxu1 %v2841_v14  ;;  %v394_v1 = vmul.f32 %v3424_v20, %v304_v59  ;;  %v3266_v10 = vld [vmem:[%s4356_s4 + $0xa0] sm:$0xff]  }
  0x20   : > { %v3538_v37 = vrot.slane %v1099_v30, 4  ;;  %v3548_v41 = vrot.slane %v1102_v31, 5  ;;  %v620_v31 = vld [vmem:[%s4353_s1 + $0x140] sm:$0xff] }
  0x21   : > { %3014 = vmatpush3.bf16.msra.mxu0 %v3254_v15  ;;  %v2845_v15 = vpack.c.bf16 %v648_v5, %v648_v5  ;;  %v484_v30 = vadd.f32 %v3438_v24, %v394_v1 }
  0x22   : > { %3038 = vmatpush3.bf16.msra.mxu1 %v3255_v19  ;;  %3015 = vmatprep.subr.bf16.mxu0 %v3256_v23  ;;  %v3521_v19 = vmul.f32 %v604_v2, %v536_v11  ;;  %v1105_v60 = vor.u32 %v3548_v41, %v3538_v37  ;;  %v313_v2 = vld [vmem:[%s3406_s24 + $0x188] sm:$0xff]  ;;  %v485_v11 = vadd.f32 %v3441_v25, %v395_v57  ;;  %v266_v37 = vld [vmem:[%s3406_s24 + $0x10] sm:$0xff] }
  0x23   : > { %3039 = vmatprep.subr.bf16.mxu1 %v3257_v29  ;;  %v1088_v27 = vshll.u32 %v2845_v15, 16  ;;  %v403_v14 = vmul.f32 %v3427_v21, %v313_v2  ;;  %v552_v52 = vmax.f32 %v484_v30, 0.0  ;;  %v3663_v30 = vrot.slane %v3432_v22, %v344_v49  ;;  %v3270_v22 = vld [vmem:[%s4356_s4 + $0x90] sm:$0xff]  }
  0x24   : > { %v2851_v33 = vpack.c.bf16 %v3521_v19, %v3521_v19  ;;  %v2842_v38 = vpack.c.bf16 %v3521_v19, %v3519_v17  ;;  %v274_v41 = vld [vmem:[%s3406_s24 + $0x50] sm:$0xff] }
  0x25   : > { %3016 = vmatpush3.bf16.msra.mxu0 %v3256_v23  ;;  %v1085_v23 = vshrl.u32 %v2845_v15, 16  ;;  %v3536_v36 = vrot.slane %v1088_v27, 5  ;;  %v411_v15 = vmul.f32 %v3427_v21, %v321_v3  ;;  %v476_v27 = vadd.f32 %v3438_v24, %v386_v0  ;;  %v632_v0 = vld [vmem:[%s4353_s1 + $0x1a0] sm:$0x1] }
  0x26   : > { %3040 = vmatpush3.bf16.msra.mxu1 %v3257_v29  ;;  %3017 = vmatprep.subr.bf16.mxu0 %v3258_v50  ;;  %v2849_v29 = vpack.c.bf16 %v3519_v17, %v3519_v17  ;;  %v1127_v45 = vshrl.u32 %v2851_v33, 16  ;;  %v1130_v47 = vshll.u32 %v2851_v33, 16  ;;  %v402_v33 = vmul.f32 %v3424_v20, %v312_v16 }
  0x27   : > { %3041 = vmatprep.subr.bf16.mxu1 %v3259_v56  ;;  %v3534_v35 = vrot.slane %v1085_v23, 4  ;;  %v545_v23 = vmax.f32 %v477_v62, 0.0  ;;  %v544_v48 = vmax.f32 %v476_v27, 0.0  ;;  %v3635_v2 = vmul.f32 %v620_v31, %v552_v52  ;;  %v3272_v52 = vld [vmem:[%s4356_s4 + $0x88] sm:$0xff]  }
  0x28   : > { %v1113_v43 = vshrl.u32 %v2849_v29, 16  ;;  %v1116_v44 = vshll.u32 %v2849_v29, 16  ;;  %v3573_v61 = vrot.slane %v1127_v45, 4  ;;  %v3583_v5 = vrot.slane %v1130_v47, 5  ;;  %v320_v29 = vld [vmem:[%s3406_s24 + $0x1c0] sm:$0xff] }
  0x29   : > { %3018 = vmatpush3.bf16.msra.mxu0 %v3258_v50  ;;  %v1091_v50 = vor.u32 %v3536_v36, %v3534_v35  ;;  %v410_v45 = vmul.f32 %v3424_v20, %v320_v29  ;;  %v3617_v47 = vmul.f32 %v613_v63, %v545_v23  ;;  %v492_v53 = vadd.f32 %v3438_v24, %v402_v33  ;;  %v628_v63 = vld [vmem:[%s4353_s1 + $0x180] sm:$0xff] }
  0x2a   : > { %3042 = vmatpush3.bf16.msra.mxu1 %v3259_v56  ;;  %3051 = vmatprep.subr.bf16.mxu0 %v3260_v12  ;;  %v3561_v54 = vrot.slane %v1113_v43, 4  ;;  %v3563_v55 = vrot.slane %v1116_v44, 5  ;;  %v3265_v56 = vld [vmem:[%s4356_s4 + $0xe8] sm:$0xff]   ;;  %v501_v43 = vadd.f32 %v3441_v25, %v411_v15  ;;  %v3633_v1 = vmul.f32 %v612_v13, %v544_v48 }
  0x2b   : > { %3075 = vmatprep.subr.bf16.mxu1 %v3261_v26  ;;  %v637_v44 = vld [vmem:[%s4353_s1 + $0x1c8] sm:$0xff]  ;;  %v500_v62 = vadd.f32 %v3438_v24, %v410_v45  ;;  %v560_v3 = vmax.f32 %v492_v53, 0.0  ;;  %v3652_v16 = vrot.slane %v3418_v18, %v344_v49  ;;  %v3676_v29 = vrot.slane %v1091_v50, 4  ;;  %v3271_v50 = vld [vmem:[%s4356_s4 + $0xd0] sm:$0xff]  }
  0x2c   : > { %3020 = vmatmul.mubr.bf16.vlgmr.msra.gmra.mxu0 %v2838_v32  ;;  %v629_v32 = vld [vmem:[%s4353_s1 + $0x188] sm:$0xff]  ;;  %v569_v59 = vmax.f32 %v501_v43, 0.0  ;;  %v2843_v23 = vpack.c.bf16 %v3635_v2, %v3633_v1  ;;  %v1133_v8 = vor.u32 %v3583_v5, %v3573_v61  ;;  %v3689_v35 = vpack.c.bf16 %v3633_v1, %v3633_v1  ;;  %v584_v61 = vld [vmem:[%s4353_s1 + $0x20] sm:$0x1] }
  0x2d   : > { %3044 = vmatmul.mubr.bf16.vlgmr.msra.gmra.mxu1 %v2842_v38  ;;  %3052 = vmatpush3.bf16.msra.mxu0 %v3260_v12  ;;  %v621_v12 = vld [vmem:[%s4353_s1 + $0x148] sm:$0xff]  ;;  %v553_v38 = vmax.f32 %v485_v11, 0.0  ;;  %v636_v11 = vld [vmem:[%s4353_s1 + $0x1c0] sm:$0xff]  ;;  %v568_v15 = vmax.f32 %v500_v62, 0.0  ;;  %v3658_v27 = vmul.f32 %v628_v63, %v560_v3  ;;  %v3702_v5 = vrot.slane %v1105_v60, 4 }
  0x2e   : > { %3076 = vmatpush3.bf16.msra.mxu1 %v3261_v26  ;;  %3053 = vmatprep.subr.bf16.mxu0 %v3262_v39  ;;  %v3267_v26 = vld [vmem:[%s4356_s4 + $0xe0] sm:$0xff]   ;;  %v3718_v60 = vpack.c.bf16 %v3635_v2, %v3635_v2  ;;  %v364_v62 = vmul.f32 %v3652_v16, %v274_v41  ;;  %v3273_v63 = vld [vmem:[%s4356_s4 + $0xc8] sm:$0xff]  }
  0x2f   : > { %3077 = vmatprep.subr.bf16.mxu1 %v3263_v40  ;;  %v3625_v57 = vmul.f32 %v621_v12, %v553_v38  ;;  %v3667_v31 = vmul.f32 %v636_v11, %v568_v15  ;;  %3047 = vmatprep.mubr.bf16.mxu1 %v2843_v23  ;;  %v284_v38 = vld [vmem:[%s3406_s24 + $0xa0] sm:$0x1] }
  0x30   : > { %v608_v15 = vld [vmem:[%s4353_s1 + $0xe0] sm:$0x1] }
  0x31   : > { %3054 = vmatpush3.bf16.msra.mxu0 %v3262_v39  ;;  %v493_v39 = vadd.f32 %v3441_v25, %v403_v14  ;;  %v2839_v12 = vpack.c.bf16 %v3625_v57, %v3617_v47  ;;  %v3647_v14 = vmul.f32 %v637_v44, %v569_v59  ;;  %v2844_v36 = vpack.c.bf16 %v3667_v31, %v3658_v27  ;;  %v592_v44 = vld [vmem:[%s4353_s1 + $0x60] sm:$0x1] }
  0x32   : > { %3078 = vmatpush3.bf16.msra.mxu1 %v3263_v40  ;;  %3055 = vmatprep.subr.bf16.mxu0 %v3264_v51  ;;  %v3623_v40 = vld [vmem:[%s4356_s4 + $0x98] sm:$0xff]   ;;  %v356_v59 = vmul.f32 %v3652_v16, %v266_v37 }
  0x33   : > { %3079 = vmatprep.subr.bf16.mxu1 %v3265_v56  ;;  %v561_v58 = vmax.f32 %v493_v39, 0.0  ;;  %4364 = vst [vmem:[#allocation2_spill] sm:$0xff] %v3647_v14  ;;  %3023 = vmatprep.mubr.bf16.mxu0 %v2839_v12 }
  0x35   : > { %3056 = vmatpush3.bf16.msra.mxu0 %v3264_v51  ;;  %v3269_v51 = vld [vmem:[%s4356_s4 + $0xd8] sm:$0xff]   ;;  %v3645_v13 = vmul.f32 %v629_v32, %v561_v58  ;;  %v268_v32 = vld [vmem:[%s3406_s24 + $0x20] sm:$0x1]  ;;  %3048 = vmatmul.mubr.bf16.gmra.mxu1 %v2844_v36 }
  0x36   : > { %3080 = vmatpush3.bf16.msra.mxu1 %v3265_v56  ;;  %3057 = vmatprep.subr.bf16.mxu0 %v3266_v10  ;;  %v1119_v56 = vor.u32 %v3563_v55, %v3561_v54  ;;  %v276_v54 = vld [vmem:[%s3406_s24 + $0x60] sm:$0x1]  ;;  %v358_v49 = vmul.f32 %v3424_v20, %v268_v32  ;;  %v454_v32 = vadd.f32 %v3663_v30, %v364_v62 }
  0x37   : > { %3081 = vmatprep.subr.bf16.mxu1 %v3267_v26  ;;  %v2840_v18 = vpack.c.bf16 %v3647_v14, %v3645_v13  ;;  %v366_v33 = vmul.f32 %v3424_v20, %v276_v54  ;;  %v600_v58 = vld [vmem:[%s4353_s1 + $0xa0] sm:$0x1]  ;;  %v282_v54 = vld [vmem:[%s3406_s24 + $0x90] sm:$0xff] }
  0x38   : > { %v448_v39 = vadd.f32 %v3438_v24, %v358_v49  ;;  %v3712_v48 = vrot.slane %v1119_v56, 4  ;;  %v290_v49 = vld [vmem:[%s3406_s24 + $0xd0] sm:$0xff] }
  0x39   : > { %3058 = vmatpush3.bf16.msra.mxu0 %v3266_v10  ;;  %v292_v10 = vld [vmem:[%s3406_s24 + $0xe0] sm:$0x1]  ;;  %v456_v43 = vadd.f32 %v3438_v24, %v366_v33 }
  0x3a   : > { %3082 = vmatpush3.bf16.msra.mxu1 %v3267_v26  ;;  %3059 = vmatprep.subr.bf16.mxu0 %v3623_v40  ;;  %v374_v26 = vmul.f32 %v3424_v20, %v284_v38  ;;  %v382_v45 = vmul.f32 %v3424_v20, %v292_v10  ;;  %v516_v3 = vmax.f32 %v448_v39, 0.0  ;;  %v582_v10 = vld [vmem:[%s4353_s1 + $0x10] sm:$0xff] }
  0x3b   : > { %3083 = vmatprep.subr.bf16.mxu1 %v3269_v51  ;;  %3024 = vmatmul.mubr.bf16.gmra.mxu0 %v2840_v18  ;;  %v524_v11 = vmax.f32 %v456_v43, 0.0  ;;  %v3739_v18 = vrot.slane %v1133_v8, 4  ;;  %v372_v8 = vmul.f32 %v3652_v16, %v282_v54  ;;  %v522_v43 = vmax.f32 %v454_v32, 0.0 }
  0x3c   : > { %v464_v53 = vadd.f32 %v3438_v24, %v374_v26  ;;  %v472_v12 = vadd.f32 %v3438_v24, %v382_v45  ;;  %v652_v33 = vmul.f32 %v584_v61, %v516_v3  ;;  %v380_v45 = vmul.f32 %v3652_v16, %v290_v49 }
  0x3d   : > { %3060 = vmatpush3.bf16.msra.mxu0 %v3623_v40  ;;  %v446_v40 = vadd.f32 %v3663_v30, %v356_v59  ;;  %v660_v38 = vmul.f32 %v592_v44, %v524_v11  ;;  %v462_v41 = vadd.f32 %v3663_v30, %v372_v8  ;;  %v3783_v8 = vpack.c.bf16 %v3658_v27, %v3658_v27 }
  0x3e   : > { %3084 = vmatpush3.bf16.msra.mxu1 %v3269_v51  ;;  %3061 = vmatprep.subr.bf16.mxu0 %v3270_v22  ;;  %v532_v23 = vmax.f32 %v464_v53, 0.0  ;;  %v540_v36 = vmax.f32 %v472_v12, 0.0  ;;  %v590_v51 = vld [vmem:[%s4353_s1 + $0x50] sm:$0xff]  ;;  %v2846_v37 = vpack.c.bf16 %v652_v33, %v652_v33  ;;  %v3274_v53 = vld [vmem:[%s4356_s4 + $0x80] sm:$0xff]   ;;  %v470_v49 = vadd.f32 %v3663_v30, %v380_v45 }
  0x3f   : > { %3085 = vmatprep.subr.bf16.mxu1 %v3271_v50  ;;  %v514_v39 = vmax.f32 %v446_v40, 0.0  ;;  %v2848_v61 = vpack.c.bf16 %v660_v38, %v660_v38  ;;  %v658_v3 = vmul.f32 %v590_v51, %v522_v43  ;;  %v3779_v51 = vld [vmem:[%s4356_s4 + $0x178] sm:$0xff]   ;;  %v300_v43 = vld [vmem:[%s3406_s24 + $0x120] sm:$0x1]  ;;  %v1172_v46 = vshll.u32 %v3783_v8, 16 }
  0x40   : > { %v668_v26 = vmul.f32 %v600_v58, %v532_v23  ;;  %v676_v44 = vmul.f32 %v608_v15, %v540_v36  ;;  %v1141_v58 = vshrl.u32 %v3689_v35, 16  ;;  %v1094_v11 = vshll.u32 %v2846_v37, 16  ;;  %v3309_v23 = vld [vmem:[%s4356_s4 + $0x230] sm:$0xff]  }
  0x41   : > { %3062 = vmatpush3.bf16.msra.mxu0 %v3270_v22  ;;  %v650_v62 = vmul.f32 %v582_v10, %v514_v39  ;;  %v3275_v22 = vld [vmem:[%s4356_s4 + $0xc0] sm:$0xff]   ;;  %v1108_v12 = vshll.u32 %v2848_v61, 16  ;;  %v3771_v10 = vpack.c.bf16 %v658_v3, %v658_v3  ;;  %v598_v39 = vld [vmem:[%s4353_s1 + $0x90] sm:$0xff]  ;;  %v3793_v37 = vpack.c.bf16 %v3667_v31, %v3667_v31 }
  0x42   : > { %3086 = vmatpush3.bf16.msra.mxu1 %v3271_v50  ;;  %3063 = vmatprep.subr.bf16.mxu0 %v3272_v52  ;;  %v2850_v59 = vpack.c.bf16 %v668_v26, %v668_v26  ;;  %v2852_v15 = vpack.c.bf16 %v676_v44, %v676_v44  ;;  %v1144_v50 = vshll.u32 %v3689_v35, 16  ;;  %v1096_v33 = vrot.slane %v1094_v11, 5  ;;  %v3276_v35 = vld [vmem:[%s4356_s4 + $0x138] sm:$0xff]  }
  0x43   : > { %3087 = vmatprep.subr.bf16.mxu1 %v3273_v63  ;;  %v2861_v32 = vpack.c.bf16 %v658_v3, %v650_v62  ;;  %v3768_v54 = vpack.c.bf16 %v650_v62, %v650_v62  ;;  %v1110_v38 = vrot.slane %v1108_v12, 5  ;;  %v530_v26 = vmax.f32 %v462_v41, 0.0  ;;  %v606_v41 = vld [vmem:[%s4353_s1 + $0xd0] sm:$0xff] }
  0x44   : > { %v1122_v40 = vshll.u32 %v2850_v59, 16  ;;  %v1136_v36 = vshll.u32 %v2852_v15, 16  ;;  %v3789_v45 = vrot.slane %v1141_v58, 4  ;;  %v1097_v61 = vsel %vm3764_vm2, %v3676_v29, %v1096_v33  ;;  %v308_v59 = vld [vmem:[%s3406_s24 + $0x160] sm:$0x1] }
  0x45   : > { %3064 = vmatpush3.bf16.msra.mxu0 %v3272_v52  ;;  %3091 = vmatprep.mubr.bf16.mxu1 %v2861_v32  ;;  %v1699_v29 = vshrl.u32 %v3768_v54, 16  ;;  %v1702_v58 = vshll.u32 %v3768_v54, 16  ;;  %v1713_v11 = vshrl.u32 %v3771_v10, 16  ;;  %v1716_v12 = vshll.u32 %v3771_v10, 16 }
  0x46   : > { %3088 = vmatpush3.bf16.msra.mxu1 %v3273_v63  ;;  %3065 = vmatprep.subr.bf16.mxu0 %v3274_v53  ;;  %v1124_v52 = vrot.slane %v1122_v40, 5  ;;  %v3801_v63 = vsel %vm3764_vm2, %v3702_v5, %v1110_v38  ;;  %v1138_v44 = vrot.slane %v1136_v36, 5  ;;  %v538_v15 = vmax.f32 %v470_v49, 0.0  ;;  %v316_v36 = vld [vmem:[%s3406_s24 + $0x1a0] sm:$0x1] }
  0x47   : > { %3089 = vmatprep.subr.bf16.mxu1 %v3275_v22  ;;  %v2636_v62 = vcombine.low %v1097_v61, %v3801_v63  ;;  %v666_v40 = vmul.f32 %v598_v39, %v530_v26  ;;  %v390_v32 = vmul.f32 %v3424_v20, %v300_v43  ;;  %v398_v49 = vmul.f32 %v3424_v20, %v308_v59  ;;  %v624_v26 = vld [vmem:[%s4353_s1 + $0x160] sm:$0x1] }
  0x48   : > { %v3811_v3 = vsel %vm3764_vm2, %v3712_v48, %v1124_v52  ;;  %v3818_v5 = vsel %vm3764_vm2, %v3739_v18, %v1138_v44  ;;  %v1146_v18 = vrot.slane %v1144_v50, 5  ;;  %v674_v54 = vmul.f32 %v606_v41, %v538_v15  ;;  %v324_v43 = vld [vmem:[%s3406_s24 + $0x1e0] sm:$0x1] }
  0x49   : > { %3066 = vmatpush3.bf16.msra.mxu0 %v3274_v53  ;;  %4367 = vst [vmem:[#allocation3_spill] sm:$0xff] %v3818_v5  ;;  %3067 = vmatprep.mubr.bf16.mxu0 %v2636_v62  ;;  %v2637_v48 = vcombine.low %v3811_v3, %v3818_v5  ;;  %v3278_v53 = vld [vmem:[%s4356_s4 + $0x130] sm:$0xff]   ;;  %v1155_v33 = vshrl.u32 %v3718_v60, 16  ;;  %v1158_v38 = vshll.u32 %v3718_v60, 16  ;;  %v3836_v10 = vrot.slane %v1699_v29, 4 }
  0x4a   : > { %3090 = vmatpush3.bf16.msra.mxu1 %v3275_v22  ;;  %3099 = vmatprep.subr.bf16.mxu0 %v3276_v35  ;;  %v616_v22 = vld [vmem:[%s4353_s1 + $0x120] sm:$0x1]  ;;  %v3838_v50 = vpack.c.bf16 %v666_v40, %v666_v40  ;;  %v480_v52 = vadd.f32 %v3438_v24, %v390_v32  ;;  %v1147_v39 = vor.u32 %v1146_v18, %v3789_v45  ;;  %v3279_v60 = vld [vmem:[%s4356_s4 + $0x170] sm:$0xff]   ;;  %v3853_v29 = vrot.slane %v1702_v58, 5  ;;  %v3281_v58 = vld [vmem:[%s4356_s4 + $0x168] sm:$0xff]  }
  0x4b   : > { %3123 = vmatprep.subr.bf16.mxu1 %v3779_v51  ;;  %v2862_v61 = vpack.c.bf16 %v674_v54, %v666_v40  ;;  %v3846_v44 = vpack.c.bf16 %v674_v54, %v674_v54  ;;  %v488_v41 = vadd.f32 %v3438_v24, %v398_v49  ;;  %v1157_v59 = vrot.slane %v1155_v33, 4  ;;  %v330_v62 = vld [vmem:[%s3406_s24 + $0x220] sm:$0x1] }
  0x4c   : > { %3068 = vmatmul.mubr.bf16.vlgmr.msra.gmra.mxu0 %v2637_v48  ;;  %v3855_v15 = vrot.slane %v1713_v11, 4  ;;  %v548_v45 = vmax.f32 %v480_v52, 0.0  ;;  %v406_v48 = vmul.f32 %v3424_v20, %v316_v36  ;;  %v3861_v40 = vrot.slane %v1716_v12, 5  ;;  %v328_v49 = vld [vmem:[%s3406_s24 + $0x200] sm:$0xff] }
  0x4d   : > { %3100 = vmatpush3.bf16.msra.mxu0 %v3276_v35  ;;  %v3280_v35 = vld [vmem:[%s4356_s4 + $0x128] sm:$0xff]   ;;  %3092 = vmatmul.mubr.bf16.vlgmr.msra.gmra.mxu1 %v2862_v61  ;;  %v1727_v32 = vshrl.u32 %v3838_v50, 16  ;;  %v556_v18 = vmax.f32 %v488_v41, 0.0  ;;  %v1160_v54 = vrot.slane %v1158_v38, 5  ;;  %v1148_v36 = vrot.slane %v1147_v39, 4 }
  0x4e   : > { %3101 = vmatprep.subr.bf16.mxu0 %v3278_v53  ;;  %3124 = vmatpush3.bf16.msra.mxu1 %v3779_v51  ;;  %v684_v33 = vmul.f32 %v616_v22, %v548_v45  ;;  %v414_v52 = vmul.f32 %v3424_v20, %v324_v43  ;;  %v418_v55 = vmul.f32 %v3424_v20, %v328_v49  ;;  %v640_v39 = vld [vmem:[%s4353_s1 + $0x1e0] sm:$0x1] }
  0x4f   : > { %3125 = vmatprep.subr.bf16.mxu1 %v3279_v60  ;;  %v692_v38 = vmul.f32 %v624_v26, %v556_v18  ;;  %v1161_v41 = vor.u32 %v1160_v54, %v1157_v59  ;;  %v420_v51 = vmul.f32 %v3424_v20, %v330_v62  ;;  %v496_v22 = vadd.f32 %v3438_v24, %v406_v48  ;;  %v644_v45 = vld [vmem:[%s4353_s1 + $0x200] sm:$0xff] }
  0x50   : > { %v2854_v56 = vpack.c.bf16 %v684_v33, %v684_v33  ;;  %v504_v59 = vadd.f32 %v3438_v24, %v414_v52  ;;  %v646_v20 = vld [vmem:[%s4353_s1 + $0x220] sm:$0x1]  ;;  %v1169_v62 = vshrl.u32 %v3783_v8, 16  ;;  %v508_v54 = vadd.f32 %v3438_v24, %v418_v55 }
  0x51   : > { %3102 = vmatpush3.bf16.msra.mxu0 %v3278_v53  ;;  %v3282_v53 = vld [vmem:[%s4356_s4 + $0x120] sm:$0xff]   ;;  %v2856_v26 = vpack.c.bf16 %v692_v38, %v692_v38  ;;  %v1162_v43 = vrot.slane %v1161_v41, 4  ;;  %v510_v49 = vadd.f32 %v3438_v24, %v420_v51  ;;  %v564_v33 = vmax.f32 %v496_v22, 0.0  ;;  %v298_v51 = vld [vmem:[%s3406_s24 + $0x110] sm:$0xff]  ;;  %v3284_v22 = vld [vmem:[%s4356_s4 + $0x118] sm:$0xff]  }
  0x52   : > { %3103 = vmatprep.subr.bf16.mxu0 %v3280_v35  ;;  %v3283_v48 = vld [vmem:[%s4356_s4 + $0x160] sm:$0xff]   ;;  %3126 = vmatpush3.bf16.msra.mxu1 %v3279_v60  ;;  %v1150_v18 = vshll.u32 %v2854_v56, 16  ;;  %v572_v38 = vmax.f32 %v504_v59, 0.0  ;;  %v1171_v41 = vrot.slane %v1169_v62, 4  ;;  %v576_v61 = vmax.f32 %v508_v54, 0.0  ;;  %v3286_v54 = vld [vmem:[%s4356_s4 + $0x110] sm:$0xff]  }
  0x53   : > { %v1164_v52 = vshll.u32 %v2856_v26, 16  ;;  %3127 = vmatprep.subr.bf16.mxu1 %v3281_v58  ;;  %v578_v12 = vmax.f32 %v510_v49, 0.0  ;;  %v700_v11 = vmul.f32 %v632_v0, %v564_v33  ;;  %v1174_v55 = vrot.slane %v1172_v46, 5  ;;  %v306_v0 = vld [vmem:[%s3406_s24 + $0x150] sm:$0xff] }
  0x54   : > { %v1152_v34 = vrot.slane %v1150_v18, 5  ;;  %v708_v60 = vmul.f32 %v640_v39, %v572_v38  ;;  %v1183_v24 = vshrl.u32 %v3793_v37, 16 }
  0x55   : > { %3104 = vmatpush3.bf16.msra.mxu0 %v3280_v35  ;;  %v1166_v56 = vrot.slane %v1164_v52, 5  ;;  %v3908_v35 = vmul.f32 %v644_v45, %v576_v61  ;;  %v714_v26 = vmul.f32 %v646_v20, %v578_v12  ;;  %v2858_v59 = vpack.c.bf16 %v700_v11, %v700_v11 }
  0x56   : > { %3105 = vmatprep.subr.bf16.mxu0 %v3282_v53  ;;  %v3906_v8 = vsel %vm3764_vm2, %v1148_v36, %v1152_v34  ;;  %3128 = vmatpush3.bf16.msra.mxu1 %v3281_v58  ;;  %v2860_v62 = vpack.c.bf16 %v708_v60, %v708_v60  ;;  %v1175_v18 = vor.u32 %v1174_v55, %v1171_v41  ;;  %v3285_v34 = vld [vmem:[%s4356_s4 + $0x158] sm:$0xff]   ;;  %v1185_v58 = vrot.slane %v1183_v24, 4  ;;  %v614_v55 = vld [vmem:[%s4353_s1 + $0x110] sm:$0xff] }
  0x57   : > { %4368 = vst [vmem:[#allocation4_spill] sm:$0xff] %v3906_v8  ;;  %v3913_v46 = vsel %vm3764_vm2, %v1162_v43, %v1166_v56  ;;  %3129 = vmatprep.subr.bf16.mxu1 %v3283_v48  ;;  %v1178_v11 = vshll.u32 %v2858_v59, 16  ;;  %v1186_v12 = vshll.u32 %v3793_v37, 16  ;;  %v2893_v45 = vpack.c.bf16 %v3908_v35, %v3908_v35  ;;  %v622_v24 = vld [vmem:[%s4353_s1 + $0x150] sm:$0xff] }
  0x58   : > { %v2638_v36 = vcombine.low %v3906_v8, %v3913_v46  ;;  %v1176_v61 = vrot.slane %v1175_v18, 4  ;;  %v1192_v43 = vshll.u32 %v2860_v62, 16  ;;  %v2894_v20 = vpack.c.bf16 %v714_v26, %v714_v26  ;;  %v322_v26 = vld [vmem:[%s3406_s24 + $0x1d0] sm:$0xff]  ;;  %v267_v18 = vld [vmem:[%s3406_s24 + $0x18] sm:$0xff] }
  0x59   : > { %3106 = vmatpush3.bf16.msra.mxu0 %v3282_v53  ;;  %v1180_v49 = vrot.slane %v1178_v11, 5  ;;  %v1188_v33 = vrot.slane %v1186_v12, 5  ;;  %v388_v52 = vmul.f32 %v3652_v16, %v298_v51  ;;  %v396_v37 = vmul.f32 %v3652_v16, %v306_v0  ;;  %v314_v53 = vld [vmem:[%s3406_s24 + $0x190] sm:$0xff] }
  0x5a   : > { %3107 = vmatprep.subr.bf16.mxu0 %v3284_v22  ;;  %3071 = vmatprep.mubr.bf16.mxu0 %v2638_v36  ;;  %v1194_v38 = vrot.slane %v1192_v43, 5  ;;  %v2264_v41 = vshrl.u32 %v2893_v45, 16  ;;  %v2267_v56 = vshll.u32 %v2893_v45, 16  ;;  %v2273_v60 = vshll.u32 %v2894_v20, 16  ;;  %v3287_v51 = vld [vmem:[%s4356_s4 + $0x150] sm:$0xff]   ;;  %v275_v36 = vld [vmem:[%s3406_s24 + $0x58] sm:$0xff] }
  0x5b   : > { %3130 = vmatpush3.bf16.msra.mxu1 %v3283_v48  ;;  %v3943_v48 = vsel %vm3764_vm2, %v1176_v61, %v1180_v49  ;;  %v1189_v59 = vor.u32 %v1188_v33, %v1185_v58  ;;  %v478_v0 = vadd.f32 %v3663_v30, %v388_v52  ;;  %v486_v62 = vadd.f32 %v3663_v30, %v396_v37  ;;  %v3288_v20 = vld [vmem:[%s4356_s4 + $0x108] sm:$0xff]  }
  0x5c   : > { %3131 = vmatprep.subr.bf16.mxu1 %v3285_v34  ;;  %v2266_v11 = vrot.slane %v2264_v41, 4  ;;  %v2269_v12 = vrot.slane %v2267_v56, 5  ;;  %v2275_v43 = vrot.slane %v2273_v60, 5  ;;  %v404_v45 = vmul.f32 %v3652_v16, %v314_v53  ;;  %v3289_v37 = vld [vmem:[%s4356_s4 + $0x148] sm:$0xff]  }
  0x5d   : > { %3108 = vmatpush3.bf16.msra.mxu0 %v3284_v22  ;;  %v1190_v61 = vrot.slane %v1189_v59, 4  ;;  %v546_v49 = vmax.f32 %v478_v0, 0.0  ;;  %v554_v58 = vmax.f32 %v486_v62, 0.0  ;;  %v412_v33 = vmul.f32 %v3652_v16, %v322_v26  ;;  %v630_v26 = vld [vmem:[%s4353_s1 + $0x190] sm:$0xff] }
  0x5e   : > { %3109 = vmatprep.subr.bf16.mxu0 %v3286_v54  ;;  %v2270_v52 = vor.u32 %v2269_v12, %v2266_v11  ;;  %v494_v22 = vadd.f32 %v3663_v30, %v404_v45  ;;  %v357_v53 = vmul.f32 %v3446_v28, %v267_v18  ;;  %v365_v41 = vmul.f32 %v3446_v28, %v275_v36 }
  0x5f   : > { %3132 = vmatpush3.bf16.msra.mxu1 %v3285_v34  ;;  %v3962_v56 = vsel %vm3764_vm2, %v1190_v61, %v1194_v38  ;;  %v682_v60 = vmul.f32 %v614_v55, %v546_v49  ;;  %v690_v59 = vmul.f32 %v622_v24, %v554_v58  ;;  %v502_v34 = vadd.f32 %v3663_v30, %v412_v33  ;;  %v3290_v38 = vld [vmem:[%s4356_s4 + $0x100] sm:$0xff]  }
  0x60   : > { %3133 = vmatprep.subr.bf16.mxu1 %v3287_v51  ;;  %4369 = vst [vmem:[#allocation5_spill] sm:$0xff] %v3962_v56  ;;  %v2639_v0 = vcombine.low %v3943_v48, %v3962_v56  ;;  %v2271_v62 = vrot.slane %v2270_v52, 4  ;;  %v562_v18 = vmax.f32 %v494_v22, 0.0  ;;  %v447_v55 = vadd.f32 %v3470_v42, %v357_v53  ;;  %v3291_v49 = vld [vmem:[%s4356_s4 + $0x140] sm:$0xff]  }
  0x61   : > { %3110 = vmatpush3.bf16.msra.mxu0 %v3286_v54  ;;  %v2863_v24 = vpack.c.bf16 %v690_v59, %v682_v60  ;;  %v2877_v36 = vpack.c.bf16 %v682_v60, %v682_v60  ;;  %v2879_v11 = vpack.c.bf16 %v690_v59, %v690_v59  ;;  %v570_v12 = vmax.f32 %v502_v34, 0.0  ;;  %v638_v54 = vld [vmem:[%s4353_s1 + $0x1d0] sm:$0xff]  ;;  %v283_v60 = vld [vmem:[%s3406_s24 + $0x98] sm:$0xff] }
  0x62   : > { %3111 = vmatprep.subr.bf16.mxu0 %v3288_v20  ;;  %3072 = vmatmul.mubr.bf16.gmra.mxu0 %v2639_v0  ;;  %v3979_v45 = vsel %vm3764_vm2, %v2271_v62, %v2275_v43  ;;  %v698_v61 = vmul.f32 %v630_v26, %v562_v18  ;;  %v455_v58 = vadd.f32 %v3470_v42, %v365_v41  ;;  %v515_v33 = vmax.f32 %v447_v55, 0.0  ;;  %v591_v41 = vld [vmem:[%s4353_s1 + $0x58] sm:$0xff] }
  0x63   : > { %3134 = vmatpush3.bf16.msra.mxu1 %v3287_v51  ;;  %4370 = vst [vmem:[#allocation6_spill] sm:$0xff] %v3979_v45  ;;  %v583_v51 = vld [vmem:[%s4353_s1 + $0x18] sm:$0xff]  ;;  %v3990_v52 = vrot.slane %v1727_v32, 4  ;;  %3095 = vmatprep.mubr.bf16.mxu1 %v2863_v24  ;;  %v1755_v22 = vshrl.u32 %v2877_v36, 16  ;;  %v1758_v53 = vshll.u32 %v2877_v36, 16  ;;  %v1769_v34 = vshrl.u32 %v2879_v11, 16 }
  0x64   : > { %3135 = vmatprep.subr.bf16.mxu1 %v3289_v37  ;;  %v291_v59 = vld [vmem:[%s3406_s24 + $0xd8] sm:$0xff]  ;;  %v1772_v26 = vshll.u32 %v2879_v11, 16  ;;  %v706_v0 = vmul.f32 %v638_v54, %v570_v12  ;;  %v523_v32 = vmax.f32 %v455_v58, 0.0  ;;  %v4371_v18 = vshll.u32 %v3838_v50, 16  ;;  %v270_v12 = vld [vmem:[%s3406_s24 + $0x30] sm:$0x1] }
  0x65   : > { %3112 = vmatpush3.bf16.msra.mxu0 %v3288_v20  ;;  %v4002_v62 = vld [vmem:[%s4356_s4 + $0x1b8] sm:$0xff]   ;;  %v4372_v20 = vshrl.u32 %v3846_v44, 16  ;;  %v4012_v36 = vpack.c.bf16 %v698_v61, %v698_v61  ;;  %v651_v11 = vmul.f32 %v583_v51, %v515_v33  ;;  %v4373_v54 = vshll.u32 %v3846_v44, 16  ;;  %v278_v51 = vld [vmem:[%s3406_s24 + $0x70] sm:$0x1] }
  0x66   : > { %3113 = vmatprep.subr.bf16.mxu0 %v3290_v38  ;;  %v4006_v55 = vrot.slane %v4371_v18, 5  ;;  %v2864_v43 = vpack.c.bf16 %v706_v0, %v698_v61  ;;  %v4019_v39 = vpack.c.bf16 %v706_v0, %v706_v0  ;;  %v4024_v50 = vld [vmem:[%s4356_s4 + $0x1f8] sm:$0xff]   ;;  %v4026_v18 = vrot.slane %v1755_v22, 4 }
  0x67   : > { %v4010_v24 = vrot.slane %v4372_v20, 4  ;;  %3136 = vmatpush3.bf16.msra.mxu1 %v3289_v37  ;;  %v4017_v58 = vrot.slane %v4373_v54, 5  ;;  %v659_v37 = vmul.f32 %v591_v41, %v523_v32  ;;  %v373_v33 = vmul.f32 %v3446_v28, %v283_v60 }
  0x68   : > { %3137 = vmatprep.subr.bf16.mxu1 %v3291_v49  ;;  %v381_v44 = vmul.f32 %v3446_v28, %v291_v59  ;;  %v4031_v61 = vrot.slane %v1758_v53, 5  ;;  %v4033_v0 = vrot.slane %v1769_v34, 4  ;;  %v4035_v20 = vrot.slane %v1772_v26, 5  ;;  %3096 = vmatmul.mubr.bf16.gmra.mxu1 %v2864_v43  ;;  %v286_v59 = vld [vmem:[%s3406_s24 + $0xb0] sm:$0x1]  ;;  %v599_v43 = vld [vmem:[%s4353_s1 + $0x98] sm:$0xff] }
  0x69   : > { %3114 = vmatpush3.bf16.msra.mxu0 %v3290_v38  ;;  %v360_v54 = vmul.f32 %v3652_v16, %v270_v12  ;;  %v2865_v22 = vpack.c.bf16 %v659_v37, %v651_v11  ;;  %v463_v41 = vadd.f32 %v3470_v42, %v373_v33  ;;  %v294_v53 = vld [vmem:[%s3406_s24 + $0xf0] sm:$0x1]  ;;  %v368_v32 = vmul.f32 %v3652_v16, %v278_v51 }
  0x6a   : > { %3147 = vmatprep.subr.bf16.mxu0 %v4002_v62  ;;  %v471_v60 = vadd.f32 %v3470_v42, %v381_v44  ;;  %v586_v12 = vld [vmem:[%s4353_s1 + $0x30] sm:$0x1]  ;;  %v1705_v26 = vor.u32 %v3853_v29, %v3836_v10  ;;  %v1719_v51 = vor.u32 %v3861_v40, %v3855_v15 }
  0x6b   : > { %3138 = vmatpush3.bf16.msra.mxu1 %v3291_v49  ;;  %v607_v49 = vld [vmem:[%s4353_s1 + $0xd8] sm:$0xff]  ;;  %v450_v11 = vadd.f32 %v3663_v30, %v360_v54  ;;  %3115 = vmatprep.mubr.bf16.mxu0 %v2865_v22  ;;  %v531_v37 = vmax.f32 %v463_v41, 0.0  ;;  %v594_v44 = vld [vmem:[%s4353_s1 + $0x70] sm:$0x1]  ;;  %v458_v34 = vadd.f32 %v3663_v30, %v368_v32  ;;  %v376_v22 = vmul.f32 %v3652_v16, %v286_v59 }
  0x6c   : > { %3171 = vmatprep.subr.bf16.mxu1 %v4024_v50  ;;  %v539_v33 = vmax.f32 %v471_v60, 0.0  ;;  %v299_v54 = vld [vmem:[%s3406_s24 + $0x118] sm:$0xff]  ;;  %v384_v41 = vmul.f32 %v3652_v16, %v294_v53  ;;  %v1706_v8 = vrot.slane %v1705_v26, 4  ;;  %v1720_v5 = vrot.slane %v1719_v51, 4  ;;  %v602_v10 = vld [vmem:[%s4353_s1 + $0xb0] sm:$0x1] }
  0x6d   : > { %v518_v38 = vmax.f32 %v450_v11, 0.0  ;;  %v307_v60 = vld [vmem:[%s3406_s24 + $0x158] sm:$0xff]  ;;  %v667_v45 = vmul.f32 %v599_v43, %v531_v37  ;;  %v610_v29 = vld [vmem:[%s4353_s1 + $0xf0] sm:$0x1]  ;;  %v526_v40 = vmax.f32 %v458_v34, 0.0  ;;  %v466_v53 = vadd.f32 %v3663_v30, %v376_v22 }
  0x6e   : > { %v675_v56 = vmul.f32 %v607_v49, %v539_v33  ;;  %v3294_v15 = vld [vmem:[%s4356_s4 + $0x1b0] sm:$0xff]   ;;  %v474_v43 = vadd.f32 %v3663_v30, %v384_v41  ;;  %v315_v26 = vld [vmem:[%s3406_s24 + $0x198] sm:$0xff]  ;;  %v1733_v11 = vor.u32 %v4006_v55, %v3990_v52  ;;  %v1747_v37 = vor.u32 %v4017_v58, %v4010_v24 }
  0x6f   : > { %v654_v59 = vmul.f32 %v586_v12, %v518_v38  ;;  %v323_v49 = vld [vmem:[%s3406_s24 + $0x1d8] sm:$0xff]  ;;  %v389_v33 = vmul.f32 %v3446_v28, %v299_v54  ;;  %v662_v51 = vmul.f32 %v594_v44, %v526_v40  ;;  %v534_v34 = vmax.f32 %v466_v53, 0.0  ;;  %v302_v54 = vld [vmem:[%s3406_s24 + $0x130] sm:$0x1] }
  0x70   : > { %v2866_v32 = vpack.c.bf16 %v675_v56, %v667_v45  ;;  %v542_v38 = vmax.f32 %v474_v43, 0.0  ;;  %v1734_v12 = vrot.slane %v1733_v11, 4  ;;  %v1748_v22 = vrot.slane %v1747_v37, 4  ;;  %v615_v45 = vld [vmem:[%s4353_s1 + $0x118] sm:$0xff] }
  0x71   : > { %v2870_v14 = vpack.c.bf16 %v654_v59, %v654_v59  ;;  %v397_v41 = vmul.f32 %v3446_v28, %v307_v60  ;;  %v479_v56 = vadd.f32 %v3470_v42, %v389_v33  ;;  %v2872_v52 = vpack.c.bf16 %v662_v51, %v662_v51  ;;  %v623_v44 = vld [vmem:[%s4353_s1 + $0x158] sm:$0xff] }
  0x72   : > { %3116 = vmatmul.mubr.bf16.vlgmr.msra.gmra.mxu0 %v2866_v32  ;;  %v670_v24 = vmul.f32 %v602_v10, %v534_v34  ;;  %v678_v58 = vmul.f32 %v610_v29, %v542_v38  ;;  %v405_v59 = vmul.f32 %v3446_v28, %v315_v26  ;;  %v413_v53 = vmul.f32 %v3446_v28, %v323_v49  ;;  %v310_v10 = vld [vmem:[%s3406_s24 + $0x170] sm:$0x1]  ;;  %v631_v26 = vld [vmem:[%s4353_s1 + $0x198] sm:$0xff] }
  0x73   : > { %v1708_v55 = vshll.u32 %v2870_v14, 16  ;;  %3148 = vmatpush3.bf16.msra.mxu0 %v4002_v62  ;;  %v487_v60 = vadd.f32 %v3470_v42, %v397_v41  ;;  %v547_v40 = vmax.f32 %v479_v56, 0.0  ;;  %v3296_v14 = vld [vmem:[%s4356_s4 + $0x1a8] sm:$0xff]   ;;  %v1722_v62 = vshll.u32 %v2872_v52, 16  ;;  %v639_v41 = vld [vmem:[%s4353_s1 + $0x1d8] sm:$0xff] }
  0x74   : > { %3149 = vmatprep.subr.bf16.mxu0 %v3294_v15  ;;  %v2874_v43 = vpack.c.bf16 %v670_v24, %v670_v24  ;;  %v2876_v32 = vpack.c.bf16 %v678_v58, %v678_v58  ;;  %v495_v33 = vadd.f32 %v3470_v42, %v405_v59  ;;  %v503_v51 = vadd.f32 %v3470_v42, %v413_v53  ;;  %v626_v53 = vld [vmem:[%s4353_s1 + $0x170] sm:$0x1] }
  0x75   : > { %v1710_v29 = vrot.slane %v1708_v55, 5  ;;  %v555_v11 = vmax.f32 %v487_v60, 0.0  ;;  %v683_v37 = vmul.f32 %v615_v45, %v547_v40  ;;  %v1724_v49 = vrot.slane %v1722_v62, 5 }
  0x76   : > { %v1736_v34 = vshll.u32 %v2874_v43, 16  ;;  %v1750_v38 = vshll.u32 %v2876_v32, 16  ;;  %v563_v45 = vmax.f32 %v495_v33, 0.0  ;;  %v571_v52 = vmax.f32 %v503_v51, 0.0 }
  0x77   : > { %v1711_v28 = vsel %vm3764_vm2, %v1706_v8, %v1710_v29  ;;  %3150 = vmatpush3.bf16.msra.mxu0 %v3294_v15  ;;  %v691_v56 = vmul.f32 %v623_v44, %v555_v11  ;;  %v392_v42 = vmul.f32 %v3652_v16, %v302_v54  ;;  %v1725_v55 = vsel %vm3764_vm2, %v1720_v5, %v1724_v49  ;;  %v3298_v15 = vld [vmem:[%s4356_s4 + $0x1a0] sm:$0xff]   ;;  %v3295_v44 = vld [vmem:[%s4356_s4 + $0x1f0] sm:$0xff]  }
  0x78   : > { %3151 = vmatprep.subr.bf16.mxu0 %v3296_v14  ;;  %v1738_v24 = vrot.slane %v1736_v34, 5  ;;  %v1752_v8 = vrot.slane %v1750_v38, 5  ;;  %v400_v58 = vmul.f32 %v3652_v16, %v310_v10  ;;  %v2736_v60 = vcombine.low %v1711_v28, %v1725_v55  ;;  %v618_v5 = vld [vmem:[%s4353_s1 + $0x130] sm:$0x1] }
  0x79   : > { %v2867_v40 = vpack.c.bf16 %v691_v56, %v683_v37  ;;  %v699_v59 = vmul.f32 %v631_v26, %v563_v45  ;;  %v707_v54 = vmul.f32 %v639_v41, %v571_v52  ;;  %v318_v10 = vld [vmem:[%s3406_s24 + $0x1b0] sm:$0x1]  ;;  %v482_v43 = vadd.f32 %v3663_v30, %v392_v42  ;;  %v3300_v26 = vld [vmem:[%s4356_s4 + $0x198] sm:$0xff]  }
  0x7a   : > { %v1739_v29 = vsel %vm3764_vm2, %v1734_v12, %v1738_v24  ;;  %v1753_v62 = vsel %vm3764_vm2, %v1748_v22, %v1752_v8  ;;  %v490_v32 = vadd.f32 %v3663_v30, %v400_v58  ;;  %v326_v11 = vld [vmem:[%s3406_s24 + $0x1f0] sm:$0x1]  ;;  %v1800_v37 = vshll.u32 %v4019_v39, 16  ;;  %3139 = vmatprep.mubr.bf16.mxu1 %v2736_v60 }
  0x7b   : > { %3152 = vmatpush3.bf16.msra.mxu0 %v3296_v14  ;;  %v2737_v33 = vcombine.low %v1739_v29, %v1753_v62  ;;  %3119 = vmatprep.mubr.bf16.mxu0 %v2867_v40  ;;  %v2868_v51 = vpack.c.bf16 %v707_v54, %v699_v59  ;;  %v550_v12 = vmax.f32 %v482_v43, 0.0  ;;  %v1761_v22 = vor.u32 %v4031_v61, %v4026_v18 }
  0x7c   : > { %v558_v28 = vmax.f32 %v490_v32, 0.0  ;;  %v408_v49 = vmul.f32 %v3652_v16, %v318_v10  ;;  %3153 = vmatprep.subr.bf16.mxu0 %v3298_v15  ;;  %v4374_v14 = vshrl.u32 %v4012_v36, 16  ;;  %v4375_v38 = vshll.u32 %v4012_v36, 16  ;;  %v3297_v36 = vld [vmem:[%s4356_s4 + $0x1e8] sm:$0xff]  }
  0x7d   : > { %3140 = vmatmul.mubr.bf16.vlgmr.msra.gmra.mxu1 %v2737_v33  ;;  %3120 = vmatmul.mubr.bf16.gmra.mxu0 %v2868_v51  ;;  %v1775_v56 = vor.u32 %v4035_v20, %v4033_v0  ;;  %v416_v45 = vmul.f32 %v3652_v16, %v326_v11  ;;  %v686_v52 = vmul.f32 %v618_v5, %v550_v12  ;;  %v4376_v42 = vshrl.u32 %v4019_v39, 16  ;;  %v634_v16 = vld [vmem:[%s4353_s1 + $0x1b0] sm:$0x1] }
  0x7e   : > { %v1785_v34 = vrot.slane %v4374_v14, 4  ;;  %v1788_v41 = vrot.slane %v4375_v38, 5  ;;  %3172 = vmatpush3.bf16.msra.mxu1 %v4024_v50  ;;  %v694_v18 = vmul.f32 %v626_v53, %v558_v28  ;;  %v498_v61 = vadd.f32 %v3663_v30, %v408_v49  ;;  %v3302_v50 = vld [vmem:[%s4356_s4 + $0x190] sm:$0xff]   ;;  %v3301_v14 = vld [vmem:[%s4356_s4 + $0x1d8] sm:$0xff]  }
  0x7f   : > { %3154 = vmatpush3.bf16.msra.mxu0 %v3298_v15  ;;  %v1799_v55 = vrot.slane %v4376_v42, 4  ;;  %v1802_v24 = vrot.slane %v1800_v37, 5  ;;  %3173 = vmatprep.subr.bf16.mxu1 %v3295_v44  ;;  %v506_v0 = vadd.f32 %v3663_v30, %v416_v45  ;;  %v2878_v20 = vpack.c.bf16 %v686_v52, %v686_v52  ;;  %v642_v15 = vld [vmem:[%s4353_s1 + $0x1f0] sm:$0x1] }
  0x80   : > { %3155 = vmatprep.subr.bf16.mxu0 %v3300_v26  ;;  %v2880_v39 = vpack.c.bf16 %v694_v18, %v694_v18  ;;  %v1762_v8 = vrot.slane %v1761_v22, 4  ;;  %v566_v58 = vmax.f32 %v498_v61, 0.0  ;;  %v4377_v30 = vpack.c.bf16 %v3519_v17, %v3506_v6  ;;  %v3299_v6 = vld [vmem:[%s4356_s4 + $0x1e0] sm:$0xff]   ;;  %v3304_v17 = vld [vmem:[%s4356_s4 + $0x188] sm:$0xff]   ;;  %v3303_v18 = vld [vmem:[%s4356_s4 + $0x1d0] sm:$0xff]  }
  0x81   : > { %v574_v60 = vmax.f32 %v506_v0, 0.0  ;;  %v1789_v40 = vor.u32 %v1788_v41, %v1785_v34  ;;  %v2822_v59 = vcombine.low %v3801_v63, %v3811_v3  ;;  %v2824_v54 = vcombine.low %v3913_v46, %v3943_v48  ;;  %v3306_v34 = vld [vmem:[%s4356_s4 + $0x180] sm:$0xff]   ;;  %v3308_v61 = vld [vmem:[%s4356_s4 + $0x238] sm:$0xff]   ;;  %v3310_v0 = vld [vmem:[%s4356_s4 + $0x228] sm:$0xff]  }
  0x82   : > { %3163 = vmatprep.mubr.bf16.mxu0 %v4377_v30  ;;  %3174 = vmatpush3.bf16.msra.mxu1 %v3295_v44  ;;  %v1764_v5 = vshll.u32 %v2878_v20, 16  ;;  %v1776_v53 = vrot.slane %v1775_v56, 4  ;;  %v1778_v10 = vshll.u32 %v2880_v39, 16  ;;  %v702_v29 = vmul.f32 %v634_v16, %v566_v58  ;;  %v3307_v16 = vld [vmem:[%s4356_s4 + $0x1c0] sm:$0xff]   ;;  %v4384_v20 = vld [vmem:[#allocation4_spill] sm:$0xff] }
  0x83   : > { %3156 = vmatpush3.bf16.msra.mxu0 %v3300_v26  ;;  %3175 = vmatprep.subr.bf16.mxu1 %v3297_v36  ;;  %v710_v62 = vmul.f32 %v642_v15, %v574_v60  ;;  %v1803_v43 = vor.u32 %v1802_v24, %v1799_v55  ;;  %v1790_v26 = vrot.slane %v1789_v40, 4  ;;  %v4378_v42 = vpack.c.bf16 %v3508_v7, %v3504_v4  ;;  %v329_v55 = vld [vmem:[%s3406_s24 + $0x208] sm:$0xff]  ;;  %v4387_v58 = vld [vmem:[#allocation6_spill] sm:$0xff] }
  0x84   : > { %3157 = vmatprep.subr.bf16.mxu0 %v3302_v50  ;;  %v1766_v32 = vrot.slane %v1764_v5, 5  ;;  %v1780_v11 = vrot.slane %v1778_v10, 5  ;;  %v2882_v44 = vpack.c.bf16 %v702_v29, %v702_v29  ;;  %v3305_v24 = vld [vmem:[%s4356_s4 + $0x1c8] sm:$0xff]   ;;  %v4380_v4 = vpack.c.bf16 %v3658_v27, %v3635_v2 }
  0x85   : > { %v2884_v37 = vpack.c.bf16 %v710_v62, %v710_v62  ;;  %v1804_v22 = vrot.slane %v1803_v43, 4  ;;  %v419_v7 = vmul.f32 %v3427_v21, %v329_v55  ;;  %v3311_v21 = vld [vmem:[%s4356_s4 + $0x220] sm:$0xff]   ;;  %v2891_v27 = vpack.c.bf16 %v3645_v13, %v3625_v57  ;;  %v3313_v57 = vld [vmem:[%s4356_s4 + $0x210] sm:$0xff]  }
  0x86   : > { %v1767_v33 = vsel %vm3764_vm2, %v1762_v8, %v1766_v32  ;;  %v1781_v51 = vsel %vm3764_vm2, %v1776_v53, %v1780_v11  ;;  %3176 = vmatpush3.bf16.msra.mxu1 %v3297_v36  ;;  %v1792_v12 = vshll.u32 %v2882_v44, 16  ;;  %v4379_v36 = vpack.c.bf16 %v3633_v1, %v3521_v19  ;;  %v4382_v13 = vld [vmem:[#allocation2_spill] sm:$0xff]  ;;  %v4386_v8 = vld [vmem:[#allocation5_spill] sm:$0xff] }
  0x87   : > { %3158 = vmatpush3.bf16.msra.mxu0 %v3302_v50  ;;  %v2738_v28 = vcombine.low %v1767_v33, %v1781_v51  ;;  %v1806_v49 = vshll.u32 %v2884_v37, 16  ;;  %3177 = vmatprep.subr.bf16.mxu1 %v3299_v6  ;;  %v2888_v19 = vpack.c.bf16 %v3908_v35, %v3667_v31  ;;  %v509_v1 = vadd.f32 %v3441_v25, %v419_v7  ;;  %v645_v25 = vld [vmem:[%s4353_s1 + $0x208] sm:$0xff]  ;;  %v3312_v31 = vld [vmem:[%s4356_s4 + $0x218] sm:$0xff]  }
  0x88   : > { %3159 = vmatprep.subr.bf16.mxu0 %v3304_v17  ;;  %v1794_v38 = vrot.slane %v1792_v12, 5  ;;  %v4381_v35 = vpack.c.bf16 %v3617_v47, %v3510_v9  ;;  %v3314_v9 = vld [vmem:[%s4356_s4 + $0x208] sm:$0xff]   ;;  %v3315_v47 = vld [vmem:[%s4356_s4 + $0x200] sm:$0xff]   ;;  %v4388_v46 = vcombine.low %v4386_v8, %v4387_v58 }
  0x89   : > { %3143 = vmatprep.mubr.bf16.mxu1 %v2738_v28  ;;  %v1808_v41 = vrot.slane %v1806_v49, 5  ;;  %v577_v2 = vmax.f32 %v509_v1, 0.0  ;;  %v4383_v50 = vld [vmem:[#allocation3_spill] sm:$0xff] }
  0x8a   : > { %v1795_v56 = vsel %vm3764_vm2, %v1790_v26, %v1794_v38  ;;  %3178 = vmatpush3.bf16.msra.mxu1 %v3299_v6  ;;  %v4385_v39 = vcombine.low %v4383_v50, %v4384_v20 }
  0x8b   : > { %3160 = vmatpush3.bf16.msra.mxu0 %v3304_v17  ;;  %v1809_v45 = vsel %vm3764_vm2, %v1804_v22, %v1808_v41  ;;  %3179 = vmatprep.subr.bf16.mxu1 %v3301_v14  ;;  %v713_v63 = vmul.f32 %v645_v25, %v577_v2 }
  0x8c   : > { %3161 = vmatprep.subr.bf16.mxu0 %v3306_v34  ;;  %v2739_v52 = vcombine.low %v1795_v56, %v1809_v45 }
  0x8d   : > { %v2892_v3 = vpack.c.bf16 %v713_v63, %v4382_v13 }
  0x8e   : > { %3144 = vmatmul.mubr.bf16.gmra.mxu1 %v2739_v52 }
  0x8f   : > { %3162 = vmatpush3.bf16.msra.mxu0 %v3306_v34  ;;  %3180 = vmatpush3.bf16.msra.mxu1 %v3301_v14 }
  0x90   : > { %3187 = vmatprep.mubr.bf16.mxu1 %v4378_v42  ;;  %3181 = vmatprep.subr.bf16.mxu1 %v3303_v18 }
  0x91   : > { %3195 = vmatprep.subr.bf16.mxu0 %v3308_v61 }
  0x92   : > { %3164 = vmatmul.mubr.bf16.vlgmr.msra.gmra.mxu0 %v4379_v36 }
  0x93   : > { %3196 = vmatpush3.bf16.msra.mxu0 %v3308_v61  ;;  %3167 = vmatprep.mubr.bf16.mxu0 %v4380_v4 }
  0x94   : > { %3182 = vmatpush3.bf16.msra.mxu1 %v3303_v18  ;;  %3197 = vmatprep.subr.bf16.mxu0 %v3309_v23 }
  0x95   : > { %3183 = vmatprep.subr.bf16.mxu1 %v3305_v24 }
  0x97   : > { %3198 = vmatpush3.bf16.msra.mxu0 %v3309_v23 }
  0x98   : > { %3184 = vmatpush3.bf16.msra.mxu1 %v3305_v24  ;;  %3199 = vmatprep.subr.bf16.mxu0 %v3310_v0 }
  0x99   : > { %3185 = vmatprep.subr.bf16.mxu1 %v3307_v16 }
  0x9a   : > { %3168 = vmatmul.mubr.bf16.gmra.mxu0 %v2888_v19 }
  0x9b   : > { %3200 = vmatpush3.bf16.msra.mxu0 %v3310_v0  ;;  %3211 = vmatprep.mubr.bf16.mxu0 %v2822_v59 }
  0x9c   : > { %3186 = vmatpush3.bf16.msra.mxu1 %v3307_v16  ;;  %3201 = vmatprep.subr.bf16.mxu0 %v3311_v21 }
  0x9d   : > { %3219 = vmatprep.subr.bf16.mxu1 %v3308_v61 }
  0x9f   : > { %3188 = vmatmul.mubr.bf16.vlgmr.msra.gmra.mxu1 %v4381_v35  ;;  %3202 = vmatpush3.bf16.msra.mxu0 %v3311_v21 }
  0xa0   : > { %3227 = vmatpush3.bf16.msra.mxu1 %v3308_v61  ;;  %3191 = vmatprep.mubr.bf16.mxu1 %v2891_v27 }
  0xa1   : > { %3220 = vmatprep.subr.bf16.mxu1 %v3309_v23  ;;  %3203 = vmatprep.subr.bf16.mxu0 %v3312_v31 }
  0xa3   : > { %3204 = vmatpush3.bf16.msra.mxu0 %v3312_v31 }
  0xa4   : > { %3228 = vmatpush3.bf16.msra.mxu1 %v3309_v23  ;;  %3205 = vmatprep.subr.bf16.mxu0 %v3313_v57 }
  0xa5   : > { %3221 = vmatprep.subr.bf16.mxu1 %v3310_v0 }
  0xa7   : > { %3192 = vmatmul.mubr.bf16.gmra.mxu1 %v2892_v3  ;;  %3206 = vmatpush3.bf16.msra.mxu0 %v3313_v57 }
  0xa8   : > { %3229 = vmatpush3.bf16.msra.mxu1 %v3310_v0  ;;  %3207 = vmatprep.subr.bf16.mxu0 %v3314_v9 }
  0xa9   : > { %3222 = vmatprep.subr.bf16.mxu1 %v3311_v21  ;;  %3215 = vmatprep.mubr.bf16.mxu1 %v2824_v54 }
  0xab   : > { %3208 = vmatpush3.bf16.msra.mxu0 %v3314_v9 }
  0xac   : > { %3230 = vmatpush3.bf16.msra.mxu1 %v3311_v21  ;;  %3209 = vmatprep.subr.bf16.mxu0 %v3315_v47 }
  0xad   : > { %3223 = vmatprep.subr.bf16.mxu1 %v3312_v31 }
  0xaf   : > { %3210 = vmatpush3.bf16.msra.mxu0 %v3315_v47 }
  0xb0   : > { %3231 = vmatpush3.bf16.msra.mxu1 %v3312_v31 }
  0xb1   : > { %3224 = vmatprep.subr.bf16.mxu1 %v3313_v57 }
  0xb2   : > { %3212 = vmatmul.mubr.bf16.vlgmr.msra.gmra.mxu0 %v4385_v39 }
  0xb4   : > { %3232 = vmatpush3.bf16.msra.mxu1 %v3313_v57 }
  0xb5   : > { %3225 = vmatprep.subr.bf16.mxu1 %v3314_v9 }
  0xb8   : > { %3233 = vmatpush3.bf16.msra.mxu1 %v3314_v9 }
  0xb9   : > { %3226 = vmatprep.subr.bf16.mxu1 %v3315_v47 }
  0xbc   : > { %3234 = vmatpush3.bf16.msra.mxu1 %v3315_v47 }
  0xbf   : > { %3216 = vmatmul.mubr.bf16.vlgmr.msra.gmra.mxu1 %v4388_v46 }
  0xec   : > { %v3021_v48 = vpop.f32.mrf.mxu0 }
  0xed   : > { %v3045_v40 = vpop.f32.mrf.mxu1 }
  0xee   : > { %v889_v15 = vpop.f32.mrf.mxu0  ;;  %v1035_v31 = vadd.f32 %v3045_v40, %v3021_v48 }
  0xef   : > { %v1026_v54 = vpop.f32.mrf.mxu1 }
  0xf0   : > { %v3022_v30 = vpop.f32.mrf.mxu0  ;;  %v1027_v57 = vadd.f32 %v1026_v54, %v889_v15 }
  0xf1   : > { %v3046_v53 = vpop.f32.mrf.mxu1 }
  0xf2   : > { %v892_v60 = vpop.f32.mrf.mxu0  ;;  %v1038_v9 = vadd.f32 %v3046_v53, %v3022_v30 }
  0xf3   : > { %v1029_v29 = vpop.f32.mrf.mxu1 }
  0xf4   : > { %v1030_v20 = vadd.f32 %v1029_v29, %v892_v60 }
  0xf5   : > { %v3049_v43 = vpop.f32.mrf.mxu1 }
  0xf7   : > { %v4273_v17 = vpop.f32.mrf.mxu1 }
  0xf9   : > { %v4275_v11 = vpop.f32.mrf.mxu1 }
  0xfb   : > { %v4265_v59 = vpop.f32.mrf.mxu0  ;;  %v4277_v37 = vpop.f32.mrf.mxu1 }
  0xfc   : > { %v1051_v30 = vadd.f32 %v3049_v43, %v4265_v59 }
  0xfd   : > { %v4267_v5 = vpop.f32.mrf.mxu0 }
  0xff   : > { %v4269_v10 = vpop.f32.mrf.mxu0 }
 0x101   : > { %v4271_v62 = vpop.f32.mrf.mxu0 }
 0x102   : > { %v1046_v59 = vadd.f32 %v4277_v37, %v4271_v62 }
 0x10c   : > { %v3069_v6 = vpop.f32.mrf.mxu0 }
 0x10d   : > { %v3093_v51 = vpop.f32.mrf.mxu1  ;;  %v1344_v13 = vadd.f32 %v3069_v6, %v1035_v31 }
 0x10e   : > { %v1311_v32 = vpop.f32.mrf.mxu0 }
 0x10f   : > { %v1473_v12 = vpop.f32.mrf.mxu1  ;;  %v1342_v47 = vadd.f32 %v1311_v32, %v1027_v57  ;;  %v1506_v39 = vadd.f32 %v3093_v51, %v1344_v13 }
 0x110   : > { %v3070_v44 = vpop.f32.mrf.mxu0 }
 0x111   : > { %v3094_v22 = vpop.f32.mrf.mxu1  ;;  %v1345_v8 = vadd.f32 %v3070_v44, %v1038_v9  ;;  %v1504_v46 = vadd.f32 %v1473_v12, %v1342_v47  ;;  %v1043_v44 = vadd.f32 %v4273_v17, %v4267_v5 }
 0x112   : > { %v1314_v33 = vpop.f32.mrf.mxu0 }
 0x113   : > { %v1476_v14 = vpop.f32.mrf.mxu1 }
 0x122   : > { %v3073_v26 = vpop.f32.mrf.mxu0 }
 0x124   : > { %v1327_v28 = vpop.f32.mrf.mxu0 }
 0x126   : > { %v4279_v49 = vpop.f32.mrf.mxu0 }
 0x128   : > { %v4281_v34 = vpop.f32.mrf.mxu0  ;;  %v4283_v38 = vpop.f32.mrf.mxu1 }
 0x129   : > { %v1347_v17 = vadd.f32 %v4281_v34, %v1046_v59 }
 0x12a   : > { %v4285_v56 = vpop.f32.mrf.mxu1 }
 0x12c   : > { %v4287_v52 = vpop.f32.mrf.mxu1 }
 0x12e   : > { %v4289_v61 = vpop.f32.mrf.mxu1 }
 0x132   : > { %v3117_v41 = vpop.f32.mrf.mxu0 }
 0x134   : > { %v1635_v45 = vpop.f32.mrf.mxu0 }
 0x135   : > { %v1666_v48 = vadd.f32 %v1635_v45, %v1504_v46 }
 0x136   : > { %v3118_v18 = vpop.f32.mrf.mxu0 }
 0x138   : > { %v1638_v42 = vpop.f32.mrf.mxu0 }
 0x13d   : > { %v3141_v23 = vpop.f32.mrf.mxu1  ;;  %v4291_v55 = vpop.f32.mrf.mxu0 }
 0x13f   : > { %v1925_v24 = vpop.f32.mrf.mxu1  ;;  %v4293_v36 = vpop.f32.mrf.mxu0 }
 0x140   : > { %v1956_v6 = vadd.f32 %v1925_v24, %v1666_v48 }
 0x141   : > { %v3142_v4 = vpop.f32.mrf.mxu1  ;;  %v4295_v7 = vpop.f32.mrf.mxu0 }
 0x142   : > { %4389 = vst [vmem:[#allocation2_spill] sm:$0xff] %v4295_v7  ;;  %v1507_v7 = vadd.f32 %v3094_v22, %v1345_v8  ;;  %v1054_v22 = vadd.f32 %v4275_v11, %v4269_v10 }
 0x143   : > { %v1928_v0 = vpop.f32.mrf.mxu1  ;;  %v4297_v16 = vpop.f32.mrf.mxu0 }
 0x144   : > { %4390 = vst [vmem:[#allocation3_spill] sm:$0xff] %v4297_v16  ;;  %v1668_v16 = vadd.f32 %v3117_v41, %v1506_v39  ;;  %v1669_v54 = vadd.f32 %v3118_v18, %v1507_v7  ;;  %v1349_v5 = vadd.f32 %v4279_v49, %v1054_v22 }
 0x146   : > { %v1958_v15 = vadd.f32 %v3141_v23, %v1668_v16  ;;  %v1959_v51 = vadd.f32 %v3142_v4, %v1669_v54  ;;  %v1511_v7 = vadd.f32 %v4287_v52, %v1349_v5  ;;  %v1509_v16 = vadd.f32 %v4289_v61, %v1347_v17 }
 0x14b   : > { %v4395_v31 = vld [vmem:[#allocation3_spill] sm:$0xff] }
 0x14e   : > { %v4299_v19 = vpop.f32.mrf.mxu1 }
 0x150   : > { %v4301_v21 = vpop.f32.mrf.mxu1 }
 0x151   : > { %4391 = vst [vmem:[#allocation4_spill] sm:$0xff] %v4301_v21  ;;  %v1343_v21 = vadd.f32 %v1314_v33, %v1030_v20  ;;  %v1348_v33 = vadd.f32 %v3073_v26, %v1051_v30 }
 0x152   : > { %v3165_v1 = vpop.f32.mrf.mxu0  ;;  %v4303_v27 = vpop.f32.mrf.mxu1 }
 0x153   : > { %4392 = vst [vmem:[#allocation5_spill] sm:$0xff] %v4303_v27  ;;  %v2106_v60 = vadd.f32 %v3165_v1, %v1958_v15  ;;  %v1510_v23 = vadd.f32 %v4283_v38, %v1348_v33 }
 0x154   : > { %v2073_v2 = vpop.f32.mrf.mxu0  ;;  %v4305_v35 = vpop.f32.mrf.mxu1 }
 0x155   : > { %4393 = vst [vmem:[#allocation6_spill] sm:$0xff] %v4305_v35  ;;  %v1505_v35 = vadd.f32 %v1476_v14, %v1343_v21  ;;  %v2104_v12 = vadd.f32 %v2073_v2, %v1956_v6  ;;  %v1346_v14 = vadd.f32 %v1327_v28, %v1043_v44  ;;  %v1672_v28 = vadd.f32 %v4291_v55, %v1510_v23  ;;  %v4394_v55 = vld [vmem:[#allocation2_spill] sm:$0xff] }
 0x156   : > { %v3166_v25 = vpop.f32.mrf.mxu0  ;;  %v1673_v2 = vadd.f32 %v4394_v55, %v1511_v7 }
 0x157   : > { %v1667_v32 = vadd.f32 %v1638_v42, %v1505_v35  ;;  %v2107_v18 = vadd.f32 %v3166_v25, %v1959_v51  ;;  %v1508_v26 = vadd.f32 %v4285_v56, %v1346_v14  ;;  %v1962_v56 = vadd.f32 %v4299_v19, %v1672_v28 }
 0x158   : > { %v2076_v63 = vpop.f32.mrf.mxu0  ;;  %v1671_v35 = vadd.f32 %v4395_v31, %v1509_v16  ;;  %v4396_v52 = vld [vmem:[#allocation4_spill] sm:$0xff] }
 0x159   : > { %v1957_v43 = vadd.f32 %v1928_v0, %v1667_v32  ;;  %v1670_v0 = vadd.f32 %v4293_v36, %v1508_v26 }
 0x15a   : > { %v4307_v50 = vpop.f32.mrf.mxu0  ;;  %v4397_v47 = vld [vmem:[#allocation5_spill] sm:$0xff] }
 0x15b   : > { %v2105_v62 = vadd.f32 %v2076_v63, %v1957_v43  ;;  %v1960_v13 = vadd.f32 %v4396_v52, %v1670_v0  ;;  %v2110_v36 = vadd.f32 %v4307_v50, %v1962_v56  ;;  %v1963_v20 = vadd.f32 %v4397_v47, %v1673_v2 }
 0x15c   : > { %v2089_v27 = vpop.f32.mrf.mxu0  ;;  %v4398_v19 = vld [vmem:[#allocation6_spill] sm:$0xff] }
 0x15d   : > { %v2108_v39 = vadd.f32 %v2089_v27, %v1960_v13  ;;  %v1961_v8 = vadd.f32 %v4398_v19, %v1671_v35 }
 0x15e   : > { %v3170_v53 = vpop.f32.mrf.mxu0 }
 0x15f   : > { %v3189_v3 = vpop.f32.mrf.mxu1  ;;  %v2111_v54 = vadd.f32 %v3170_v53, %v1963_v20 }
 0x160   : > { %v2092_v41 = vpop.f32.mrf.mxu0  ;;  %v2254_v45 = vadd.f32 %v3189_v3, %v2106_v60 }
 0x161   : > { %v2221_v58 = vpop.f32.mrf.mxu1  ;;  %v2109_v30 = vadd.f32 %v2092_v41, %v1961_v8 }
 0x162   : > { %v2252_v11 = vadd.f32 %v2221_v58, %v2104_v12 }
 0x163   : > { %v3190_v40 = vpop.f32.mrf.mxu1 }
 0x164   : > { %v2255_v24 = vadd.f32 %v3190_v40, %v2107_v18 }
 0x165   : > { %v2224_v29 = vpop.f32.mrf.mxu1 }
 0x166   : > { %v2253_v1 = vadd.f32 %v2224_v29, %v2105_v62 }
 0x167   : > { %v3193_v42 = vpop.f32.mrf.mxu1 }
 0x168   : > { %v2258_v15 = vadd.f32 %v3193_v42, %v2110_v36 }
 0x169   : > { %v2237_v49 = vpop.f32.mrf.mxu1 }
 0x16a   : > { %v2256_v32 = vadd.f32 %v2237_v49, %v2108_v39 }
 0x16b   : > { %v3194_v63 = vpop.f32.mrf.mxu1 }
 0x16c   : > { %v2259_v33 = vadd.f32 %v3194_v63, %v2111_v54 }
 0x16d   : > { %v2240_v58 = vpop.f32.mrf.mxu1 }
 0x16e   : > { %v2257_v14 = vadd.f32 %v2240_v58, %v2109_v30 }
 0x172   : > { %v3213_v10 = vpop.f32.mrf.mxu0 }
 0x173   : > { %v2418_v37 = vadd.f32 %v3213_v10, %v2254_v45 }
 0x174   : > { %v2385_v38 = vpop.f32.mrf.mxu0 }
 0x175   : > { %2426 = vst [vmem:[%s4322_s26 + $0x10] sm:$0xff] %v2418_v37  ;;  %v2416_v4 = vadd.f32 %v2385_v38, %v2252_v11  ;;  %v2447_v46 = vmul.f32 %v2418_v37, %v2418_v37 }
 0x176   : > { %v3214_v34 = vpop.f32.mrf.mxu0 }
 0x177   : > { %2424 = vst [vmem:[%s4322_s26] sm:$0xff] %v2416_v4  ;;  %v2419_v21 = vadd.f32 %v3214_v34, %v2255_v24  ;;  %v2445_v3 = vmul.f32 %v2416_v4, %v2416_v4 }
 0x178   : > { %v2388_v25 = vpop.f32.mrf.mxu0 }
 0x179   : > { %2427 = vst [vmem:[%s4322_s26 + $0x18] sm:$0xff] %v2419_v21  ;;  %v2417_v57 = vadd.f32 %v2388_v25, %v2253_v1  ;;  %v2448_v29 = vmul.f32 %v2419_v21, %v2419_v21 }
 0x17b   : > { %2425 = vst [vmem:[%s4322_s26 + $0x8] sm:$0xff] %v2417_v57  ;;  %v2432_v61 = vadd.f32 %v2417_v57, %v2416_v4  ;;  %v2446_v9 = vmul.f32 %v2417_v57, %v2417_v57 }
 0x17d   : > { %v2433_v48 = vadd.f32 %v2432_v61, %v2418_v37  ;;  %v2453_v40 = vadd.f32 %v2446_v9, %v2445_v3 }
 0x17f   : > { %v3217_v6 = vpop.f32.mrf.mxu1  ;;  %v2454_v50 = vadd.f32 %v2453_v40, %v2447_v46  ;;  %v2434_v44 = vadd.f32 %v2433_v48, %v2419_v21 }
 0x180   : > { %v2422_v60 = vadd.f32 %v3217_v6, %v2258_v15 }
 0x181   : > { %v2401_v27 = vpop.f32.mrf.mxu1  ;;  %v2455_v12 = vadd.f32 %v2454_v50, %v2448_v29 }
 0x182   : > { %2430 = vst [vmem:[%s4322_s26 + $0x30] sm:$0xff] %v2422_v60  ;;  %v2420_v51 = vadd.f32 %v2401_v27, %v2256_v32  ;;  %v2451_v5 = vmul.f32 %v2422_v60, %v2422_v60 }
 0x183   : > { %v3218_v22 = vpop.f32.mrf.mxu1 }
 0x184   : > { %2428 = vst [vmem:[%s4322_s26 + $0x20] sm:$0xff] %v2420_v51  ;;  %v2449_v59 = vmul.f32 %v2420_v51, %v2420_v51  ;;  %v2423_v43 = vadd.f32 %v3218_v22, %v2259_v33  ;;  %v2435_v53 = vadd.f32 %v2434_v44, %v2420_v51 }
 0x185   : > { %v2404_v41 = vpop.f32.mrf.mxu1 }
 0x186   : > { %2431 = vst [vmem:[%s4322_s26 + $0x38] sm:$0xff] %v2423_v43  ;;  %v2421_v45 = vadd.f32 %v2404_v41, %v2257_v14  ;;  %v2456_v18 = vadd.f32 %v2455_v12, %v2449_v59  ;;  %v2452_v11 = vmul.f32 %v2423_v43, %v2423_v43 }
 0x188   : > { %2429 = vst [vmem:[%s4322_s26 + $0x28] sm:$0xff] %v2421_v45  ;;  %v2436_v42 = vadd.f32 %v2435_v53, %v2421_v45  ;;  %v2450_v23 = vmul.f32 %v2421_v45, %v2421_v45 }
 0x18a   : > { %v2437_v10 = vadd.f32 %v2436_v42, %v2422_v60  ;;  %v2457_v17 = vadd.f32 %v2456_v18, %v2450_v23 }
 0x18c   : > { %v2438_v62 = vadd.f32 %v2437_v10, %v2423_v43  ;;  %v2458_v37 = vadd.f32 %v2457_v17, %v2451_v5 }
 0x18e   : > { %v2439_v26 = vrot.slane %v2438_v62, 4  ;;  %v2459_v28 = vadd.f32 %v2458_v37, %v2452_v11 }
 0x190   : > { %v2440_v38 = vadd.f32 %v2439_v26, %v2438_v62  ;;  %v2460_v24 = vrot.slane %v2459_v28, 4 }
 0x192   : > { %v2441_v49 = vrot.slane %v2440_v38, 2  ;;  %v2461_v4 = vadd.f32 %v2460_v24, %v2459_v28 }
 0x194   : > { %v2442_v7 = vadd.f32 %v2441_v49, %v2440_v38  ;;  %v2462_v0 = vrot.slane %v2461_v4, 2 }
 0x196   : > { %v2443_v34 = vrot.slane %v2442_v7, 1  ;;  %v2463_v16 = vadd.f32 %v2462_v0, %v2461_v4 }
 0x198   : > { %v2464_v1 = vrot.slane %v2463_v16, 1  ;;  %v2444_v21 = vadd.f32 %v2443_v34, %v2442_v7 }
 0x19a   : > { %v2465_v56 = vadd.f32 %v2464_v1, %v2463_v16 }
 0x19c   : > { %v2467_v55 = vsel %vm2466_vm3, %v2444_v21, %v2465_v56 }
 0x19d   : > { %2468 = vst [vmem:[%s262_s29] sm:$0x3] %v2467_v55 }
 0x19e PF: > { %s17_s21 = sadd.s32 1, %s3322_s21  }
 0x19f   : > { %p14_p4 = scmp.ge.s32.totalorder %s17_s21, 4  }
 0x1a1   :  { %16 = sbr.rel (!%p14_p4) target bundleno = 1 (0x1), region = 90 }

// kernel: block_forward.6
= control target key start
LH: loop header
LB: loop body
LE: loop exit
PB: predicated region body
PF: predicated region fallthrough
CT: control target
= control target key end

     0   :  { %vm448_vm0 = vcmask 1040384   ;;  %s1244_s3 = inlined_call_operand.vmem [shape: bf16[128,128], index: 3, kind: input, shape index: {}]   ;;  %s1245_s5 = inlined_call_operand.vmem [shape: bf16[128,128], index: 5, kind: input, shape index: {}]   ;;  %s1246_s0 = inlined_call_operand.vmem [shape: f32[128,128], index: 0, kind: input, shape index: {}]   ;;  %s1247_s1 = inlined_call_operand.vmem [shape: f32[1,128], index: 1, kind: input, shape index: {}]   ;;  %s1248_s2 = inlined_call_operand.vmem [shape: f32[1,128], index: 2, kind: input, shape index: {}]   ;;  %s1249_s4 = inlined_call_operand.vmem [shape: bf16[128,128], index: 4, kind: input, shape index: {}]   ;;  %s1250_s6 = inlined_call_operand.vmem [shape: f32[128,128], index: 6, kind: output, shape index: {0}]   ;;  %s1251_s8 = inlined_call_operand.vmem [shape: f32[128,128], index: 8, kind: output, shape index: {2}]   ;;  %s1252_s7 = inlined_call_operand.vmem [shape: f32[1,2,128], index: 7, kind: output, shape index: {1}]   ;;  %s1253_s9 = inlined_call_operand.vmem [shape: f32[1,2,128], index: 9, kind: output, shape index: {3}]  }
   0x1   :  { %v906_v0 = vld [vmem:[%s1244_s3 + $0x38] sm:$0xff]   ;;  %v908_v2 = vld [vmem:[%s1244_s3 + $0x30] sm:$0xff]   ;;  %v910_v4 = vld [vmem:[%s1244_s3 + $0x28] sm:$0xff]  }
   0x2   :  { %v907_v1 = vld [vmem:[%s1245_s5 + $0x38] sm:$0xff]   ;;  %842 = vmatprep.subr.bf16.mxu0 %v906_v0  ;;  %v909_v3 = vld [vmem:[%s1245_s5 + $0x30] sm:$0xff]   ;;  %v911_v5 = vld [vmem:[%s1245_s5 + $0x28] sm:$0xff]  }
   0x3   :  { %874 = vmatprep.subr.bf16.mxu1 %v907_v1  ;;  %843 = vmatpush3.bf16.msra.mxu0 %v906_v0  ;;  %v912_v6 = vld [vmem:[%s1244_s3 + $0x20] sm:$0xff]   ;;  %v914_v8 = vld [vmem:[%s1244_s3 + $0x18] sm:$0xff]   ;;  %v916_v10 = vld [vmem:[%s1244_s3 + $0x10] sm:$0xff]  }
   0x4   :  { %875 = vmatpush3.bf16.msra.mxu1 %v907_v1  ;;  %844 = vmatprep.subr.bf16.mxu0 %v908_v2  ;;  %v913_v7 = vld [vmem:[%s1245_s5 + $0x20] sm:$0xff]   ;;  %v915_v9 = vld [vmem:[%s1245_s5 + $0x18] sm:$0xff]   ;;  %v917_v11 = vld [vmem:[%s1245_s5 + $0x10] sm:$0xff]  }
   0x5   :  { %876 = vmatprep.subr.bf16.mxu1 %v909_v3  ;;  %v79_v12 = vld [vmem:[%s1246_s0] sm:$0xff]  ;;  %v80_v13 = vld [vmem:[%s1246_s0 + $0x8] sm:$0xff]  ;;  %v81_v19 = vld [vmem:[%s1246_s0 + $0x10] sm:$0xff] }
   0x6   :  { %v1025_v14 = vld [vmem:[%s1247_s1] ss:$0 sm:$0xff]  ;;  %v82_v20 = vld [vmem:[%s1246_s0 + $0x18] sm:$0xff]  ;;  %v918_v21 = vld [vmem:[%s1244_s3 + $0x8] sm:$0xff]  }
   0x7   :  { %845 = vmatpush3.bf16.msra.mxu0 %v908_v2  ;;  %v102_v15 = vmul.f32 %v1025_v14, %v79_v12  ;;  %v103_v16 = vmul.f32 %v1025_v14, %v80_v13  ;;  %v1032_v17 = vld [vmem:[%s1248_s2] ss:$0 sm:$0xff]  ;;  %v104_v24 = vmul.f32 %v1025_v14, %v81_v19  ;;  %v105_v25 = vmul.f32 %v1025_v14, %v82_v20  ;;  %v84_v27 = vld [vmem:[%s1246_s0 + $0x28] sm:$0xff]  ;;  %v85_v37 = vld [vmem:[%s1246_s0 + $0x30] sm:$0xff] }
   0x8   :  { %877 = vmatpush3.bf16.msra.mxu1 %v909_v3  ;;  %846 = vmatprep.subr.bf16.mxu0 %v910_v4  ;;  %v922_v18 = vld [vmem:[%s1249_s4] sm:$0xff]   ;;  %v919_v28 = vld [vmem:[%s1245_s5 + $0x8] sm:$0xff]   ;;  %v107_v35 = vmul.f32 %v1025_v14, %v84_v27  ;;  %v86_v38 = vld [vmem:[%s1246_s0 + $0x38] sm:$0xff]  ;;  %v108_v46 = vmul.f32 %v1025_v14, %v85_v37 }
   0x9   :  { %878 = vmatprep.subr.bf16.mxu1 %v911_v5  ;;  %v125_v22 = vadd.f32 %v1032_v17, %v102_v15  ;;  %v126_v23 = vadd.f32 %v1032_v17, %v103_v16  ;;  %v83_v26 = vld [vmem:[%s1246_s0 + $0x20] sm:$0xff]  ;;  %890 = vmatprep.mubr.bf16.mxu1 %v922_v18  ;;  %v127_v32 = vadd.f32 %v1032_v17, %v104_v24  ;;  %v88_v42 = vld [vmem:[%s1246_s0 + $0x48] sm:$0xff]  ;;  %v89_v59 = vld [vmem:[%s1246_s0 + $0x50] sm:$0xff] }
   0xa   :  { %v920_v31 = vld [vmem:[%s1244_s3] sm:$0xff]   ;;  %v128_v33 = vadd.f32 %v1032_v17, %v105_v25  ;;  %v106_v34 = vmul.f32 %v1025_v14, %v83_v26  ;;  %v130_v41 = vadd.f32 %v1032_v17, %v107_v35  ;;  %v109_v47 = vmul.f32 %v1025_v14, %v86_v38  ;;  %v923_v55 = vld [vmem:[%s1249_s4 + $0x8] sm:$0xff]   ;;  %v90_v60 = vld [vmem:[%s1246_s0 + $0x58] sm:$0xff] }
   0xb   :  { %847 = vmatpush3.bf16.msra.mxu0 %v910_v4  ;;  %v141_v29 = vmax.f32 %v125_v22, 0.0  ;;  %v142_v30 = vmax.f32 %v126_v23, 0.0  ;;  %v87_v39 = vld [vmem:[%s1246_s0 + $0x40] sm:$0xff]  ;;  %v143_v44 = vmax.f32 %v127_v32, 0.0  ;;  %v111_v51 = vmul.f32 %v1025_v14, %v88_v42  ;;  %v924_v61 = vld [vmem:[%s1249_s4 + $0x10] sm:$0xff]   ;;  %v92_v63 = vld [vmem:[%s1246_s0 + $0x68] sm:$0xff] }
   0xc   :  { %879 = vmatpush3.bf16.msra.mxu1 %v911_v5  ;;  %848 = vmatprep.subr.bf16.mxu0 %v912_v6  ;;  %v129_v40 = vadd.f32 %v1032_v17, %v106_v34  ;;  %v921_v43 = vld [vmem:[%s1245_s5] sm:$0xff]   ;;  %v144_v45 = vmax.f32 %v128_v33, 0.0  ;;  %v146_v49 = vmax.f32 %v130_v41, 0.0  ;;  %v110_v50 = vmul.f32 %v1025_v14, %v87_v39  ;;  %v93_v16 = vld [vmem:[%s1246_s0 + $0x70] sm:$0xff]  ;;  %v94_v18 = vld [vmem:[%s1246_s0 + $0x78] sm:$0xff] }
   0xd   :  { %880 = vmatprep.subr.bf16.mxu1 %v913_v7  ;;  %v157_v36 = vpack.c.bf16 %v142_v30, %v141_v29  ;;  %v131_v53 = vadd.f32 %v1032_v17, %v108_v46  ;;  %v132_v54 = vadd.f32 %v1032_v17, %v109_v47  ;;  %v134_v58 = vadd.f32 %v1032_v17, %v111_v51  ;;  %v91_v62 = vld [vmem:[%s1246_s0 + $0x60] sm:$0xff]  ;;  %v927_v29 = vld [vmem:[%s1249_s4 + $0x28] sm:$0xff]  }
   0xe   :  { %v145_v48 = vmax.f32 %v129_v40, 0.0  ;;  %v158_v52 = vpack.c.bf16 %v144_v45, %v143_v44  ;;  %v133_v57 = vadd.f32 %v1032_v17, %v110_v50  ;;  %v112_v2 = vmul.f32 %v1025_v14, %v89_v59  ;;  %v926_v19 = vld [vmem:[%s1249_s4 + $0x20] sm:$0xff]  }
   0xf   :  { %849 = vmatpush3.bf16.msra.mxu0 %v912_v6  ;;  %858 = vmatprep.mubr.bf16.mxu0 %v157_v36  ;;  %v147_v0 = vmax.f32 %v131_v53, 0.0  ;;  %v148_v1 = vmax.f32 %v132_v54, 0.0  ;;  %v113_v3 = vmul.f32 %v1025_v14, %v90_v60  ;;  %v150_v5 = vmax.f32 %v134_v58, 0.0 }
  0x10   :  { %881 = vmatpush3.bf16.msra.mxu1 %v913_v7  ;;  %850 = vmatprep.subr.bf16.mxu0 %v914_v8  ;;  %v159_v56 = vpack.c.bf16 %v146_v49, %v145_v48  ;;  %v149_v4 = vmax.f32 %v133_v57, 0.0  ;;  %v114_v6 = vmul.f32 %v1025_v14, %v91_v62  ;;  %v115_v7 = vmul.f32 %v1025_v14, %v92_v63 }
  0x11   :  { %882 = vmatprep.subr.bf16.mxu1 %v915_v9  ;;  %v116_v22 = vmul.f32 %v1025_v14, %v93_v16  ;;  %v117_v23 = vmul.f32 %v1025_v14, %v94_v18 }
  0x12   :  { %v161_v12 = vpack.c.bf16 %v150_v5, %v149_v4  ;;  %v137_v13 = vadd.f32 %v1032_v17, %v114_v6  ;;  %v138_v15 = vadd.f32 %v1032_v17, %v115_v7 }
  0x13   :  { %851 = vmatpush3.bf16.msra.mxu0 %v914_v8  ;;  %v160_v8 = vpack.c.bf16 %v148_v1, %v147_v0  ;;  %v139_v27 = vadd.f32 %v1032_v17, %v116_v22 }
  0x14   :  { %883 = vmatpush3.bf16.msra.mxu1 %v915_v9  ;;  %852 = vmatprep.subr.bf16.mxu0 %v916_v10  ;;  %v135_v9 = vadd.f32 %v1032_v17, %v112_v2  ;;  %v153_v24 = vmax.f32 %v137_v13, 0.0  ;;  %v154_v25 = vmax.f32 %v138_v15, 0.0 }
  0x15   :  { %884 = vmatprep.subr.bf16.mxu1 %v917_v11  ;;  %v155_v14 = vmax.f32 %v139_v27, 0.0 }
  0x16   :  { %v151_v20 = vmax.f32 %v135_v9, 0.0  ;;  %v163_v30 = vpack.c.bf16 %v154_v25, %v153_v24 }
  0x17   :  { %853 = vmatpush3.bf16.msra.mxu0 %v916_v10  ;;  %v136_v10 = vadd.f32 %v1032_v17, %v113_v3 }
  0x18   :  { %885 = vmatpush3.bf16.msra.mxu1 %v917_v11  ;;  %854 = vmatprep.subr.bf16.mxu0 %v918_v21  ;;  %v925_v11 = vld [vmem:[%s1249_s4 + $0x18] sm:$0xff]  }
  0x19   :  { %886 = vmatprep.subr.bf16.mxu1 %v919_v28 }
  0x1b   :  { %855 = vmatpush3.bf16.msra.mxu0 %v918_v21  ;;  %v152_v21 = vmax.f32 %v136_v10, 0.0 }
  0x1c   :  { %887 = vmatpush3.bf16.msra.mxu1 %v919_v28  ;;  %856 = vmatprep.subr.bf16.mxu0 %v920_v31  ;;  %v140_v28 = vadd.f32 %v1032_v17, %v117_v23  ;;  %v929_v17 = vld [vmem:[%s1249_s4 + $0x38] sm:$0xff]  }
  0x1d   :  { %888 = vmatprep.subr.bf16.mxu1 %v921_v43  ;;  %v162_v26 = vpack.c.bf16 %v152_v21, %v151_v20 }
  0x1e   :  { %v156_v32 = vmax.f32 %v140_v28, 0.0 }
  0x1f   :  { %857 = vmatpush3.bf16.msra.mxu0 %v920_v31  ;;  %v928_v31 = vld [vmem:[%s1249_s4 + $0x30] sm:$0xff]  }
  0x20   :  { %889 = vmatpush3.bf16.msra.mxu1 %v921_v43  ;;  %v164_v33 = vpack.c.bf16 %v156_v32, %v155_v14 }
  0x22   :  { %859 = vmatmul.mubr.bf16.vlgmr.msra.gmra.mxu0 %v158_v52 }
  0x23   :  { %891 = vmatmul.mubr.bf16.vlgmr.msra.gmra.mxu1 %v923_v55  ;;  %862 = vmatprep.mubr.bf16.mxu0 %v159_v56 }
  0x24   :  { %894 = vmatprep.mubr.bf16.mxu1 %v924_v61 }
  0x2a   :  { %863 = vmatmul.mubr.bf16.gmra.mxu0 %v160_v8 }
  0x2b   :  { %895 = vmatmul.mubr.bf16.gmra.mxu1 %v925_v11  ;;  %866 = vmatprep.mubr.bf16.mxu0 %v161_v12 }
  0x2c   :  { %898 = vmatprep.mubr.bf16.mxu1 %v926_v19 }
  0x32   :  { %867 = vmatmul.mubr.bf16.gmra.mxu0 %v162_v26 }
  0x33   :  { %899 = vmatmul.mubr.bf16.gmra.mxu1 %v927_v29  ;;  %870 = vmatprep.mubr.bf16.mxu0 %v163_v30 }
  0x34   :  { %902 = vmatprep.mubr.bf16.mxu1 %v928_v31 }
  0x3a   :  { %871 = vmatmul.mubr.bf16.gmra.mxu0 %v164_v33 }
  0x3b   :  { %903 = vmatmul.mubr.bf16.gmra.mxu1 %v929_v17 }
  0xe2   :  { %v860_v34 = vpop.f32.mrf.mxu0 }
  0xe3   :  { %328 = vst [vmem:[%s1250_s6 + $0x10] sm:$0xff] %v860_v34  ;;  %v892_v35 = vpop.f32.mrf.mxu1  ;;  %v413_v49 = vmul.f32 %v860_v34, %v860_v34 }
  0xe4   :  { %678 = vst [vmem:[%s1251_s8 + $0x10] sm:$0xff] %v892_v35  ;;  %v263_v36 = vpop.f32.mrf.mxu0  ;;  %v731_v53 = vmul.f32 %v892_v35, %v892_v35 }
  0xe5   :  { %326 = vst [vmem:[%s1250_s6] sm:$0xff] %v263_v36  ;;  %v613_v37 = vpop.f32.mrf.mxu1  ;;  %v411_v41 = vmul.f32 %v263_v36, %v263_v36 }
  0xe6   :  { %676 = vst [vmem:[%s1251_s8] sm:$0xff] %v613_v37  ;;  %v861_v38 = vpop.f32.mrf.mxu0  ;;  %v729_v45 = vmul.f32 %v613_v37, %v613_v37 }
  0xe7   :  { %329 = vst [vmem:[%s1250_s6 + $0x18] sm:$0xff] %v861_v38  ;;  %v893_v39 = vpop.f32.mrf.mxu1  ;;  %v414_v57 = vmul.f32 %v861_v38, %v861_v38 }
  0xe8   :  { %679 = vst [vmem:[%s1251_s8 + $0x18] sm:$0xff] %v893_v39  ;;  %v266_v40 = vpop.f32.mrf.mxu0  ;;  %v732_v61 = vmul.f32 %v893_v39, %v893_v39 }
  0xe9   :  { %327 = vst [vmem:[%s1250_s6 + $0x8] sm:$0xff] %v266_v40  ;;  %v390_v42 = vadd.f32 %v266_v40, %v263_v36  ;;  %v412_v43 = vmul.f32 %v266_v40, %v266_v40  ;;  %v616_v44 = vpop.f32.mrf.mxu1 }
  0xea   :  { %677 = vst [vmem:[%s1251_s8 + $0x8] sm:$0xff] %v616_v44  ;;  %v708_v46 = vadd.f32 %v616_v44, %v613_v37  ;;  %v730_v47 = vmul.f32 %v616_v44, %v616_v44  ;;  %v864_v48 = vpop.f32.mrf.mxu0 }
  0xeb   :  { %v391_v50 = vadd.f32 %v860_v34, %v390_v42  ;;  %v427_v51 = vadd.f32 %v412_v43, %v411_v41  ;;  %332 = vst [vmem:[%s1250_s6 + $0x30] sm:$0xff] %v864_v48  ;;  %v896_v52 = vpop.f32.mrf.mxu1  ;;  %v417_v19 = vmul.f32 %v864_v48, %v864_v48 }
  0xec   :  { %v709_v54 = vadd.f32 %v892_v35, %v708_v46  ;;  %v745_v55 = vadd.f32 %v730_v47, %v729_v45  ;;  %682 = vst [vmem:[%s1251_s8 + $0x30] sm:$0xff] %v896_v52  ;;  %v279_v56 = vpop.f32.mrf.mxu0  ;;  %v735_v23 = vmul.f32 %v896_v52, %v896_v52 }
  0xed   :  { %v428_v58 = vadd.f32 %v427_v51, %v413_v49  ;;  %330 = vst [vmem:[%s1250_s6 + $0x20] sm:$0xff] %v279_v56  ;;  %v392_v59 = vadd.f32 %v861_v38, %v391_v50  ;;  %v629_v60 = vpop.f32.mrf.mxu1  ;;  %v415_v2 = vmul.f32 %v279_v56, %v279_v56 }
  0xee   :  { %v746_v62 = vadd.f32 %v745_v55, %v731_v53  ;;  %680 = vst [vmem:[%s1251_s8 + $0x20] sm:$0xff] %v629_v60  ;;  %v710_v63 = vadd.f32 %v893_v39, %v709_v54  ;;  %v865_v0 = vpop.f32.mrf.mxu0  ;;  %v733_v6 = vmul.f32 %v629_v60, %v629_v60 }
  0xef   :  { %v393_v1 = vadd.f32 %v392_v59, %v279_v56  ;;  %v429_v3 = vadd.f32 %v428_v58, %v414_v57  ;;  %333 = vst [vmem:[%s1250_s6 + $0x38] sm:$0xff] %v865_v0  ;;  %v897_v4 = vpop.f32.mrf.mxu1  ;;  %v418_v27 = vmul.f32 %v865_v0, %v865_v0 }
  0xf0   :  { %v711_v5 = vadd.f32 %v710_v63, %v629_v60  ;;  %v747_v7 = vadd.f32 %v746_v62, %v732_v61  ;;  %683 = vst [vmem:[%s1251_s8 + $0x38] sm:$0xff] %v897_v4  ;;  %v282_v8 = vpop.f32.mrf.mxu0  ;;  %v736_v31 = vmul.f32 %v897_v4, %v897_v4 }
  0xf1   :  { %v430_v9 = vadd.f32 %v429_v3, %v415_v2  ;;  %331 = vst [vmem:[%s1250_s6 + $0x28] sm:$0xff] %v282_v8  ;;  %v394_v10 = vadd.f32 %v393_v1, %v282_v8  ;;  %v416_v11 = vmul.f32 %v282_v8, %v282_v8  ;;  %v632_v12 = vpop.f32.mrf.mxu1 }
  0xf2   :  { %v748_v13 = vadd.f32 %v747_v7, %v733_v6  ;;  %681 = vst [vmem:[%s1251_s8 + $0x28] sm:$0xff] %v632_v12  ;;  %v712_v15 = vadd.f32 %v711_v5, %v632_v12  ;;  %v734_v16 = vmul.f32 %v632_v12, %v632_v12  ;;  %v868_v18 = vpop.f32.mrf.mxu0 }
  0xf3   :  { %v395_v20 = vadd.f32 %v864_v48, %v394_v10  ;;  %v431_v21 = vadd.f32 %v430_v9, %v416_v11  ;;  %336 = vst [vmem:[%s1250_s6 + $0x50] sm:$0xff] %v868_v18  ;;  %v900_v22 = vpop.f32.mrf.mxu1  ;;  %v421_v49 = vmul.f32 %v868_v18, %v868_v18 }
  0xf4   :  { %v713_v24 = vadd.f32 %v896_v52, %v712_v15  ;;  %v749_v25 = vadd.f32 %v748_v13, %v734_v16  ;;  %686 = vst [vmem:[%s1251_s8 + $0x50] sm:$0xff] %v900_v22  ;;  %v295_v26 = vpop.f32.mrf.mxu0  ;;  %v739_v53 = vmul.f32 %v900_v22, %v900_v22 }
  0xf5   :  { %v432_v28 = vadd.f32 %v431_v21, %v417_v19  ;;  %334 = vst [vmem:[%s1250_s6 + $0x40] sm:$0xff] %v295_v26  ;;  %v396_v29 = vadd.f32 %v865_v0, %v395_v20  ;;  %v645_v30 = vpop.f32.mrf.mxu1  ;;  %v419_v34 = vmul.f32 %v295_v26, %v295_v26 }
  0xf6   :  { %v750_v14 = vadd.f32 %v749_v25, %v735_v23  ;;  %684 = vst [vmem:[%s1251_s8 + $0x40] sm:$0xff] %v645_v30  ;;  %v714_v32 = vadd.f32 %v897_v4, %v713_v24  ;;  %v869_v33 = vpop.f32.mrf.mxu0  ;;  %v737_v38 = vmul.f32 %v645_v30, %v645_v30 }
  0xf7   :  { %v397_v17 = vadd.f32 %v396_v29, %v295_v26  ;;  %v433_v35 = vadd.f32 %v432_v28, %v418_v27  ;;  %337 = vst [vmem:[%s1250_s6 + $0x58] sm:$0xff] %v869_v33  ;;  %v901_v36 = vpop.f32.mrf.mxu1  ;;  %v422_v57 = vmul.f32 %v869_v33, %v869_v33 }
  0xf8   :  { %v715_v37 = vadd.f32 %v714_v32, %v645_v30  ;;  %v751_v39 = vadd.f32 %v750_v14, %v736_v31  ;;  %687 = vst [vmem:[%s1251_s8 + $0x58] sm:$0xff] %v901_v36  ;;  %v298_v40 = vpop.f32.mrf.mxu0  ;;  %v740_v61 = vmul.f32 %v901_v36, %v901_v36 }
  0xf9   :  { %v434_v41 = vadd.f32 %v433_v35, %v419_v34  ;;  %335 = vst [vmem:[%s1250_s6 + $0x48] sm:$0xff] %v298_v40  ;;  %v398_v42 = vadd.f32 %v397_v17, %v298_v40  ;;  %v420_v43 = vmul.f32 %v298_v40, %v298_v40  ;;  %v648_v44 = vpop.f32.mrf.mxu1 }
  0xfa   :  { %v752_v45 = vadd.f32 %v751_v39, %v737_v38  ;;  %685 = vst [vmem:[%s1251_s8 + $0x48] sm:$0xff] %v648_v44  ;;  %v716_v46 = vadd.f32 %v715_v37, %v648_v44  ;;  %v738_v47 = vmul.f32 %v648_v44, %v648_v44  ;;  %v872_v48 = vpop.f32.mrf.mxu0 }
  0xfb   :  { %v399_v50 = vadd.f32 %v868_v18, %v398_v42  ;;  %v435_v51 = vadd.f32 %v434_v41, %v420_v43  ;;  %340 = vst [vmem:[%s1250_s6 + $0x70] sm:$0xff] %v872_v48  ;;  %v904_v52 = vpop.f32.mrf.mxu1  ;;  %v425_v18 = vmul.f32 %v872_v48, %v872_v48 }
  0xfc   :  { %v717_v54 = vadd.f32 %v900_v22, %v716_v46  ;;  %v753_v55 = vadd.f32 %v752_v45, %v738_v47  ;;  %690 = vst [vmem:[%s1251_s8 + $0x70] sm:$0xff] %v904_v52  ;;  %v311_v56 = vpop.f32.mrf.mxu0  ;;  %v743_v21 = vmul.f32 %v904_v52, %v904_v52 }
  0xfd   :  { %v436_v58 = vadd.f32 %v435_v51, %v421_v49  ;;  %338 = vst [vmem:[%s1250_s6 + $0x60] sm:$0xff] %v311_v56  ;;  %v400_v59 = vadd.f32 %v869_v33, %v399_v50  ;;  %v661_v60 = vpop.f32.mrf.mxu1  ;;  %v423_v2 = vmul.f32 %v311_v56, %v311_v56 }
  0xfe   :  { %v754_v62 = vadd.f32 %v753_v55, %v739_v53  ;;  %688 = vst [vmem:[%s1251_s8 + $0x60] sm:$0xff] %v661_v60  ;;  %v718_v63 = vadd.f32 %v901_v36, %v717_v54  ;;  %v873_v0 = vpop.f32.mrf.mxu0  ;;  %v741_v6 = vmul.f32 %v661_v60, %v661_v60 }
  0xff   :  { %v401_v1 = vadd.f32 %v400_v59, %v311_v56  ;;  %v437_v3 = vadd.f32 %v436_v58, %v422_v57  ;;  %341 = vst [vmem:[%s1250_s6 + $0x78] sm:$0xff] %v873_v0  ;;  %v905_v4 = vpop.f32.mrf.mxu1  ;;  %v426_v24 = vmul.f32 %v873_v0, %v873_v0 }
 0x100   :  { %v719_v5 = vadd.f32 %v718_v63, %v661_v60  ;;  %v755_v7 = vadd.f32 %v754_v62, %v740_v61  ;;  %691 = vst [vmem:[%s1251_s8 + $0x78] sm:$0xff] %v905_v4  ;;  %v314_v8 = vpop.f32.mrf.mxu0  ;;  %v744_v27 = vmul.f32 %v905_v4, %v905_v4 }
 0x101   :  { %v438_v9 = vadd.f32 %v437_v3, %v423_v2  ;;  %339 = vst [vmem:[%s1250_s6 + $0x68] sm:$0xff] %v314_v8  ;;  %v402_v10 = vadd.f32 %v401_v1, %v314_v8  ;;  %v424_v11 = vmul.f32 %v314_v8, %v314_v8  ;;  %v664_v12 = vpop.f32.mrf.mxu1 }
 0x102   :  { %v756_v13 = vadd.f32 %v755_v7, %v741_v6  ;;  %689 = vst [vmem:[%s1251_s8 + $0x68] sm:$0xff] %v664_v12  ;;  %v720_v15 = vadd.f32 %v719_v5, %v664_v12  ;;  %v742_v16 = vmul.f32 %v664_v12, %v664_v12 }
 0x103   :  { %v403_v19 = vadd.f32 %v872_v48, %v402_v10  ;;  %v439_v20 = vadd.f32 %v438_v9, %v424_v11 }
 0x104   :  { %v721_v22 = vadd.f32 %v904_v52, %v720_v15  ;;  %v757_v23 = vadd.f32 %v756_v13, %v742_v16 }
 0x105   :  { %v404_v25 = vadd.f32 %v873_v0, %v403_v19  ;;  %v440_v26 = vadd.f32 %v439_v20, %v425_v18 }
 0x106   :  { %v722_v28 = vadd.f32 %v905_v4, %v721_v22  ;;  %v758_v29 = vadd.f32 %v757_v23, %v743_v21 }
 0x107   :  { %v405_v30 = vrot.slane %v404_v25, 4  ;;  %v441_v31 = vadd.f32 %v440_v26, %v426_v24 }
 0x108   :  { %v723_v14 = vrot.slane %v722_v28, 4  ;;  %v759_v32 = vadd.f32 %v758_v29, %v744_v27 }
 0x109   :  { %v406_v33 = vadd.f32 %v405_v30, %v404_v25  ;;  %v442_v17 = vrot.slane %v441_v31, 4 }
 0x10a   :  { %v724_v34 = vadd.f32 %v723_v14, %v722_v28  ;;  %v760_v35 = vrot.slane %v759_v32, 4 }
 0x10b   :  { %v407_v36 = vrot.slane %v406_v33, 2  ;;  %v443_v37 = vadd.f32 %v442_v17, %v441_v31 }
 0x10c   :  { %v725_v38 = vrot.slane %v724_v34, 2  ;;  %v761_v39 = vadd.f32 %v760_v35, %v759_v32 }
 0x10d   :  { %v408_v40 = vadd.f32 %v407_v36, %v406_v33  ;;  %v444_v41 = vrot.slane %v443_v37, 2 }
 0x10e   :  { %v726_v42 = vadd.f32 %v725_v38, %v724_v34  ;;  %v762_v43 = vrot.slane %v761_v39, 2 }
 0x10f   :  { %v409_v44 = vrot.slane %v408_v40, 1  ;;  %v445_v45 = vadd.f32 %v444_v41, %v443_v37 }
 0x110   :  { %v727_v46 = vrot.slane %v726_v42, 1  ;;  %v763_v47 = vadd.f32 %v762_v43, %v761_v39 }
 0x111   :  { %v446_v48 = vrot.slane %v445_v45, 1  ;;  %v410_v50 = vadd.f32 %v409_v44, %v408_v40 }
 0x112   :  { %v764_v49 = vrot.slane %v763_v47, 1  ;;  %v728_v52 = vadd.f32 %v727_v46, %v726_v42 }
 0x113   :  { %v447_v51 = vadd.f32 %v446_v48, %v445_v45 }
 0x114   :  { %v765_v53 = vadd.f32 %v764_v49, %v763_v47 }
 0x115   :  { %v449_v54 = vsel %vm448_vm0, %v410_v50, %v447_v51 }
 0x116   :  { %450 = vst [vmem:[%s1252_s7] sm:$0x3] %v449_v54  ;;  %v766_v55 = vsel %vm448_vm0, %v728_v52, %v765_v53 }
 0x117   :  { %767 = vst [vmem:[%s1253_s9] sm:$0x3] %v766_v55 }

// kernel: block_forward.7
= control target key start
LH: loop header
LB: loop body
LE: loop exit
PB: predicated region body
PF: predicated region fallthrough
CT: control target
= control target key end

     0   :  { %s462_s0 = inlined_call_operand.vmem [shape: f32[128,128], index: 0, kind: input, shape index: {}]   ;;  %s463_s1 = inlined_call_operand.vmem [shape: f32[1,128], index: 1, kind: input, shape index: {}]   ;;  %s464_s2 = inlined_call_operand.vmem [shape: f32[1,128], index: 2, kind: input, shape index: {}]   ;;  %s465_s3 = inlined_call_operand.vmem [shape: f32[128,128], index: 3, kind: input, shape index: {}]   ;;  %s466_s4 = inlined_call_operand.vmem [shape: f32[1,128], index: 4, kind: input, shape index: {}]   ;;  %s467_s5 = inlined_call_operand.vmem [shape: f32[1,128], index: 5, kind: input, shape index: {}]   ;;  %s468_s6 = inlined_call_operand.hbm [shape: f32[128,128], index: 6, kind: output, shape index: {}]  }
   0x1   :  { %v24_v0 = vld [vmem:[%s465_s3] sm:$0xff]  ;;  %v25_v8 = vld [vmem:[%s465_s3 + $0x8] sm:$0xff]  ;;  %v26_v10 = vld [vmem:[%s465_s3 + $0x10] sm:$0xff] }
   0x2   :  { %v285_v1 = vld [vmem:[%s466_s4] ss:$0 sm:$0xff]  ;;  %v87_v9 = vld [vmem:[%s462_s0 + $0x8] sm:$0xff]  ;;  %v88_v15 = vld [vmem:[%s462_s0 + $0x10] sm:$0xff] }
   0x3   :  { %v290_v2 = vld [vmem:[%s467_s5] ss:$0 sm:$0xff]  ;;  %v47_v3 = vmul.f32 %v285_v1, %v24_v0  ;;  %v48_v12 = vmul.f32 %v285_v1, %v25_v8  ;;  %v49_v14 = vmul.f32 %v285_v1, %v26_v10  ;;  %v27_v16 = vld [vmem:[%s465_s3 + $0x18] sm:$0xff]  ;;  %v29_v24 = vld [vmem:[%s465_s3 + $0x28] sm:$0xff] }
   0x4   :  { %v86_v4 = vld [vmem:[%s462_s0] sm:$0xff]  ;;  %v89_v17 = vld [vmem:[%s462_s0 + $0x18] sm:$0xff]  ;;  %v50_v20 = vmul.f32 %v285_v1, %v27_v16  ;;  %v91_v29 = vld [vmem:[%s462_s0 + $0x28] sm:$0xff]  ;;  %v52_v38 = vmul.f32 %v285_v1, %v29_v24 }
   0x5   :  { %v299_v5 = vld [vmem:[%s463_s1] ss:$0 sm:$0xff]  ;;  %v70_v11 = vadd.f32 %v290_v2, %v47_v3  ;;  %v71_v25 = vadd.f32 %v290_v2, %v48_v12  ;;  %v72_v27 = vadd.f32 %v290_v2, %v49_v14  ;;  %v30_v34 = vld [vmem:[%s465_s3 + $0x30] sm:$0xff]  ;;  %v31_v44 = vld [vmem:[%s465_s3 + $0x38] sm:$0xff] }
   0x6   :  { %v304_v6 = vld [vmem:[%s464_s2] ss:$0 sm:$0xff]  ;;  %v109_v7 = vmul.f32 %v299_v5, %v86_v4  ;;  %v110_v13 = vmul.f32 %v299_v5, %v87_v9  ;;  %v111_v19 = vmul.f32 %v299_v5, %v88_v15  ;;  %v112_v21 = vmul.f32 %v299_v5, %v89_v17  ;;  %v92_v39 = vld [vmem:[%s462_s0 + $0x30] sm:$0xff]  ;;  %v93_v45 = vld [vmem:[%s462_s0 + $0x38] sm:$0xff] }
   0x7   :  { %v28_v22 = vld [vmem:[%s465_s3 + $0x20] sm:$0xff]  ;;  %v73_v32 = vadd.f32 %v290_v2, %v50_v20  ;;  %v114_v43 = vmul.f32 %v299_v5, %v91_v29  ;;  %v75_v48 = vadd.f32 %v290_v2, %v52_v38  ;;  %v53_v49 = vmul.f32 %v285_v1, %v30_v34  ;;  %v33_v56 = vld [vmem:[%s465_s3 + $0x48] sm:$0xff]  ;;  %v34_v4 = vld [vmem:[%s465_s3 + $0x50] sm:$0xff] }
   0x8   :  { %v132_v18 = vadd.f32 %v304_v6, %v109_v7  ;;  %v90_v23 = vld [vmem:[%s462_s0 + $0x20] sm:$0xff]  ;;  %v133_v26 = vadd.f32 %v304_v6, %v110_v13  ;;  %v51_v28 = vmul.f32 %v285_v1, %v28_v22  ;;  %v134_v31 = vadd.f32 %v304_v6, %v111_v19  ;;  %v95_v3 = vld [vmem:[%s462_s0 + $0x48] sm:$0xff] }
   0x9   :  { %v135_v33 = vadd.f32 %v304_v6, %v112_v21  ;;  %v113_v37 = vmul.f32 %v299_v5, %v90_v23  ;;  %v32_v50 = vld [vmem:[%s465_s3 + $0x40] sm:$0xff]  ;;  %v137_v54 = vadd.f32 %v304_v6, %v114_v43  ;;  %v115_v55 = vmul.f32 %v299_v5, %v92_v39 }
   0xa   :  { %v148_v30 = vadd.f32 %v132_v18, %v70_v11  ;;  %v149_v35 = vadd.f32 %v133_v26, %v71_v25  ;;  %v74_v36 = vadd.f32 %v290_v2, %v51_v28  ;;  %v150_v41 = vadd.f32 %v134_v31, %v72_v27  ;;  %v94_v51 = vld [vmem:[%s462_s0 + $0x40] sm:$0xff] }
   0xb   :  { %v151_v42 = vadd.f32 %v135_v33, %v73_v32  ;;  %v136_v47 = vadd.f32 %v304_v6, %v113_v37  ;;  %v76_v58 = vadd.f32 %v290_v2, %v53_v49  ;;  %v54_v59 = vmul.f32 %v285_v1, %v31_v44 }
   0xc   :  { %v164_v40 = vmax.f32 %v148_v30, 0.0  ;;  %v165_v46 = vmax.f32 %v149_v35, 0.0  ;;  %v166_v52 = vmax.f32 %v150_v41, 0.0  ;;  %v116_v60 = vmul.f32 %v299_v5, %v93_v45 }
   0xd   :  { %v167_v53 = vmax.f32 %v151_v42, 0.0  ;;  %v152_v57 = vadd.f32 %v136_v47, %v74_v36  ;;  %v153_v61 = vadd.f32 %v137_v54, %v75_v48  ;;  %v138_v62 = vadd.f32 %v304_v6, %v115_v55 }
   0xe   :  { %180 = vst [vmem:[#allocation2] sm:$0xff] %v164_v40  ;;  %181 = vst [vmem:[#allocation2 + $0x8] sm:$0xff] %v165_v46  ;;  %v55_v63 = vmul.f32 %v285_v1, %v32_v50  ;;  %v117_v0 = vmul.f32 %v299_v5, %v94_v51 }
   0xf   :  { %182 = vst [vmem:[#allocation2 + $0x10] sm:$0xff] %v166_v52  ;;  %183 = vst [vmem:[#allocation2 + $0x18] sm:$0xff] %v167_v53 }
  0x10   :  { %11 = vsyncpa [#allocation3], 0  ;;  %v168_v7 = vmax.f32 %v152_v57, 0.0  ;;  %v77_v8 = vadd.f32 %v290_v2, %v54_v59  ;;  %v139_v9 = vadd.f32 %v304_v6, %v116_v60  ;;  %v56_v10 = vmul.f32 %v285_v1, %v33_v56  ;;  %v96_v11 = vld [vmem:[%s462_s0 + $0x50] sm:$0xff]  ;;  %v35_v12 = vld [vmem:[%s465_s3 + $0x58] sm:$0xff] }
  0x11   :  { %v169_v13 = vmax.f32 %v153_v61, 0.0  ;;  %v154_v14 = vadd.f32 %v138_v62, %v76_v58  ;;  %v78_v15 = vadd.f32 %v290_v2, %v55_v63  ;;  %v140_v16 = vadd.f32 %v304_v6, %v117_v0  ;;  %v97_v17 = vld [vmem:[%s462_s0 + $0x58] sm:$0xff]  ;;  %v36_v22 = vld [vmem:[%s465_s3 + $0x60] sm:$0xff]  ;;  %v37_v28 = vld [vmem:[%s465_s3 + $0x68] sm:$0xff] }
  0x12   :  { %184 = vst [vmem:[#allocation2 + $0x20] sm:$0xff] %v168_v7  ;;  %v155_v18 = vadd.f32 %v139_v9, %v77_v8  ;;  %v79_v19 = vadd.f32 %v290_v2, %v56_v10  ;;  %v118_v20 = vmul.f32 %v299_v5, %v95_v3  ;;  %v57_v21 = vmul.f32 %v285_v1, %v34_v4  ;;  %v98_v27 = vld [vmem:[%s462_s0 + $0x60] sm:$0xff]  ;;  %v99_v33 = vld [vmem:[%s462_s0 + $0x68] sm:$0xff]  ;;  %v38_v34 = vld [vmem:[%s465_s3 + $0x70] sm:$0xff] }
  0x13   :  { %185 = vst [vmem:[#allocation2 + $0x28] sm:$0xff] %v169_v13  ;;  %v170_v23 = vmax.f32 %v154_v14, 0.0  ;;  %v156_v24 = vadd.f32 %v140_v16, %v78_v15  ;;  %v119_v25 = vmul.f32 %v299_v5, %v96_v11  ;;  %v58_v26 = vmul.f32 %v285_v1, %v35_v12  ;;  %v100_v43 = vld [vmem:[%s462_s0 + $0x70] sm:$0xff]  ;;  %v39_v48 = vld [vmem:[%s465_s3 + $0x78] sm:$0xff] }
  0x14   :  { %v171_v29 = vmax.f32 %v155_v18, 0.0  ;;  %v141_v30 = vadd.f32 %v304_v6, %v118_v20  ;;  %v80_v31 = vadd.f32 %v290_v2, %v57_v21  ;;  %v120_v32 = vmul.f32 %v299_v5, %v97_v17  ;;  %v101_v49 = vld [vmem:[%s462_s0 + $0x78] sm:$0xff]  ;;  %s241_s0 = smov [#allocation2]  }
  0x15   :  { %186 = vst [vmem:[#allocation2 + $0x30] sm:$0xff] %v170_v23  ;;  %v172_v35 = vmax.f32 %v156_v24, 0.0  ;;  %v142_v36 = vadd.f32 %v304_v6, %v119_v25  ;;  %v81_v37 = vadd.f32 %v290_v2, %v58_v26  ;;  %v59_v38 = vmul.f32 %v285_v1, %v36_v22  ;;  %s201_s3 = sshll.u32 %s241_s0, 4  ;;  %s202_s3 = int_to_ptr.vmem [resolvable:$true] %s201_s3 }
  0x16   :  { %187 = vst [vmem:[#allocation2 + $0x38] sm:$0xff] %v171_v29  ;;  %v157_v39 = vadd.f32 %v141_v30, %v79_v19  ;;  %v143_v40 = vadd.f32 %v304_v6, %v120_v32  ;;  %v121_v41 = vmul.f32 %v299_v5, %v98_v27  ;;  %v60_v42 = vmul.f32 %v285_v1, %v37_v28  ;;  %s219_s11 = scalar_lea.vmem %s202_s3, 2048  ;;  %p224_p1 = scmp.lt.s32.totalorder %s202_s3, %s202_s3 }
  0x17   :  { %188 = vst [vmem:[#allocation2 + $0x40] sm:$0xff] %v172_v35  ;;  %v158_v44 = vadd.f32 %v142_v36, %v80_v31  ;;  %v82_v45 = vadd.f32 %v290_v2, %v59_v38  ;;  %v122_v46 = vmul.f32 %v299_v5, %v99_v33  ;;  %v61_v47 = vmul.f32 %v285_v1, %v38_v34  ;;  %p220_p0 = scmp.ne.s32.totalorder %s202_s3, %s219_s11  ;;  %p225_p2 = scmp.lt.s32.totalorder %s219_s11, %s219_s11 }
  0x18   :  { %v173_v50 = vmax.f32 %v157_v39, 0.0  ;;  %v159_v51 = vadd.f32 %v143_v40, %v81_v37  ;;  %v144_v52 = vadd.f32 %v304_v6, %v121_v41  ;;  %v83_v53 = vadd.f32 %v290_v2, %v60_v42 }
  0x19   :  { %v174_v54 = vmax.f32 %v158_v44, 0.0  ;;  %v145_v55 = vadd.f32 %v304_v6, %v122_v46  ;;  %v84_v56 = vadd.f32 %v290_v2, %v61_v47  ;;  %v123_v57 = vmul.f32 %v299_v5, %v100_v43  ;;  %p226_p3 = por %p225_p2, %p224_p1 }
  0x1a   :  { %189 = vst [vmem:[#allocation2 + $0x48] sm:$0xff] %v173_v50  ;;  %v175_v58 = vmax.f32 %v159_v51, 0.0  ;;  %v160_v59 = vadd.f32 %v144_v52, %v82_v45  ;;  %v62_v60 = vmul.f32 %v285_v1, %v39_v48  ;;  %v124_v61 = vmul.f32 %v299_v5, %v101_v49 }
  0x1b   :  { %190 = vst [vmem:[#allocation2 + $0x50] sm:$0xff] %v174_v54  ;;  %v161_v62 = vadd.f32 %v145_v55, %v83_v53  ;;  %v146_v63 = vadd.f32 %v304_v6, %v123_v57  ;;  %p227_p4 = pnand %p226_p3, %p220_p0 }
  0x1c   :  { %191 = vst [vmem:[#allocation2 + $0x58] sm:$0xff] %v175_v58  ;;  %v176_v0 = vmax.f32 %v160_v59, 0.0  ;;  %v85_v3 = vadd.f32 %v290_v2, %v62_v60  ;;  %v147_v4 = vadd.f32 %v304_v6, %v124_v61 }
  0x1d   :  { %v177_v7 = vmax.f32 %v161_v62, 0.0  ;;  %v162_v8 = vadd.f32 %v146_v63, %v84_v56 }
  0x1e   :  { %192 = vst [vmem:[#allocation2 + $0x60] sm:$0xff] %v176_v0  ;;  %v163_v9 = vadd.f32 %v147_v4, %v85_v3 }
  0x1f   :  { %193 = vst [vmem:[#allocation2 + $0x68] sm:$0xff] %v177_v7  ;;  %v178_v1 = vmax.f32 %v162_v8, 0.0 }
  0x20   :  { %v179_v5 = vmax.f32 %v163_v9, 0.0 }
  0x21   :  { %194 = vst [vmem:[#allocation2 + $0x70] sm:$0xff] %v178_v1 }
  0x22   :  { %195 = vst [vmem:[#allocation2 + $0x78] sm:$0xff] %v179_v5 }
  0x23   :  { %230 = shalt.err (!%p227_p4)
}
  0x24   :  { %s242_s12 = smov 128   ;;  %s243_s1 = smov 8  }
  0x25   :  { %207 = dma.vmem_to_hbm [thread:$0]  %s202_s3, 2048, %s468_s6, [#allocation3], %s242_s12, %s242_s12, %s243_s1  }
  0x26   :  { %239 = dma.done.wait [#allocation3], 2048  }
  0x27   :  { %240 = vsyncadd [#allocation3], 4294965248 }
  0x28   :  { %211 = vsyncpa [#allocation3], 1 }

</bundles_post_ra>
